<compile_context>
chip_gen: v6e
topology: v6e:2x2x1
jax: 0.10.0
libtpu: 0.0.40
codegen_flags: <defaults>
</compile_context>

<pallas_src>
import functools

import jax
import jax.numpy as jnp
from jax.experimental import pallas as pl
from jax.experimental.pallas import tpu as pltpu

NEG_SLOPE = 0.01              # nn.LeakyReLU default
MXU_DTYPE = jnp.bfloat16      # matmul operand dtype (accumulation stays float32)


# ---------------------------------------------------------------------------
# Small helpers used inside kernels
# ---------------------------------------------------------------------------
def _leaky(x):
    return jnp.where(x > 0, x, NEG_SLOPE * x)


def _mm(a, b):
    # MXU matmul, bf16 operands, f32 accumulation.
    return jnp.dot(a.astype(MXU_DTYPE), b.astype(MXU_DTYPE),
                   preferred_element_type=jnp.float32)


def _mm_nt(a, b):
    # a @ b.T on the MXU (trans-B dot_general), bf16 operands, f32 accumulation.
    return jax.lax.dot_general(a.astype(MXU_DTYPE), b.astype(MXU_DTYPE),
                               (((1,), (1,)), ((), ())),
                               preferred_element_type=jnp.float32)


def _mmf(a, b):
    # Small f32 matmul (LayerNorm statistics / per-graph broadcasts): keep full precision.
    return jnp.dot(a, b, preferred_element_type=jnp.float32)


def _vmem_specs(n):
    return [pl.BlockSpec(memory_space=pltpu.MemorySpace.VMEM) for _ in range(n)]


def _vmem_out():
    return pl.BlockSpec(memory_space=pltpu.MemorySpace.VMEM)


# ---------------------------------------------------------------------------
# Fused multi-layer MLP kernel (Linear -> LeakyReLU -> ... -> Linear)
# ---------------------------------------------------------------------------
def _mlp_kernel(*refs, n_layers):
    x_ref, o_ref = refs[0], refs[-1]
    h = x_ref[...]
    for i in range(n_layers):
        w = refs[1 + 2 * i][...]
        b = refs[2 + 2 * i][...]
        h = _mm(h, w) + b
        if i < n_layers - 1:
            h = _leaky(h)
    o_ref[...] = h


def fused_mlp(x, layers):
    """Whole MLP (list of (w, b) with b shaped (1, dout)) in one Pallas call."""
    flat = []
    for w, b in layers:
        flat.extend((w, b))
    dout = layers[-1][0].shape[1]
    return pl.pallas_call(
        functools.partial(_mlp_kernel, n_layers=len(layers)),
        in_specs=_vmem_specs(1 + len(flat)),
        out_specs=_vmem_out(),
        out_shape=jax.ShapeDtypeStruct((x.shape[0], dout), jnp.float32),
    )(jnp.asarray(x, jnp.float32), *flat)


# ---------------------------------------------------------------------------
# Global mean pool kernel
# ---------------------------------------------------------------------------
def _pool_kernel(bt_ref, x_ref, invc_ref, o_ref):
    o_ref[...] = _mmf(bt_ref[...], x_ref[...]) * invc_ref[...]


def mean_pool(bt, x, inv_cnt):
    return pl.pallas_call(
        _pool_kernel,
        in_specs=_vmem_specs(3),
        out_specs=_vmem_out(),
        out_shape=jax.ShapeDtypeStruct((bt.shape[0], x.shape[1]), jnp.float32),
    )(bt, x, inv_cnt)


# ---------------------------------------------------------------------------
# Fused transformer layer kernel (the hot loop): one pallas_call per layer.
# ---------------------------------------------------------------------------
def _layer_kernel(o_ref, c_ref, e_ref, src_oh_ref, dstT_ref, boh_ref, bT_ref, invn_ref,
                  gen_w_ref, gen_b_ref, qkvs_w_ref, qkvs_b_ref, edge_w_ref,
                  lin_w_ref, lin_b_ref, ff1_w_ref, ff1_b_ref, ff2_w_ref, ff2_b_ref,
                  cs_w_ref, cs_b_ref, o_out_ref, *, ne, heads):
    o = o_ref[...]                      # (Na, ne)   node + virtual-node features
    e_attr = e_ref[...]                 # (E,  ne)   edge features (layer-invariant)
    src_oh = src_oh_ref[...]            # (E,  Na)   gather operator:  M @ x == x[src]
    dstT = dstT_ref[...]                # (Na, E)    scatter operator / destination mask
    boh = boh_ref[...]                  # (Na, G)    node -> graph gather operator
    bT = bT_ref[...]                    # (G,  Na)   graph <- node scatter operator
    inv_norm = invn_ref[...]            # (G, 1)     1 / (nodes_per_graph * ne)

    def graph_norm(xx):  # torch_geometric LayerNorm(num_emb, affine=False, mode='graph')
        mean_g = jnp.sum(_mmf(bT, xx), axis=-1, keepdims=True) * inv_norm      # (G, 1)
        xc = xx - _mmf(boh, mean_g)
        var_g = jnp.sum(_mmf(bT, xc * xc), axis=-1, keepdims=True) * inv_norm  # (G, 1)
        return xc * jax.lax.rsqrt(_mmf(boh, var_g) + 1e-5)

    # FiLM conditioning: project the G conditioning rows first, then broadcast to nodes.
    cs = _mmf(boh, _mm(c_ref[...], cs_w_ref[...]) + cs_b_ref[...])             # (Na, 2ne)

    o_norm = graph_norm(o)

    # ---- GENConv(num_emb, num_emb, num_layers=1, aggr='add', norm=None) ----
    msg = jnp.maximum(_mm(src_oh, o_norm) + e_attr, 0.0) + 1e-7                # (E, ne)
    agg = _mm(dstT, msg)                                                       # (Na, ne)
    gen_out = _mm(agg + o_norm, gen_w_ref[...]) + gen_b_ref[...]               # (Na, ne)

    # ---- TransformerConv(2*ne -> ne, heads, edge_dim=ne) ----
    # Fused [query|key|value|skip] projection weight (2ne, 4*H*ne).
    # concat([o_norm, gen_out]) @ W is computed as a row-split sum (no in-kernel concat).
    qkvs = (_mm(o_norm, qkvs_w_ref[:ne, :]) + _mm(gen_out, qkvs_w_ref[ne:, :])
            + qkvs_b_ref[...])                                                 # (Na, 4*H*ne)
    hd = heads * ne
    q = qkvs[:, 0:hd]
    e_proj = _mm(e_attr, edge_w_ref[...])                                      # (E, H*ne)
    k_msg = _mm(src_oh, qkvs[:, hd:2 * hd]) + e_proj                           # (E, H*ne)
    v_msg = _mm(src_oh, qkvs[:, 2 * hd:3 * hd]) + e_proj                       # (E, H*ne)
    skip = qkvs[:, 3 * hd:]                                                    # (Na, H*ne)

    inv_sqrt_d = 1.0 / float(ne) ** 0.5
    # l_h accumulates (concat(head outputs) + skip) @ lin_w + lin_b, one head block at a time
    l_h = _mm(skip, lin_w_ref[...]) + lin_b_ref[...]                           # (Na, ne)
    for h in range(heads):              # heads is small & static -> unrolled
        qh = q[:, h * ne:(h + 1) * ne]                                         # (Na, ne)
        kh = k_msg[:, h * ne:(h + 1) * ne]                                     # (E, ne)
        vh = v_msg[:, h * ne:(h + 1) * ne]                                     # (E, ne)
        s = _mm_nt(qh, kh) * inv_sqrt_d                                        # (Na, E) dense scores
        s = jnp.where(dstT > 0.5, s, -1e30)        # keep only edges whose destination == row
        m = jnp.max(s, axis=-1, keepdims=True)     # per-destination (segment) max, in-kernel
        p = jnp.where(dstT > 0.5, jnp.exp(s - m), 0.0)
        inv_den = 1.0 / (jnp.sum(p, axis=-1, keepdims=True) + 1e-16)
        head_out = _mm(p * inv_den, vh)            # softmax-weighted scatter-add   (Na, ne)
        l_h = l_h + _mm(head_out, lin_w_ref[h * ne:(h + 1) * ne, :])

    # FiLM residual (ln_type='pre'): o + l_h * scale + shift
    o2 = o + l_h * cs[:, :ne] + cs[:, ne:]

    # pre-norm feed-forward residual: o + ff(norm(o))
    h1 = _leaky(_mm(graph_norm(o2), ff1_w_ref[...]) + ff1_b_ref[...])          # (Na, 4ne)
    o_out_ref[...] = o2 + _mm(h1, ff2_w_ref[...]) + ff2_b_ref[...]


def fused_transformer_layer(o, c, aug_e, src_oh, dstT, b_oh, bT, inv_norm, lp, ne, heads):
    inputs = (o, c, aug_e, src_oh, dstT, b_oh, bT, inv_norm,
              lp["gen_w"], lp["gen_b"], lp["qkvs_w"], lp["qkvs_b"], lp["edge_w"],
              lp["lin_w"], lp["lin_b"], lp["ff1_w"], lp["ff1_b"], lp["ff2_w"], lp["ff2_b"],
              lp["cs_w"], lp["cs_b"])
    return pl.pallas_call(
        functools.partial(_layer_kernel, ne=ne, heads=heads),
        in_specs=_vmem_specs(len(inputs)),
        out_specs=_vmem_out(),
        out_shape=jax.ShapeDtypeStruct(o.shape, jnp.float32),
    )(*inputs)


# ---------------------------------------------------------------------------
# Once-per-forward graph preprocessing helpers (plain JAX glue, not in the hot loop)
# ---------------------------------------------------------------------------
def _gather_mat(idx, n):   # one-hot rows (len(idx), n):  M @ x == x[idx]
    return (idx[:, None] == jnp.arange(n, dtype=jnp.int32)[None, :]).astype(jnp.float32)


def _scatter_mat(idx, n):  # (n, len(idx)):  M @ v == segment_sum(v, idx)
    return (jnp.arange(n, dtype=jnp.int32)[:, None] == idx[None, :]).astype(jnp.float32)


# ---------------------------------------------------------------------------
# GraphTransformer forward (ln_type='pre')
# ---------------------------------------------------------------------------
def graph_transformer_forward(p, x, edge_index, edge_attr, batch, cond, cfg):
    ne, heads, nlayers = cfg["num_emb"], cfg["num_heads"], cfg["num_layers"]
    N = x.shape[0]
    G = cond.shape[0]
    N_aug = N + G

    # input MLPs (one fused Pallas call each)
    o = fused_mlp(x, p["x2h"])
    e = fused_mlp(edge_attr, p["e2h"])
    c = fused_mlp(cond, p["c2h"])

    # ---- once-per-forward graph preprocessing (kept in plain JAX glue) ----
    u = jnp.arange(N, dtype=jnp.int32)
    v = batch + N
    aug_ei = jnp.concatenate([edge_index, jnp.stack([u, v]), jnp.stack([v, u])], axis=1)
    e_p = jnp.zeros((2 * N, ne), jnp.float32).at[:, 0].set(1.0)
    aug_e = jnp.concatenate([e, e_p], axis=0)

    # add_self_loops(aug_edge_index, aug_e, fill_value='mean')
    # TODO(synk): this one-shot segment-mean stays in XLA glue (not worth a Pallas call).
    dst0 = aug_ei[1]
    cnt0 = jax.ops.segment_sum(jnp.ones(dst0.shape, jnp.float32), dst0, num_segments=N_aug)
    loop_attr = (jax.ops.segment_sum(aug_e, dst0, num_segments=N_aug)
                 / jnp.maximum(cnt0, 1.0)[:, None])
    loop_idx = jnp.arange(N_aug, dtype=jnp.int32)
    aug_ei = jnp.concatenate([aug_ei, jnp.stack([loop_idx, loop_idx])], axis=1)
    aug_e = jnp.concatenate([aug_e, loop_attr], axis=0)
    aug_batch = jnp.concatenate([batch, jnp.arange(G, dtype=jnp.int32)], axis=0)

    # gather/scatter one-hot operators + per-graph counts: built ONCE, reused by all layers
    src_oh = _gather_mat(aug_ei[0], N_aug)        # (E, Na)
    dstT = _scatter_mat(aug_ei[1], N_aug)         # (Na, E)
    b_oh = _gather_mat(aug_batch, G)              # (Na, G)
    bT = _scatter_mat(aug_batch, G)               # (G, Na)
    inv_norm = 1.0 / (jnp.maximum(jnp.sum(b_oh, axis=0)[:, None], 1.0) * float(ne))

    o = jnp.concatenate([o, c], axis=0)           # append virtual (conditioning) nodes

    for i in range(nlayers):
        o = fused_transformer_layer(o, c, aug_e, src_oh, dstT, b_oh, bT, inv_norm,
                                    p["layers"][i], ne, heads)

    node_emb = o[:N]
    bT_nodes = _scatter_mat(batch, G)             # (G, N)
    inv_cnt = 1.0 / jnp.maximum(jnp.sum(bT_nodes, axis=1, keepdims=True), 1.0)
    pooled = mean_pool(bT_nodes, node_emb, inv_cnt)           # global_mean_pool
    graph_emb = jnp.concatenate([pooled, o[N:]], axis=1)
    return node_emb, graph_emb


# ---------------------------------------------------------------------------
# GraphTransformerGFN forward
# ---------------------------------------------------------------------------
def _mask(x, m):
    return x * m + -1000000000.0 * (1.0 - m)


def gfn_forward(p, x, edge_index, edge_attr, batch, cond, non_edge_index, cfg):
    node_emb, graph_emb = graph_transformer_forward(
        p["transf"], x, edge_index, edge_attr, batch, cond, cfg)

    # edges_are_unordered=True, edges_are_duplicated=True
    ne_row, ne_col = non_edge_index
    non_edge_emb = node_emb[ne_row] + node_emb[ne_col]
    e_row, e_col = edge_index[:, ::2]
    edge_emb = node_emb[e_row] + node_emb[e_col]

    emb = {"graph": graph_emb, "node": node_emb,
           "edge": edge_emb, "non_edge": non_edge_emb}

    graph_out = fused_mlp(graph_emb, p["emb2graph_out"])

    ones_mask = jnp.ones((1, 1), jnp.float32)  # g has no *_mask attributes -> ones((1,1))
    logits = {}
    for at in cfg["action_type_order"]:
        h = fused_mlp(emb[at.part], p["mlps"][at.cname])
        logits[at.cname] = _mask(h, ones_mask)

    logZ = fused_mlp(cond, p["logZ"])[:, 0]
    return logits, graph_out, logZ


# ---------------------------------------------------------------------------
# Deterministic parameter init (torch.nn.Linear-style U(-1/sqrt(fan_in), 1/sqrt(fan_in)))
# ---------------------------------------------------------------------------
class KeyGen:
    def __init__(self, key):
        self.key = key

    def __call__(self):
        self.key, sub = jax.random.split(self.key)
        return sub


def init_linear(kg, din, dout, bias=True):
    s = 1.0 / (din ** 0.5)
    w = jax.random.uniform(kg(), (din, dout), jnp.float32, -s, s)
    if not bias:
        return w, None
    b = jax.random.uniform(kg(), (1, dout), jnp.float32, -s, s)
    return w, b


def init_mlp(kg, n_in, n_hid, n_out, n_layer):
    dims = [n_in] + [n_hid] * n_layer + [n_out]
    return [init_linear(kg, dims[i], dims[i + 1]) for i in range(len(dims) - 1)]


def init_layer(kg, ne, heads):
    hd = heads * ne
    gen_w, gen_b = init_linear(kg, ne, ne)
    qkvs_w, qkvs_b = init_linear(kg, 2 * ne, 4 * hd)     # fused [query|key|value|skip]
    edge_w, _ = init_linear(kg, ne, hd, bias=False)      # TransformerConv lin_edge: no bias
    lin_w, lin_b = init_linear(kg, hd, ne)
    ff1_w, ff1_b = init_linear(kg, ne, 4 * ne)
    ff2_w, ff2_b = init_linear(kg, 4 * ne, ne)
    cs_w, cs_b = init_linear(kg, ne, 2 * ne)
    return dict(gen_w=gen_w, gen_b=gen_b, qkvs_w=qkvs_w, qkvs_b=qkvs_b, edge_w=edge_w,
                lin_w=lin_w, lin_b=lin_b, ff1_w=ff1_w, ff1_b=ff1_b,
                ff2_w=ff2_w, ff2_b=ff2_b, cs_w=cs_w, cs_b=cs_b)


def init_params(seed, env, ne, nlayers, heads, num_mlp_layers, num_graph_out):
    kg = KeyGen(jax.random.PRNGKey(seed))
    transf = {
        "x2h": init_mlp(kg, env.num_node_dim, ne, ne, 2),
        "e2h": init_mlp(kg, env.num_edge_dim, ne, ne, 2),
        "c2h": init_mlp(kg, env.num_cond_dim, ne, ne, 2),
        "layers": [init_layer(kg, ne, heads) for _ in range(nlayers)],
    }
    num_glob_final = 2 * ne
    num_edge_feat = ne if env.edges_are_unordered else 2 * ne
    io = {
        "stop": (num_glob_final, 1),
        "add_node": (ne, env.num_new_node_values),
        "set_node_attr": (ne, env.num_node_attr_logits),
        "add_edge": (num_edge_feat, 1),
        "set_edge_attr": (num_edge_feat, env.num_edge_attr_logits),
    }
    mlps = {at.cname: init_mlp(kg, io[at.cname][0], ne, io[at.cname][1], num_mlp_layers)
            for at in env.action_type_order}
    return {
        "transf": transf,
        "mlps": mlps,
        "emb2graph_out": init_mlp(kg, num_glob_final, ne, num_graph_out, num_mlp_layers),
        "logZ": init_mlp(kg, env.num_cond_dim, 2 * ne, 1, 2),
    }


# ---------------------------------------------------------------------------
# Synthetic env context / action types (stand-ins for GraphActionType & env_ctx)
# ---------------------------------------------------------------------------
class ActionType:
    def __init__(self, cname, part):
        self.cname = cname
        self.part = part  # which embedding this action reads ('graph'/'node'/'edge'/'non_edge')


Stop = ActionType("stop", "graph")
AddNode = ActionType("add_node", "node")
SetNodeAttr = ActionType("set_node_attr", "node")
AddEdge = ActionType("add_edge", "non_edge")
SetEdgeAttr = ActionType("set_edge_attr", "edge")


class EnvCtx:
    num_node_dim = 7
    num_edge_dim = 5
    num_cond_dim = 10
    num_new_node_values = 6
    num_node_attr_logits = 8
    num_edge_attr_logits = 4
    num_node_attrs = 3
    num_edge_attrs = 2
    edges_are_unordered = True
    edges_are_duplicated = True
    action_type_order = [Stop, AddNode, SetNodeAttr, AddEdge, SetEdgeAttr]


if __name__ == "__main__":
    NUM_EMB, NUM_LAYERS, NUM_HEADS = 32, 2, 2
    CFG = {"num_emb": NUM_EMB, "num_layers": NUM_LAYERS, "num_heads": NUM_HEADS,
           "action_type_order": EnvCtx.action_type_order}

    # Small deterministic graph batch: 2 graphs, 7 nodes, 10 (duplicated) edges.
    key = jax.random.PRNGKey(0)
    k1, k2, k3 = jax.random.split(key, 3)
    N, G = 7, 2
    x = jax.random.normal(k1, (N, EnvCtx.num_node_dim), jnp.float32)
    edge_index = jnp.array([[0, 1, 1, 2, 2, 3, 4, 5, 5, 6],
                            [1, 0, 2, 1, 3, 2, 5, 4, 6, 5]], jnp.int32)
    edge_attr = jax.random.normal(k2, (edge_index.shape[1], EnvCtx.num_edge_dim), jnp.float32)
    batch = jnp.array([0, 0, 0, 0, 1, 1, 1], jnp.int32)
    cond_info = jax.random.normal(k3, (G, EnvCtx.num_cond_dim), jnp.float32)
    non_edge_index = jnp.array([[0, 1, 4], [2, 3, 6]], jnp.int32)

    params = init_params(0, EnvCtx, NUM_EMB, NUM_LAYERS, NUM_HEADS,
                         num_mlp_layers=0, num_graph_out=1)

    fwd = jax.jit(lambda p, a, b_, c_, d_, e_, f_: gfn_forward(p, a, b_, c_, d_, e_, f_, CFG))
    logits, graph_out, logZ = fwd(params, x, edge_index, edge_attr, batch,
                                  cond_info, non_edge_index)
    jax.block_until_ready((logits, graph_out, logZ))

    # sanity on shapes implied by the module
    assert graph_out.shape == (G, 1)
    assert logZ.shape == (G,)
    assert logits["stop"].shape == (G, 1)
    assert logits["add_node"].shape == (N, EnvCtx.num_new_node_values)
    assert logits["set_node_attr"].shape == (N, EnvCtx.num_node_attr_logits)
    assert logits["add_edge"].shape == (non_edge_index.shape[1], 1)
    assert logits["set_edge_attr"].shape == (edge_index.shape[1] // 2, EnvCtx.num_edge_attr_logits)
    print("KERNEL_OK")
</pallas_src>

<mosaic_0001>
module attributes {stable_mosaic.version = 11 : i64} {
  func.func private @main(%arg0: i32) attributes {dimension_semantics = [#tpu.dimension_semantics<core_parallel>], iteration_bounds = array<i64: 2>, tpu.core_type = #tpu.core_type<sc_scalar_subcore>, window_params = []} {
    return
  }
}

module attributes {stable_mosaic.version = 11 : i64} {
  func.func private @main(%arg0: i32) attributes {dimension_semantics = [#tpu.dimension_semantics<core_parallel>], iteration_bounds = array<i64: 2>, tpu.core_type = #tpu.core_type<sc_scalar_subcore>, window_params = []} {
    return
  }
}

module attributes {stable_mosaic.version = 11 : i64} {
  func.func @_mlp_kernel(%arg0: memref<2x10xf32, #tpu.memory_space<vmem>>, %arg1: memref<10x32xf32, #tpu.memory_space<vmem>>, %arg2: memref<1x32xf32, #tpu.memory_space<vmem>>, %arg3: memref<32x32xf32, #tpu.memory_space<vmem>>, %arg4: memref<1x32xf32, #tpu.memory_space<vmem>>, %arg5: memref<32x32xf32, #tpu.memory_space<vmem>>, %arg6: memref<1x32xf32, #tpu.memory_space<vmem>>, %arg7: memref<2x32xf32, #tpu.memory_space<vmem>>) attributes {dimension_semantics = [], scalar_prefetch = 0 : i64, scratch_operands = 0 : i64, tpu.core_type = #tpu.core_type<tc>} {
    %c0 = arith.constant 0 : index
    %c0_0 = arith.constant 0 : index
    %0 = vector.load %arg0[%c0, %c0_0] : memref<2x10xf32, #tpu.memory_space<vmem>>, vector<2x10xf32>
    %c0_1 = arith.constant 0 : index
    %c0_2 = arith.constant 0 : index
    %1 = vector.load %arg1[%c0_1, %c0_2] : memref<10x32xf32, #tpu.memory_space<vmem>>, vector<10x32xf32>
    %c0_3 = arith.constant 0 : index
    %c0_4 = arith.constant 0 : index
    %2 = vector.load %arg2[%c0_3, %c0_4] : memref<1x32xf32, #tpu.memory_space<vmem>>, vector<1x32xf32>
    %3 = arith.truncf %0 : vector<2x10xf32> to vector<2x10xbf16>
    %4 = arith.truncf %1 : vector<10x32xf32> to vector<10x32xbf16>
    %cst = arith.constant dense<0.000000e+00> : vector<2x32xf32>
    %5 = tpu.matmul %3, %4, %cst {dimension_numbers = #tpu.dot_dimension_numbers<[1], [0], [0], [1], [0, 0, 1, 1], [], []>} : vector<2x10xbf16>, vector<10x32xbf16>, vector<2x32xf32> -> vector<2x32xf32>
    %6 = vector.broadcast %2 : vector<1x32xf32> to vector<2x32xf32>
    %7 = arith.addf %5, %6 : vector<2x32xf32>
    %cst_5 = arith.constant 0.000000e+00 : f32
    %8 = vector.broadcast %cst_5 : f32 to vector<2x32xf32>
    %9 = arith.cmpf ogt, %7, %8 : vector<2x32xf32>
    %cst_6 = arith.constant 0.00999999977 : f32
    %10 = vector.broadcast %cst_6 : f32 to vector<2x32xf32>
    %11 = arith.mulf %10, %7 : vector<2x32xf32>
    %12 = arith.select %9, %7, %11 : vector<2x32xi1>, vector<2x32xf32>
    %c0_7 = arith.constant 0 : index
    %c0_8 = arith.constant 0 : index
    %13 = vector.load %arg3[%c0_7, %c0_8] : memref<32x32xf32, #tpu.memory_space<vmem>>, vector<32x32xf32>
    %c0_9 = arith.constant 0 : index
    %c0_10 = arith.constant 0 : index
    %14 = vector.load %arg4[%c0_9, %c0_10] : memref<1x32xf32, #tpu.memory_space<vmem>>, vector<1x32xf32>
    %15 = arith.truncf %12 : vector<2x32xf32> to vector<2x32xbf16>
    %16 = arith.truncf %13 : vector<32x32xf32> to vector<32x32xbf16>
    %cst_11 = arith.constant dense<0.000000e+00> : vector<2x32xf32>
    %17 = tpu.matmul %15, %16, %cst_11 {dimension_numbers = #tpu.dot_dimension_numbers<[1], [0], [0], [1], [0, 0, 1, 1], [], []>} : vector<2x32xbf16>, vector<32x32xbf16>, vector<2x32xf32> -> vector<2x32xf32>
    %18 = vector.broadcast %14 : vector<1x32xf32> to vector<2x32xf32>
    %19 = arith.addf %17, %18 : vector<2x32xf32>
    %cst_12 = arith.constant 0.000000e+00 : f32
    %20 = vector.broadcast %cst_12 : f32 to vector<2x32xf32>
    %21 = arith.cmpf ogt, %19, %20 : vector<2x32xf32>
    %cst_13 = arith.constant 0.00999999977 : f32
    %22 = vector.broadcast %cst_13 : f32 to vector<2x32xf32>
    %23 = arith.mulf %22, %19 : vector<2x32xf32>
    %24 = arith.select %21, %19, %23 : vector<2x32xi1>, vector<2x32xf32>
    %c0_14 = arith.constant 0 : index
    %c0_15 = arith.constant 0 : index
    %25 = vector.load %arg5[%c0_14, %c0_15] : memref<32x32xf32, #tpu.memory_space<vmem>>, vector<32x32xf32>
    %c0_16 = arith.constant 0 : index
    %c0_17 = arith.constant 0 : index
    %26 = vector.load %arg6[%c0_16, %c0_17] : memref<1x32xf32, #tpu.memory_space<vmem>>, vector<1x32xf32>
    %27 = arith.truncf %24 : vector<2x32xf32> to vector<2x32xbf16>
    %28 = arith.truncf %25 : vector<32x32xf32> to vector<32x32xbf16>
    %cst_18 = arith.constant dense<0.000000e+00> : vector<2x32xf32>
    %29 = tpu.matmul %27, %28, %cst_18 {dimension_numbers = #tpu.dot_dimension_numbers<[1], [0], [0], [1], [0, 0, 1, 1], [], []>} : vector<2x32xbf16>, vector<32x32xbf16>, vector<2x32xf32> -> vector<2x32xf32>
    %30 = vector.broadcast %26 : vector<1x32xf32> to vector<2x32xf32>
    %31 = arith.addf %29, %30 : vector<2x32xf32>
    %c0_19 = arith.constant 0 : index
    %c0_20 = arith.constant 0 : index
    %32 = vector.load %arg7[%c0_19, %c0_20] : memref<2x32xf32, #tpu.memory_space<vmem>>, vector<2x32xf32>
    tpu.vector_store %arg7[%c0_19, %c0_20], %31 {strides = array<i32>} : memref<2x32xf32, #tpu.memory_space<vmem>>, vector<2x32xf32>,
    return
  }
}

module attributes {stable_mosaic.version = 11 : i64} {
  func.func @_mlp_kernel(%arg0: memref<7x7xf32, #tpu.memory_space<vmem>>, %arg1: memref<7x32xf32, #tpu.memory_space<vmem>>, %arg2: memref<1x32xf32, #tpu.memory_space<vmem>>, %arg3: memref<32x32xf32, #tpu.memory_space<vmem>>, %arg4: memref<1x32xf32, #tpu.memory_space<vmem>>, %arg5: memref<32x32xf32, #tpu.memory_space<vmem>>, %arg6: memref<1x32xf32, #tpu.memory_space<vmem>>, %arg7: memref<7x32xf32, #tpu.memory_space<vmem>>) attributes {dimension_semantics = [], scalar_prefetch = 0 : i64, scratch_operands = 0 : i64, tpu.core_type = #tpu.core_type<tc>} {
    %c0 = arith.constant 0 : index
    %c0_0 = arith.constant 0 : index
    %0 = vector.load %arg0[%c0, %c0_0] : memref<7x7xf32, #tpu.memory_space<vmem>>, vector<7x7xf32>
    %c0_1 = arith.constant 0 : index
    %c0_2 = arith.constant 0 : index
    %1 = vector.load %arg1[%c0_1, %c0_2] : memref<7x32xf32, #tpu.memory_space<vmem>>, vector<7x32xf32>
    %c0_3 = arith.constant 0 : index
    %c0_4 = arith.constant 0 : index
    %2 = vector.load %arg2[%c0_3, %c0_4] : memref<1x32xf32, #tpu.memory_space<vmem>>, vector<1x32xf32>
    %3 = arith.truncf %0 : vector<7x7xf32> to vector<7x7xbf16>
    %4 = arith.truncf %1 : vector<7x32xf32> to vector<7x32xbf16>
    %cst = arith.constant dense<0.000000e+00> : vector<7x32xf32>
    %5 = tpu.matmul %3, %4, %cst {dimension_numbers = #tpu.dot_dimension_numbers<[1], [0], [0], [1], [0, 0, 1, 1], [], []>} : vector<7x7xbf16>, vector<7x32xbf16>, vector<7x32xf32> -> vector<7x32xf32>
    %6 = vector.broadcast %2 : vector<1x32xf32> to vector<7x32xf32>
    %7 = arith.addf %5, %6 : vector<7x32xf32>
    %cst_5 = arith.constant 0.000000e+00 : f32
    %8 = vector.broadcast %cst_5 : f32 to vector<7x32xf32>
    %9 = arith.cmpf ogt, %7, %8 : vector<7x32xf32>
    %cst_6 = arith.constant 0.00999999977 : f32
    %10 = vector.broadcast %cst_6 : f32 to vector<7x32xf32>
    %11 = arith.mulf %10, %7 : vector<7x32xf32>
    %12 = arith.select %9, %7, %11 : vector<7x32xi1>, vector<7x32xf32>
    %c0_7 = arith.constant 0 : index
    %c0_8 = arith.constant 0 : index
    %13 = vector.load %arg3[%c0_7, %c0_8] : memref<32x32xf32, #tpu.memory_space<vmem>>, vector<32x32xf32>
    %c0_9 = arith.constant 0 : index
    %c0_10 = arith.constant 0 : index
    %14 = vector.load %arg4[%c0_9, %c0_10] : memref<1x32xf32, #tpu.memory_space<vmem>>, vector<1x32xf32>
    %15 = arith.truncf %12 : vector<7x32xf32> to vector<7x32xbf16>
    %16 = arith.truncf %13 : vector<32x32xf32> to vector<32x32xbf16>
    %cst_11 = arith.constant dense<0.000000e+00> : vector<7x32xf32>
    %17 = tpu.matmul %15, %16, %cst_11 {dimension_numbers = #tpu.dot_dimension_numbers<[1], [0], [0], [1], [0, 0, 1, 1], [], []>} : vector<7x32xbf16>, vector<32x32xbf16>, vector<7x32xf32> -> vector<7x32xf32>
    %18 = vector.broadcast %14 : vector<1x32xf32> to vector<7x32xf32>
    %19 = arith.addf %17, %18 : vector<7x32xf32>
    %cst_12 = arith.constant 0.000000e+00 : f32
    %20 = vector.broadcast %cst_12 : f32 to vector<7x32xf32>
    %21 = arith.cmpf ogt, %19, %20 : vector<7x32xf32>
    %cst_13 = arith.constant 0.00999999977 : f32
    %22 = vector.broadcast %cst_13 : f32 to vector<7x32xf32>
    %23 = arith.mulf %22, %19 : vector<7x32xf32>
    %24 = arith.select %21, %19, %23 : vector<7x32xi1>, vector<7x32xf32>
    %c0_14 = arith.constant 0 : index
    %c0_15 = arith.constant 0 : index
    %25 = vector.load %arg5[%c0_14, %c0_15] : memref<32x32xf32, #tpu.memory_space<vmem>>, vector<32x32xf32>
    %c0_16 = arith.constant 0 : index
    %c0_17 = arith.constant 0 : index
    %26 = vector.load %arg6[%c0_16, %c0_17] : memref<1x32xf32, #tpu.memory_space<vmem>>, vector<1x32xf32>
    %27 = arith.truncf %24 : vector<7x32xf32> to vector<7x32xbf16>
    %28 = arith.truncf %25 : vector<32x32xf32> to vector<32x32xbf16>
    %cst_18 = arith.constant dense<0.000000e+00> : vector<7x32xf32>
    %29 = tpu.matmul %27, %28, %cst_18 {dimension_numbers = #tpu.dot_dimension_numbers<[1], [0], [0], [1], [0, 0, 1, 1], [], []>} : vector<7x32xbf16>, vector<32x32xbf16>, vector<7x32xf32> -> vector<7x32xf32>
    %30 = vector.broadcast %26 : vector<1x32xf32> to vector<7x32xf32>
    %31 = arith.addf %29, %30 : vector<7x32xf32>
    %c0_19 = arith.constant 0 : index
    %c0_20 = arith.constant 0 : index
    %32 = vector.load %arg7[%c0_19, %c0_20] : memref<7x32xf32, #tpu.memory_space<vmem>>, vector<7x32xf32>
    tpu.vector_store %arg7[%c0_19, %c0_20], %31 {strides = array<i32>} : memref<7x32xf32, #tpu.memory_space<vmem>>, vector<7x32xf32>,
    return
  }
}

module attributes {stable_mosaic.version = 11 : i64} {
  func.func @_mlp_kernel(%arg0: memref<2x10xf32, #tpu.memory_space<vmem>>, %arg1: memref<10x64xf32, #tpu.memory_space<vmem>>, %arg2: memref<1x64xf32, #tpu.memory_space<vmem>>, %arg3: memref<64x64xf32, #tpu.memory_space<vmem>>, %arg4: memref<1x64xf32, #tpu.memory_space<vmem>>, %arg5: memref<64x1xf32, #tpu.memory_space<vmem>>, %arg6: memref<1x1xf32, #tpu.memory_space<vmem>>, %arg7: memref<2x1xf32, #tpu.memory_space<vmem>>) attributes {dimension_semantics = [], scalar_prefetch = 0 : i64, scratch_operands = 0 : i64, tpu.core_type = #tpu.core_type<tc>} {
    %c0 = arith.constant 0 : index
    %c0_0 = arith.constant 0 : index
    %0 = vector.load %arg0[%c0, %c0_0] : memref<2x10xf32, #tpu.memory_space<vmem>>, vector<2x10xf32>
    %c0_1 = arith.constant 0 : index
    %c0_2 = arith.constant 0 : index
    %1 = vector.load %arg1[%c0_1, %c0_2] : memref<10x64xf32, #tpu.memory_space<vmem>>, vector<10x64xf32>
    %c0_3 = arith.constant 0 : index
    %c0_4 = arith.constant 0 : index
    %2 = vector.load %arg2[%c0_3, %c0_4] : memref<1x64xf32, #tpu.memory_space<vmem>>, vector<1x64xf32>
    %3 = arith.truncf %0 : vector<2x10xf32> to vector<2x10xbf16>
    %4 = arith.truncf %1 : vector<10x64xf32> to vector<10x64xbf16>
    %cst = arith.constant dense<0.000000e+00> : vector<2x64xf32>
    %5 = tpu.matmul %3, %4, %cst {dimension_numbers = #tpu.dot_dimension_numbers<[1], [0], [0], [1], [0, 0, 1, 1], [], []>} : vector<2x10xbf16>, vector<10x64xbf16>, vector<2x64xf32> -> vector<2x64xf32>
    %6 = vector.broadcast %2 : vector<1x64xf32> to vector<2x64xf32>
    %7 = arith.addf %5, %6 : vector<2x64xf32>
    %cst_5 = arith.constant 0.000000e+00 : f32
    %8 = vector.broadcast %cst_5 : f32 to vector<2x64xf32>
    %9 = arith.cmpf ogt, %7, %8 : vector<2x64xf32>
    %cst_6 = arith.constant 0.00999999977 : f32
    %10 = vector.broadcast %cst_6 : f32 to vector<2x64xf32>
    %11 = arith.mulf %10, %7 : vector<2x64xf32>
    %12 = arith.select %9, %7, %11 : vector<2x64xi1>, vector<2x64xf32>
    %c0_7 = arith.constant 0 : index
    %c0_8 = arith.constant 0 : index
    %13 = vector.load %arg3[%c0_7, %c0_8] : memref<64x64xf32, #tpu.memory_space<vmem>>, vector<64x64xf32>
    %c0_9 = arith.constant 0 : index
    %c0_10 = arith.constant 0 : index
    %14 = vector.load %arg4[%c0_9, %c0_10] : memref<1x64xf32, #tpu.memory_space<vmem>>, vector<1x64xf32>
    %15 = arith.truncf %12 : vector<2x64xf32> to vector<2x64xbf16>
    %16 = arith.truncf %13 : vector<64x64xf32> to vector<64x64xbf16>
    %cst_11 = arith.constant dense<0.000000e+00> : vector<2x64xf32>
    %17 = tpu.matmul %15, %16, %cst_11 {dimension_numbers = #tpu.dot_dimension_numbers<[1], [0], [0], [1], [0, 0, 1, 1], [], []>} : vector<2x64xbf16>, vector<64x64xbf16>, vector<2x64xf32> -> vector<2x64xf32>
    %18 = vector.broadcast %14 : vector<1x64xf32> to vector<2x64xf32>
    %19 = arith.addf %17, %18 : vector<2x64xf32>
    %cst_12 = arith.constant 0.000000e+00 : f32
    %20 = vector.broadcast %cst_12 : f32 to vector<2x64xf32>
    %21 = arith.cmpf ogt, %19, %20 : vector<2x64xf32>
    %cst_13 = arith.constant 0.00999999977 : f32
    %22 = vector.broadcast %cst_13 : f32 to vector<2x64xf32>
    %23 = arith.mulf %22, %19 : vector<2x64xf32>
    %24 = arith.select %21, %19, %23 : vector<2x64xi1>, vector<2x64xf32>
    %c0_14 = arith.constant 0 : index
    %c0_15 = arith.constant 0 : index
    %25 = vector.load %arg5[%c0_14, %c0_15] : memref<64x1xf32, #tpu.memory_space<vmem>>, vector<64x1xf32>
    %c0_16 = arith.constant 0 : index
    %c0_17 = arith.constant 0 : index
    %26 = vector.load %arg6[%c0_16, %c0_17] : memref<1x1xf32, #tpu.memory_space<vmem>>, vector<1x1xf32>
    %27 = arith.truncf %24 : vector<2x64xf32> to vector<2x64xbf16>
    %28 = arith.truncf %25 : vector<64x1xf32> to vector<64x1xbf16>
    %cst_18 = arith.constant dense<0.000000e+00> : vector<2x1xf32>
    %29 = tpu.matmul %27, %28, %cst_18 {dimension_numbers = #tpu.dot_dimension_numbers<[1], [0], [0], [1], [0, 0, 1, 1], [], []>} : vector<2x64xbf16>, vector<64x1xbf16>, vector<2x1xf32> -> vector<2x1xf32>
    %30 = vector.broadcast %26 : vector<1x1xf32> to vector<2x1xf32>
    %31 = arith.addf %29, %30 : vector<2x1xf32>
    %c0_19 = arith.constant 0 : index
    %c0_20 = arith.constant 0 : index
    %32 = vector.load %arg7[%c0_19, %c0_20] : memref<2x1xf32, #tpu.memory_space<vmem>>, vector<2x1xf32>
    tpu.vector_store %arg7[%c0_19, %c0_20], %31 {strides = array<i32>} : memref<2x1xf32, #tpu.memory_space<vmem>>, vector<2x1xf32>,
    return
  }
}

module attributes {stable_mosaic.version = 11 : i64} {
  func.func @_mlp_kernel(%arg0: memref<10x5xf32, #tpu.memory_space<vmem>>, %arg1: memref<5x32xf32, #tpu.memory_space<vmem>>, %arg2: memref<1x32xf32, #tpu.memory_space<vmem>>, %arg3: memref<32x32xf32, #tpu.memory_space<vmem>>, %arg4: memref<1x32xf32, #tpu.memory_space<vmem>>, %arg5: memref<32x32xf32, #tpu.memory_space<vmem>>, %arg6: memref<1x32xf32, #tpu.memory_space<vmem>>, %arg7: memref<10x32xf32, #tpu.memory_space<vmem>>) attributes {dimension_semantics = [], scalar_prefetch = 0 : i64, scratch_operands = 0 : i64, tpu.core_type = #tpu.core_type<tc>} {
    %c0 = arith.constant 0 : index
    %c0_0 = arith.constant 0 : index
    %0 = vector.load %arg0[%c0, %c0_0] : memref<10x5xf32, #tpu.memory_space<vmem>>, vector<10x5xf32>
    %c0_1 = arith.constant 0 : index
    %c0_2 = arith.constant 0 : index
    %1 = vector.load %arg1[%c0_1, %c0_2] : memref<5x32xf32, #tpu.memory_space<vmem>>, vector<5x32xf32>
    %c0_3 = arith.constant 0 : index
    %c0_4 = arith.constant 0 : index
    %2 = vector.load %arg2[%c0_3, %c0_4] : memref<1x32xf32, #tpu.memory_space<vmem>>, vector<1x32xf32>
    %3 = arith.truncf %0 : vector<10x5xf32> to vector<10x5xbf16>
    %4 = arith.truncf %1 : vector<5x32xf32> to vector<5x32xbf16>
    %cst = arith.constant dense<0.000000e+00> : vector<10x32xf32>
    %5 = tpu.matmul %3, %4, %cst {dimension_numbers = #tpu.dot_dimension_numbers<[1], [0], [0], [1], [0, 0, 1, 1], [], []>} : vector<10x5xbf16>, vector<5x32xbf16>, vector<10x32xf32> -> vector<10x32xf32>
    %6 = vector.broadcast %2 : vector<1x32xf32> to vector<10x32xf32>
    %7 = arith.addf %5, %6 : vector<10x32xf32>
    %cst_5 = arith.constant 0.000000e+00 : f32
    %8 = vector.broadcast %cst_5 : f32 to vector<10x32xf32>
    %9 = arith.cmpf ogt, %7, %8 : vector<10x32xf32>
    %cst_6 = arith.constant 0.00999999977 : f32
    %10 = vector.broadcast %cst_6 : f32 to vector<10x32xf32>
    %11 = arith.mulf %10, %7 : vector<10x32xf32>
    %12 = arith.select %9, %7, %11 : vector<10x32xi1>, vector<10x32xf32>
    %c0_7 = arith.constant 0 : index
    %c0_8 = arith.constant 0 : index
    %13 = vector.load %arg3[%c0_7, %c0_8] : memref<32x32xf32, #tpu.memory_space<vmem>>, vector<32x32xf32>
    %c0_9 = arith.constant 0 : index
    %c0_10 = arith.constant 0 : index
    %14 = vector.load %arg4[%c0_9, %c0_10] : memref<1x32xf32, #tpu.memory_space<vmem>>, vector<1x32xf32>
    %15 = arith.truncf %12 : vector<10x32xf32> to vector<10x32xbf16>
    %16 = arith.truncf %13 : vector<32x32xf32> to vector<32x32xbf16>
    %cst_11 = arith.constant dense<0.000000e+00> : vector<10x32xf32>
    %17 = tpu.matmul %15, %16, %cst_11 {dimension_numbers = #tpu.dot_dimension_numbers<[1], [0], [0], [1], [0, 0, 1, 1], [], []>} : vector<10x32xbf16>, vector<32x32xbf16>, vector<10x32xf32> -> vector<10x32xf32>
    %18 = vector.broadcast %14 : vector<1x32xf32> to vector<10x32xf32>
    %19 = arith.addf %17, %18 : vector<10x32xf32>
    %cst_12 = arith.constant 0.000000e+00 : f32
    %20 = vector.broadcast %cst_12 : f32 to vector<10x32xf32>
    %21 = arith.cmpf ogt, %19, %20 : vector<10x32xf32>
    %cst_13 = arith.constant 0.00999999977 : f32
    %22 = vector.broadcast %cst_13 : f32 to vector<10x32xf32>
    %23 = arith.mulf %22, %19 : vector<10x32xf32>
    %24 = arith.select %21, %19, %23 : vector<10x32xi1>, vector<10x32xf32>
    %c0_14 = arith.constant 0 : index
    %c0_15 = arith.constant 0 : index
    %25 = vector.load %arg5[%c0_14, %c0_15] : memref<32x32xf32, #tpu.memory_space<vmem>>, vector<32x32xf32>
    %c0_16 = arith.constant 0 : index
    %c0_17 = arith.constant 0 : index
    %26 = vector.load %arg6[%c0_16, %c0_17] : memref<1x32xf32, #tpu.memory_space<vmem>>, vector<1x32xf32>
    %27 = arith.truncf %24 : vector<10x32xf32> to vector<10x32xbf16>
    %28 = arith.truncf %25 : vector<32x32xf32> to vector<32x32xbf16>
    %cst_18 = arith.constant dense<0.000000e+00> : vector<10x32xf32>
    %29 = tpu.matmul %27, %28, %cst_18 {dimension_numbers = #tpu.dot_dimension_numbers<[1], [0], [0], [1], [0, 0, 1, 1], [], []>} : vector<10x32xbf16>, vector<32x32xbf16>, vector<10x32xf32> -> vector<10x32xf32>
    %30 = vector.broadcast %26 : vector<1x32xf32> to vector<10x32xf32>
    %31 = arith.addf %29, %30 : vector<10x32xf32>
    %c0_19 = arith.constant 0 : index
    %c0_20 = arith.constant 0 : index
    %32 = vector.load %arg7[%c0_19, %c0_20] : memref<10x32xf32, #tpu.memory_space<vmem>>, vector<10x32xf32>
    tpu.vector_store %arg7[%c0_19, %c0_20], %31 {strides = array<i32>} : memref<10x32xf32, #tpu.memory_space<vmem>>, vector<10x32xf32>,
    return
  }
}

module attributes {stable_mosaic.version = 11 : i64} {
  func.func @_layer_kernel(%arg0: memref<9x32xf32, #tpu.memory_space<vmem>>, %arg1: memref<2x32xf32, #tpu.memory_space<vmem>>, %arg2: memref<33x32xf32, #tpu.memory_space<vmem>>, %arg3: memref<33x9xf32, #tpu.memory_space<vmem>>, %arg4: memref<9x33xf32, #tpu.memory_space<vmem>>, %arg5: memref<9x2xf32, #tpu.memory_space<vmem>>, %arg6: memref<2x9xf32, #tpu.memory_space<vmem>>, %arg7: memref<2x1xf32, #tpu.memory_space<vmem>>, %arg8: memref<32x32xf32, #tpu.memory_space<vmem>>, %arg9: memref<1x32xf32, #tpu.memory_space<vmem>>, %arg10: memref<64x256xf32, #tpu.memory_space<vmem>>, %arg11: memref<1x256xf32, #tpu.memory_space<vmem>>, %arg12: memref<32x64xf32, #tpu.memory_space<vmem>>, %arg13: memref<64x32xf32, #tpu.memory_space<vmem>>, %arg14: memref<1x32xf32, #tpu.memory_space<vmem>>, %arg15: memref<32x128xf32, #tpu.memory_space<vmem>>, %arg16: memref<1x128xf32, #tpu.memory_space<vmem>>, %arg17: memref<128x32xf32, #tpu.memory_space<vmem>>, %arg18: memref<1x32xf32, #tpu.memory_space<vmem>>, %arg19: memref<32x64xf32, #tpu.memory_space<vmem>>, %arg20: memref<1x64xf32, #tpu.memory_space<vmem>>, %arg21: memref<9x32xf32, #tpu.memory_space<vmem>>) attributes {dimension_semantics = [], scalar_prefetch = 0 : i64, scratch_operands = 0 : i64, tpu.core_type = #tpu.core_type<tc>} {
    %c0 = arith.constant 0 : index
    %c0_0 = arith.constant 0 : index
    %0 = vector.load %arg0[%c0, %c0_0] : memref<9x32xf32, #tpu.memory_space<vmem>>, vector<9x32xf32>
    %c0_1 = arith.constant 0 : index
    %c0_2 = arith.constant 0 : index
    %1 = vector.load %arg2[%c0_1, %c0_2] : memref<33x32xf32, #tpu.memory_space<vmem>>, vector<33x32xf32>
    %c0_3 = arith.constant 0 : index
    %c0_4 = arith.constant 0 : index
    %2 = vector.load %arg3[%c0_3, %c0_4] : memref<33x9xf32, #tpu.memory_space<vmem>>, vector<33x9xf32>
    %c0_5 = arith.constant 0 : index
    %c0_6 = arith.constant 0 : index
    %3 = vector.load %arg4[%c0_5, %c0_6] : memref<9x33xf32, #tpu.memory_space<vmem>>, vector<9x33xf32>
    %c0_7 = arith.constant 0 : index
    %c0_8 = arith.constant 0 : index
    %4 = vector.load %arg5[%c0_7, %c0_8] : memref<9x2xf32, #tpu.memory_space<vmem>>, vector<9x2xf32>
    %c0_9 = arith.constant 0 : index
    %c0_10 = arith.constant 0 : index
    %5 = vector.load %arg6[%c0_9, %c0_10] : memref<2x9xf32, #tpu.memory_space<vmem>>, vector<2x9xf32>
    %c0_11 = arith.constant 0 : index
    %c0_12 = arith.constant 0 : index
    %6 = vector.load %arg7[%c0_11, %c0_12] : memref<2x1xf32, #tpu.memory_space<vmem>>, vector<2x1xf32>
    %c0_13 = arith.constant 0 : index
    %c0_14 = arith.constant 0 : index
    %7 = vector.load %arg1[%c0_13, %c0_14] : memref<2x32xf32, #tpu.memory_space<vmem>>, vector<2x32xf32>
    %c0_15 = arith.constant 0 : index
    %c0_16 = arith.constant 0 : index
    %8 = vector.load %arg19[%c0_15, %c0_16] : memref<32x64xf32, #tpu.memory_space<vmem>>, vector<32x64xf32>
    %9 = arith.truncf %7 : vector<2x32xf32> to vector<2x32xbf16>
    %10 = arith.truncf %8 : vector<32x64xf32> to vector<32x64xbf16>
    %cst = arith.constant dense<0.000000e+00> : vector<2x64xf32>
    %11 = tpu.matmul %9, %10, %cst {dimension_numbers = #tpu.dot_dimension_numbers<[1], [0], [0], [1], [0, 0, 1, 1], [], []>} : vector<2x32xbf16>, vector<32x64xbf16>, vector<2x64xf32> -> vector<2x64xf32>
    %c0_17 = arith.constant 0 : index
    %c0_18 = arith.constant 0 : index
    %12 = vector.load %arg20[%c0_17, %c0_18] : memref<1x64xf32, #tpu.memory_space<vmem>>, vector<1x64xf32>
    %13 = vector.broadcast %12 : vector<1x64xf32> to vector<2x64xf32>
    %14 = arith.addf %11, %13 : vector<2x64xf32>
    %cst_19 = arith.constant dense<0.000000e+00> : vector<9x64xf32>
    %15 = tpu.matmul %4, %14, %cst_19 {dimension_numbers = #tpu.dot_dimension_numbers<[1], [0], [0], [1], [0, 0, 1, 1], [], []>} : vector<9x2xf32>, vector<2x64xf32>, vector<9x64xf32> -> vector<9x64xf32>
    %cst_20 = arith.constant dense<0.000000e+00> : vector<2x32xf32>
    %16 = tpu.matmul %5, %0, %cst_20 {dimension_numbers = #tpu.dot_dimension_numbers<[1], [0], [0], [1], [0, 0, 1, 1], [], []>} : vector<2x9xf32>, vector<9x32xf32>, vector<2x32xf32> -> vector<2x32xf32>
    %cst_21 = arith.constant dense<0.000000e+00> : vector<2xf32>
    %17 = vector.multi_reduction <add>, %16, %cst_21 [1] : vector<2x32xf32> to vector<2xf32>
    %18 = vector.shape_cast %17 : vector<2xf32> to vector<2x1xf32>
    %19 = arith.mulf %18, %6 : vector<2x1xf32>
    %cst_22 = arith.constant dense<0.000000e+00> : vector<9x1xf32>
    %20 = tpu.matmul %4, %19, %cst_22 {dimension_numbers = #tpu.dot_dimension_numbers<[1], [0], [0], [1], [0, 0, 1, 1], [], []>} : vector<9x2xf32>, vector<2x1xf32>, vector<9x1xf32> -> vector<9x1xf32>
    %21 = vector.broadcast %20 : vector<9x1xf32> to vector<9x32xf32>
    %22 = arith.subf %0, %21 : vector<9x32xf32>
    %23 = arith.mulf %22, %22 : vector<9x32xf32>
    %cst_23 = arith.constant dense<0.000000e+00> : vector<2x32xf32>
    %24 = tpu.matmul %5, %23, %cst_23 {dimension_numbers = #tpu.dot_dimension_numbers<[1], [0], [0], [1], [0, 0, 1, 1], [], []>} : vector<2x9xf32>, vector<9x32xf32>, vector<2x32xf32> -> vector<2x32xf32>
    %cst_24 = arith.constant dense<0.000000e+00> : vector<2xf32>
    %25 = vector.multi_reduction <add>, %24, %cst_24 [1] : vector<2x32xf32> to vector<2xf32>
    %26 = vector.shape_cast %25 : vector<2xf32> to vector<2x1xf32>
    %27 = arith.mulf %26, %6 : vector<2x1xf32>
    %cst_25 = arith.constant dense<0.000000e+00> : vector<9x1xf32>
    %28 = tpu.matmul %4, %27, %cst_25 {dimension_numbers = #tpu.dot_dimension_numbers<[1], [0], [0], [1], [0, 0, 1, 1], [], []>} : vector<9x2xf32>, vector<2x1xf32>, vector<9x1xf32> -> vector<9x1xf32>
    %cst_26 = arith.constant 9.99999974E-6 : f32
    %29 = vector.broadcast %cst_26 : f32 to vector<9x1xf32>
    %30 = arith.addf %28, %29 : vector<9x1xf32>
    %31 = math.rsqrt %30 : vector<9x1xf32>
    %32 = vector.broadcast %31 : vector<9x1xf32> to vector<9x32xf32>
    %33 = arith.mulf %22, %32 : vector<9x32xf32>
    %34 = arith.truncf %2 : vector<33x9xf32> to vector<33x9xbf16>
    %35 = arith.truncf %33 : vector<9x32xf32> to vector<9x32xbf16>
    %cst_27 = arith.constant dense<0.000000e+00> : vector<33x32xf32>
    %36 = tpu.matmul %34, %35, %cst_27 {dimension_numbers = #tpu.dot_dimension_numbers<[1], [0], [0], [1], [0, 0, 1, 1], [], []>} : vector<33x9xbf16>, vector<9x32xbf16>, vector<33x32xf32> -> vector<33x32xf32>
    %37 = arith.addf %36, %1 : vector<33x32xf32>
    %cst_28 = arith.constant 0.000000e+00 : f32
    %38 = vector.broadcast %cst_28 : f32 to vector<33x32xf32>
    %39 = arith.maximumf %37, %38 : vector<33x32xf32>
    %cst_29 = arith.constant 1.000000e-07 : f32
    %40 = vector.broadcast %cst_29 : f32 to vector<33x32xf32>
    %41 = arith.addf %39, %40 : vector<33x32xf32>
    %42 = arith.truncf %3 : vector<9x33xf32> to vector<9x33xbf16>
    %43 = arith.truncf %41 : vector<33x32xf32> to vector<33x32xbf16>
    %cst_30 = arith.constant dense<0.000000e+00> : vector<9x32xf32>
    %44 = tpu.matmul %42, %43, %cst_30 {dimension_numbers = #tpu.dot_dimension_numbers<[1], [0], [0], [1], [0, 0, 1, 1], [], []>} : vector<9x33xbf16>, vector<33x32xbf16>, vector<9x32xf32> -> vector<9x32xf32>
    %45 = arith.addf %44, %33 : vector<9x32xf32>
    %c0_31 = arith.constant 0 : index
    %c0_32 = arith.constant 0 : index
    %46 = vector.load %arg8[%c0_31, %c0_32] : memref<32x32xf32, #tpu.memory_space<vmem>>, vector<32x32xf32>
    %47 = arith.truncf %45 : vector<9x32xf32> to vector<9x32xbf16>
    %48 = arith.truncf %46 : vector<32x32xf32> to vector<32x32xbf16>
    %cst_33 = arith.constant dense<0.000000e+00> : vector<9x32xf32>
    %49 = tpu.matmul %47, %48, %cst_33 {dimension_numbers = #tpu.dot_dimension_numbers<[1], [0], [0], [1], [0, 0, 1, 1], [], []>} : vector<9x32xbf16>, vector<32x32xbf16>, vector<9x32xf32> -> vector<9x32xf32>
    %c0_34 = arith.constant 0 : index
    %c0_35 = arith.constant 0 : index
    %50 = vector.load %arg9[%c0_34, %c0_35] : memref<1x32xf32, #tpu.memory_space<vmem>>, vector<1x32xf32>
    %51 = vector.broadcast %50 : vector<1x32xf32> to vector<9x32xf32>
    %52 = arith.addf %49, %51 : vector<9x32xf32>
    %c0_36 = arith.constant 0 : index
    %c0_37 = arith.constant 0 : index
    %53 = vector.load %arg10[%c0_36, %c0_37] : memref<64x256xf32, #tpu.memory_space<vmem>>, vector<32x256xf32>
    %54 = arith.truncf %33 : vector<9x32xf32> to vector<9x32xbf16>
    %55 = arith.truncf %53 : vector<32x256xf32> to vector<32x256xbf16>
    %cst_38 = arith.constant dense<0.000000e+00> : vector<9x256xf32>
    %56 = tpu.matmul %54, %55, %cst_38 {dimension_numbers = #tpu.dot_dimension_numbers<[1], [0], [0], [1], [0, 0, 1, 1], [], []>} : vector<9x32xbf16>, vector<32x256xbf16>, vector<9x256xf32> -> vector<9x256xf32>
    %c32 = arith.constant 32 : index
    %c0_39 = arith.constant 0 : index
    %57 = vector.load %arg10[%c32, %c0_39] : memref<64x256xf32, #tpu.memory_space<vmem>>, vector<32x256xf32>
    %58 = arith.truncf %52 : vector<9x32xf32> to vector<9x32xbf16>
    %59 = arith.truncf %57 : vector<32x256xf32> to vector<32x256xbf16>
    %cst_40 = arith.constant dense<0.000000e+00> : vector<9x256xf32>
    %60 = tpu.matmul %58, %59, %cst_40 {dimension_numbers = #tpu.dot_dimension_numbers<[1], [0], [0], [1], [0, 0, 1, 1], [], []>} : vector<9x32xbf16>, vector<32x256xbf16>, vector<9x256xf32> -> vector<9x256xf32>
    %61 = arith.addf %56, %60 : vector<9x256xf32>
    %c0_41 = arith.constant 0 : index
    %c0_42 = arith.constant 0 : index
    %62 = vector.load %arg11[%c0_41, %c0_42] : memref<1x256xf32, #tpu.memory_space<vmem>>, vector<1x256xf32>
    %63 = vector.broadcast %62 : vector<1x256xf32> to vector<9x256xf32>
    %64 = arith.addf %61, %63 : vector<9x256xf32>
    %65 = vector.extract_strided_slice %64 {offsets = [0, 0], sizes = [9, 64], strides = [1, 1]} : vector<9x256xf32> to vector<9x64xf32>
    %c0_43 = arith.constant 0 : index
    %c0_44 = arith.constant 0 : index
    %66 = vector.load %arg12[%c0_43, %c0_44] : memref<32x64xf32, #tpu.memory_space<vmem>>, vector<32x64xf32>
    %67 = arith.truncf %1 : vector<33x32xf32> to vector<33x32xbf16>
    %68 = arith.truncf %66 : vector<32x64xf32> to vector<32x64xbf16>
    %cst_45 = arith.constant dense<0.000000e+00> : vector<33x64xf32>
    %69 = tpu.matmul %67, %68, %cst_45 {dimension_numbers = #tpu.dot_dimension_numbers<[1], [0], [0], [1], [0, 0, 1, 1], [], []>} : vector<33x32xbf16>, vector<32x64xbf16>, vector<33x64xf32> -> vector<33x64xf32>
    %70 = vector.extract_strided_slice %64 {offsets = [0, 64], sizes = [9, 64], strides = [1, 1]} : vector<9x256xf32> to vector<9x64xf32>
    %71 = arith.truncf %2 : vector<33x9xf32> to vector<33x9xbf16>
    %72 = arith.truncf %70 : vector<9x64xf32> to vector<9x64xbf16>
    %cst_46 = arith.constant dense<0.000000e+00> : vector<33x64xf32>
    %73 = tpu.matmul %71, %72, %cst_46 {dimension_numbers = #tpu.dot_dimension_numbers<[1], [0], [0], [1], [0, 0, 1, 1], [], []>} : vector<33x9xbf16>, vector<9x64xbf16>, vector<33x64xf32> -> vector<33x64xf32>
    %74 = arith.addf %73, %69 : vector<33x64xf32>
    %75 = vector.extract_strided_slice %64 {offsets = [0, 128], sizes = [9, 64], strides = [1, 1]} : vector<9x256xf32> to vector<9x64xf32>
    %76 = arith.truncf %2 : vector<33x9xf32> to vector<33x9xbf16>
    %77 = arith.truncf %75 : vector<9x64xf32> to vector<9x64xbf16>
    %cst_47 = arith.constant dense<0.000000e+00> : vector<33x64xf32>
    %78 = tpu.matmul %76, %77, %cst_47 {dimension_numbers = #tpu.dot_dimension_numbers<[1], [0], [0], [1], [0, 0, 1, 1], [], []>} : vector<33x9xbf16>, vector<9x64xbf16>, vector<33x64xf32> -> vector<33x64xf32>
    %79 = arith.addf %78, %69 : vector<33x64xf32>
    %80 = vector.extract_strided_slice %64 {offsets = [0, 192], sizes = [9, 64], strides = [1, 1]} : vector<9x256xf32> to vector<9x64xf32>
    %c0_48 = arith.constant 0 : index
    %c0_49 = arith.constant 0 : index
    %81 = vector.load %arg13[%c0_48, %c0_49] : memref<64x32xf32, #tpu.memory_space<vmem>>, vector<64x32xf32>
    %82 = arith.truncf %80 : vector<9x64xf32> to vector<9x64xbf16>
    %83 = arith.truncf %81 : vector<64x32xf32> to vector<64x32xbf16>
    %cst_50 = arith.constant dense<0.000000e+00> : vector<9x32xf32>
    %84 = tpu.matmul %82, %83, %cst_50 {dimension_numbers = #tpu.dot_dimension_numbers<[1], [0], [0], [1], [0, 0, 1, 1], [], []>} : vector<9x64xbf16>, vector<64x32xbf16>, vector<9x32xf32> -> vector<9x32xf32>
    %c0_51 = arith.constant 0 : index
    %c0_52 = arith.constant 0 : index
    %85 = vector.load %arg14[%c0_51, %c0_52] : memref<1x32xf32, #tpu.memory_space<vmem>>, vector<1x32xf32>
    %86 = vector.broadcast %85 : vector<1x32xf32> to vector<9x32xf32>
    %87 = arith.addf %84, %86 : vector<9x32xf32>
    %88 = vector.extract_strided_slice %65 {offsets = [0, 0], sizes = [9, 32], strides = [1, 1]} : vector<9x64xf32> to vector<9x32xf32>
    %89 = vector.extract_strided_slice %74 {offsets = [0, 0], sizes = [33, 32], strides = [1, 1]} : vector<33x64xf32> to vector<33x32xf32>
    %90 = vector.extract_strided_slice %79 {offsets = [0, 0], sizes = [33, 32], strides = [1, 1]} : vector<33x64xf32> to vector<33x32xf32>
    %91 = arith.truncf %88 : vector<9x32xf32> to vector<9x32xbf16>
    %92 = arith.truncf %89 : vector<33x32xf32> to vector<33x32xbf16>
    %cst_53 = arith.constant dense<0.000000e+00> : vector<9x33xf32>
    %93 = tpu.matmul %91, %92, %cst_53 {dimension_numbers = #tpu.dot_dimension_numbers<[1], [1], [0], [0], [0, 0, 1, 0], [], []>} : vector<9x32xbf16>, vector<33x32xbf16>, vector<9x33xf32> -> vector<9x33xf32>
    %cst_54 = arith.constant 0.176776692 : f32
    %94 = vector.broadcast %cst_54 : f32 to vector<9x33xf32>
    %95 = arith.mulf %93, %94 : vector<9x33xf32>
    %cst_55 = arith.constant 5.000000e-01 : f32
    %96 = vector.broadcast %cst_55 : f32 to vector<9x33xf32>
    %97 = arith.cmpf ogt, %3, %96 : vector<9x33xf32>
    %cst_56 = arith.constant -1.000000e+30 : f32
    %98 = vector.broadcast %cst_56 : f32 to vector<9x33xf32>
    %99 = arith.select %97, %95, %98 : vector<9x33xi1>, vector<9x33xf32>
    %cst_57 = arith.constant dense<0xFF800000> : vector<9xf32>
    %100 = vector.multi_reduction <maximumf>, %99, %cst_57 [1] : vector<9x33xf32> to vector<9xf32>
    %101 = vector.shape_cast %100 : vector<9xf32> to vector<9x1xf32>
    %cst_58 = arith.constant 5.000000e-01 : f32
    %102 = vector.broadcast %cst_58 : f32 to vector<9x33xf32>
    %103 = arith.cmpf ogt, %3, %102 : vector<9x33xf32>
    %104 = vector.broadcast %101 : vector<9x1xf32> to vector<9x33xf32>
    %105 = arith.subf %99, %104 : vector<9x33xf32>
    %106 = math.exp %105 : vector<9x33xf32>
    %cst_59 = arith.constant 0.000000e+00 : f32
    %107 = vector.broadcast %cst_59 : f32 to vector<9x33xf32>
    %108 = arith.select %103, %106, %107 : vector<9x33xi1>, vector<9x33xf32>
    %cst_60 = arith.constant dense<0.000000e+00> : vector<9xf32>
    %109 = vector.multi_reduction <add>, %108, %cst_60 [1] : vector<9x33xf32> to vector<9xf32>
    %110 = vector.shape_cast %109 : vector<9xf32> to vector<9x1xf32>
    %cst_61 = arith.constant 1.000000e-16 : f32
    %111 = vector.broadcast %cst_61 : f32 to vector<9x1xf32>
    %112 = arith.addf %110, %111 : vector<9x1xf32>
    %cst_62 = arith.constant 1.000000e+00 : f32
    %113 = vector.broadcast %cst_62 : f32 to vector<9x1xf32>
    %114 = arith.divf %113, %112 : vector<9x1xf32>
    %115 = vector.broadcast %114 : vector<9x1xf32> to vector<9x33xf32>
    %116 = arith.mulf %108, %115 : vector<9x33xf32>
    %117 = arith.truncf %116 : vector<9x33xf32> to vector<9x33xbf16>
    %118 = arith.truncf %90 : vector<33x32xf32> to vector<33x32xbf16>
    %cst_63 = arith.constant dense<0.000000e+00> : vector<9x32xf32>
    %119 = tpu.matmul %117, %118, %cst_63 {dimension_numbers = #tpu.dot_dimension_numbers<[1], [0], [0], [1], [0, 0, 1, 1], [], []>} : vector<9x33xbf16>, vector<33x32xbf16>, vector<9x32xf32> -> vector<9x32xf32>
    %c0_64 = arith.constant 0 : index
    %c0_65 = arith.constant 0 : index
    %120 = vector.load %arg13[%c0_64, %c0_65] : memref<64x32xf32, #tpu.memory_space<vmem>>, vector<32x32xf32>
    %121 = arith.truncf %119 : vector<9x32xf32> to vector<9x32xbf16>
    %122 = arith.truncf %120 : vector<32x32xf32> to vector<32x32xbf16>
    %cst_66 = arith.constant dense<0.000000e+00> : vector<9x32xf32>
    %123 = tpu.matmul %121, %122, %cst_66 {dimension_numbers = #tpu.dot_dimension_numbers<[1], [0], [0], [1], [0, 0, 1, 1], [], []>} : vector<9x32xbf16>, vector<32x32xbf16>, vector<9x32xf32> -> vector<9x32xf32>
    %124 = arith.addf %87, %123 : vector<9x32xf32>
    %125 = vector.extract_strided_slice %65 {offsets = [0, 32], sizes = [9, 32], strides = [1, 1]} : vector<9x64xf32> to vector<9x32xf32>
    %126 = vector.extract_strided_slice %74 {offsets = [0, 32], sizes = [33, 32], strides = [1, 1]} : vector<33x64xf32> to vector<33x32xf32>
    %127 = vector.extract_strided_slice %79 {offsets = [0, 32], sizes = [33, 32], strides = [1, 1]} : vector<33x64xf32> to vector<33x32xf32>
    %128 = arith.truncf %125 : vector<9x32xf32> to vector<9x32xbf16>
    %129 = arith.truncf %126 : vector<33x32xf32> to vector<33x32xbf16>
    %cst_67 = arith.constant dense<0.000000e+00> : vector<9x33xf32>
    %130 = tpu.matmul %128, %129, %cst_67 {dimension_numbers = #tpu.dot_dimension_numbers<[1], [1], [0], [0], [0, 0, 1, 0], [], []>} : vector<9x32xbf16>, vector<33x32xbf16>, vector<9x33xf32> -> vector<9x33xf32>
    %cst_68 = arith.constant 0.176776692 : f32
    %131 = vector.broadcast %cst_68 : f32 to vector<9x33xf32>
    %132 = arith.mulf %130, %131 : vector<9x33xf32>
    %cst_69 = arith.constant 5.000000e-01 : f32
    %133 = vector.broadcast %cst_69 : f32 to vector<9x33xf32>
    %134 = arith.cmpf ogt, %3, %133 : vector<9x33xf32>
    %cst_70 = arith.constant -1.000000e+30 : f32
    %135 = vector.broadcast %cst_70 : f32 to vector<9x33xf32>
    %136 = arith.select %134, %132, %135 : vector<9x33xi1>, vector<9x33xf32>
    %cst_71 = arith.constant dense<0xFF800000> : vector<9xf32>
    %137 = vector.multi_reduction <maximumf>, %136, %cst_71 [1] : vector<9x33xf32> to vector<9xf32>
    %138 = vector.shape_cast %137 : vector<9xf32> to vector<9x1xf32>
    %cst_72 = arith.constant 5.000000e-01 : f32
    %139 = vector.broadcast %cst_72 : f32 to vector<9x33xf32>
    %140 = arith.cmpf ogt, %3, %139 : vector<9x33xf32>
    %141 = vector.broadcast %138 : vector<9x1xf32> to vector<9x33xf32>
    %142 = arith.subf %136, %141 : vector<9x33xf32>
    %143 = math.exp %142 : vector<9x33xf32>
    %cst_73 = arith.constant 0.000000e+00 : f32
    %144 = vector.broadcast %cst_73 : f32 to vector<9x33xf32>
    %145 = arith.select %140, %143, %144 : vector<9x33xi1>, vector<9x33xf32>
    %cst_74 = arith.constant dense<0.000000e+00> : vector<9xf32>
    %146 = vector.multi_reduction <add>, %145, %cst_74 [1] : vector<9x33xf32> to vector<9xf32>
    %147 = vector.shape_cast %146 : vector<9xf32> to vector<9x1xf32>
    %cst_75 = arith.constant 1.000000e-16 : f32
    %148 = vector.broadcast %cst_75 : f32 to vector<9x1xf32>
    %149 = arith.addf %147, %148 : vector<9x1xf32>
    %cst_76 = arith.constant 1.000000e+00 : f32
    %150 = vector.broadcast %cst_76 : f32 to vector<9x1xf32>
    %151 = arith.divf %150, %149 : vector<9x1xf32>
    %152 = vector.broadcast %151 : vector<9x1xf32> to vector<9x33xf32>
    %153 = arith.mulf %145, %152 : vector<9x33xf32>
    %154 = arith.truncf %153 : vector<9x33xf32> to vector<9x33xbf16>
    %155 = arith.truncf %127 : vector<33x32xf32> to vector<33x32xbf16>
    %cst_77 = arith.constant dense<0.000000e+00> : vector<9x32xf32>
    %156 = tpu.matmul %154, %155, %cst_77 {dimension_numbers = #tpu.dot_dimension_numbers<[1], [0], [0], [1], [0, 0, 1, 1], [], []>} : vector<9x33xbf16>, vector<33x32xbf16>, vector<9x32xf32> -> vector<9x32xf32>
    %c32_78 = arith.constant 32 : index
    %c0_79 = arith.constant 0 : index
    %157 = vector.load %arg13[%c32_78, %c0_79] : memref<64x32xf32, #tpu.memory_space<vmem>>, vector<32x32xf32>
    %158 = arith.truncf %156 : vector<9x32xf32> to vector<9x32xbf16>
    %159 = arith.truncf %157 : vector<32x32xf32> to vector<32x32xbf16>
    %cst_80 = arith.constant dense<0.000000e+00> : vector<9x32xf32>
    %160 = tpu.matmul %158, %159, %cst_80 {dimension_numbers = #tpu.dot_dimension_numbers<[1], [0], [0], [1], [0, 0, 1, 1], [], []>} : vector<9x32xbf16>, vector<32x32xbf16>, vector<9x32xf32> -> vector<9x32xf32>
    %161 = arith.addf %124, %160 : vector<9x32xf32>
    %162 = vector.extract_strided_slice %15 {offsets = [0, 0], sizes = [9, 32], strides = [1, 1]} : vector<9x64xf32> to vector<9x32xf32>
    %163 = arith.mulf %161, %162 : vector<9x32xf32>
    %164 = arith.addf %0, %163 : vector<9x32xf32>
    %165 = vector.extract_strided_slice %15 {offsets = [0, 32], sizes = [9, 32], strides = [1, 1]} : vector<9x64xf32> to vector<9x32xf32>
    %166 = arith.addf %164, %165 : vector<9x32xf32>
    %cst_81 = arith.constant dense<0.000000e+00> : vector<2x32xf32>
    %167 = tpu.matmul %5, %166, %cst_81 {dimension_numbers = #tpu.dot_dimension_numbers<[1], [0], [0], [1], [0, 0, 1, 1], [], []>} : vector<2x9xf32>, vector<9x32xf32>, vector<2x32xf32> -> vector<2x32xf32>
    %cst_82 = arith.constant dense<0.000000e+00> : vector<2xf32>
    %168 = vector.multi_reduction <add>, %167, %cst_82 [1] : vector<2x32xf32> to vector<2xf32>
    %169 = vector.shape_cast %168 : vector<2xf32> to vector<2x1xf32>
    %170 = arith.mulf %169, %6 : vector<2x1xf32>
    %cst_83 = arith.constant dense<0.000000e+00> : vector<9x1xf32>
    %171 = tpu.matmul %4, %170, %cst_83 {dimension_numbers = #tpu.dot_dimension_numbers<[1], [0], [0], [1], [0, 0, 1, 1], [], []>} : vector<9x2xf32>, vector<2x1xf32>, vector<9x1xf32> -> vector<9x1xf32>
    %172 = vector.broadcast %171 : vector<9x1xf32> to vector<9x32xf32>
    %173 = arith.subf %166, %172 : vector<9x32xf32>
    %174 = arith.mulf %173, %173 : vector<9x32xf32>
    %cst_84 = arith.constant dense<0.000000e+00> : vector<2x32xf32>
    %175 = tpu.matmul %5, %174, %cst_84 {dimension_numbers = #tpu.dot_dimension_numbers<[1], [0], [0], [1], [0, 0, 1, 1], [], []>} : vector<2x9xf32>, vector<9x32xf32>, vector<2x32xf32> -> vector<2x32xf32>
    %cst_85 = arith.constant dense<0.000000e+00> : vector<2xf32>
    %176 = vector.multi_reduction <add>, %175, %cst_85 [1] : vector<2x32xf32> to vector<2xf32>
    %177 = vector.shape_cast %176 : vector<2xf32> to vector<2x1xf32>
    %178 = arith.mulf %177, %6 : vector<2x1xf32>
    %cst_86 = arith.constant dense<0.000000e+00> : vector<9x1xf32>
    %179 = tpu.matmul %4, %178, %cst_86 {dimension_numbers = #tpu.dot_dimension_numbers<[1], [0], [0], [1], [0, 0, 1, 1], [], []>} : vector<9x2xf32>, vector<2x1xf32>, vector<9x1xf32> -> vector<9x1xf32>
    %cst_87 = arith.constant 9.99999974E-6 : f32
    %180 = vector.broadcast %cst_87 : f32 to vector<9x1xf32>
    %181 = arith.addf %179, %180 : vector<9x1xf32>
    %182 = math.rsqrt %181 : vector<9x1xf32>
    %183 = vector.broadcast %182 : vector<9x1xf32> to vector<9x32xf32>
    %184 = arith.mulf %173, %183 : vector<9x32xf32>
    %c0_88 = arith.constant 0 : index
    %c0_89 = arith.constant 0 : index
    %185 = vector.load %arg15[%c0_88, %c0_89] : memref<32x128xf32, #tpu.memory_space<vmem>>, vector<32x128xf32>
    %186 = arith.truncf %184 : vector<9x32xf32> to vector<9x32xbf16>
    %187 = arith.truncf %185 : vector<32x128xf32> to vector<32x128xbf16>
    %cst_90 = arith.constant dense<0.000000e+00> : vector<9x128xf32>
    %188 = tpu.matmul %186, %187, %cst_90 {dimension_numbers = #tpu.dot_dimension_numbers<[1], [0], [0], [1], [0, 0, 1, 1], [], []>} : vector<9x32xbf16>, vector<32x128xbf16>, vector<9x128xf32> -> vector<9x128xf32>
    %c0_91 = arith.constant 0 : index
    %c0_92 = arith.constant 0 : index
    %189 = vector.load %arg16[%c0_91, %c0_92] : memref<1x128xf32, #tpu.memory_space<vmem>>, vector<1x128xf32>
    %190 = vector.broadcast %189 : vector<1x128xf32> to vector<9x128xf32>
    %191 = arith.addf %188, %190 : vector<9x128xf32>
    %cst_93 = arith.constant 0.000000e+00 : f32
    %192 = vector.broadcast %cst_93 : f32 to vector<9x128xf32>
    %193 = arith.cmpf ogt, %191, %192 : vector<9x128xf32>
    %cst_94 = arith.constant 0.00999999977 : f32
    %194 = vector.broadcast %cst_94 : f32 to vector<9x128xf32>
    %195 = arith.mulf %194, %191 : vector<9x128xf32>
    %196 = arith.select %193, %191, %195 : vector<9x128xi1>, vector<9x128xf32>
    %c0_95 = arith.constant 0 : index
    %c0_96 = arith.constant 0 : index
    %197 = vector.load %arg17[%c0_95, %c0_96] : memref<128x32xf32, #tpu.memory_space<vmem>>, vector<128x32xf32>
    %198 = arith.truncf %196 : vector<9x128xf32> to vector<9x128xbf16>
    %199 = arith.truncf %197 : vector<128x32xf32> to vector<128x32xbf16>
    %cst_97 = arith.constant dense<0.000000e+00> : vector<9x32xf32>
    %200 = tpu.matmul %198, %199, %cst_97 {dimension_numbers = #tpu.dot_dimension_numbers<[1], [0], [0], [1], [0, 0, 1, 1], [], []>} : vector<9x128xbf16>, vector<128x32xbf16>, vector<9x32xf32> -> vector<9x32xf32>
    %201 = arith.addf %166, %200 : vector<9x32xf32>
    %c0_98 = arith.constant 0 : index
    %c0_99 = arith.constant 0 : index
    %202 = vector.load %arg18[%c0_98, %c0_99] : memref<1x32xf32, #tpu.memory_space<vmem>>, vector<1x32xf32>
    %203 = vector.broadcast %202 : vector<1x32xf32> to vector<9x32xf32>
    %204 = arith.addf %201, %203 : vector<9x32xf32>
    %c0_100 = arith.constant 0 : index
    %c0_101 = arith.constant 0 : index
    %205 = vector.load %arg21[%c0_100, %c0_101] : memref<9x32xf32, #tpu.memory_space<vmem>>, vector<9x32xf32>
    tpu.vector_store %arg21[%c0_100, %c0_101], %204 {strides = array<i32>} : memref<9x32xf32, #tpu.memory_space<vmem>>, vector<9x32xf32>,
    return
  }
}

module attributes {stable_mosaic.version = 11 : i64} {
  func.func @_mlp_kernel(%arg0: memref<5x32xf32, #tpu.memory_space<vmem>>, %arg1: memref<32x4xf32, #tpu.memory_space<vmem>>, %arg2: memref<1x4xf32, #tpu.memory_space<vmem>>, %arg3: memref<5x4xf32, #tpu.memory_space<vmem>>) attributes {dimension_semantics = [], scalar_prefetch = 0 : i64, scratch_operands = 0 : i64, tpu.core_type = #tpu.core_type<tc>} {
    %c0 = arith.constant 0 : index
    %c0_0 = arith.constant 0 : index
    %0 = vector.load %arg0[%c0, %c0_0] : memref<5x32xf32, #tpu.memory_space<vmem>>, vector<5x32xf32>
    %c0_1 = arith.constant 0 : index
    %c0_2 = arith.constant 0 : index
    %1 = vector.load %arg1[%c0_1, %c0_2] : memref<32x4xf32, #tpu.memory_space<vmem>>, vector<32x4xf32>
    %c0_3 = arith.constant 0 : index
    %c0_4 = arith.constant 0 : index
    %2 = vector.load %arg2[%c0_3, %c0_4] : memref<1x4xf32, #tpu.memory_space<vmem>>, vector<1x4xf32>
    %3 = arith.truncf %0 : vector<5x32xf32> to vector<5x32xbf16>
    %4 = arith.truncf %1 : vector<32x4xf32> to vector<32x4xbf16>
    %cst = arith.constant dense<0.000000e+00> : vector<5x4xf32>
    %5 = tpu.matmul %3, %4, %cst {dimension_numbers = #tpu.dot_dimension_numbers<[1], [0], [0], [1], [0, 0, 1, 1], [], []>} : vector<5x32xbf16>, vector<32x4xbf16>, vector<5x4xf32> -> vector<5x4xf32>
    %6 = vector.broadcast %2 : vector<1x4xf32> to vector<5x4xf32>
    %7 = arith.addf %5, %6 : vector<5x4xf32>
    %c0_5 = arith.constant 0 : index
    %c0_6 = arith.constant 0 : index
    %8 = vector.load %arg3[%c0_5, %c0_6] : memref<5x4xf32, #tpu.memory_space<vmem>>, vector<5x4xf32>
    tpu.vector_store %arg3[%c0_5, %c0_6], %7 {strides = array<i32>} : memref<5x4xf32, #tpu.memory_space<vmem>>, vector<5x4xf32>,
    return
  }
}

module attributes {stable_mosaic.version = 11 : i64} {
  func.func @_mlp_kernel(%arg0: memref<3x32xf32, #tpu.memory_space<vmem>>, %arg1: memref<32x1xf32, #tpu.memory_space<vmem>>, %arg2: memref<1x1xf32, #tpu.memory_space<vmem>>, %arg3: memref<3x1xf32, #tpu.memory_space<vmem>>) attributes {dimension_semantics = [], scalar_prefetch = 0 : i64, scratch_operands = 0 : i64, tpu.core_type = #tpu.core_type<tc>} {
    %c0 = arith.constant 0 : index
    %c0_0 = arith.constant 0 : index
    %0 = vector.load %arg0[%c0, %c0_0] : memref<3x32xf32, #tpu.memory_space<vmem>>, vector<3x32xf32>
    %c0_1 = arith.constant 0 : index
    %c0_2 = arith.constant 0 : index
    %1 = vector.load %arg1[%c0_1, %c0_2] : memref<32x1xf32, #tpu.memory_space<vmem>>, vector<32x1xf32>
    %c0_3 = arith.constant 0 : index
    %c0_4 = arith.constant 0 : index
    %2 = vector.load %arg2[%c0_3, %c0_4] : memref<1x1xf32, #tpu.memory_space<vmem>>, vector<1x1xf32>
    %3 = arith.truncf %0 : vector<3x32xf32> to vector<3x32xbf16>
    %4 = arith.truncf %1 : vector<32x1xf32> to vector<32x1xbf16>
    %cst = arith.constant dense<0.000000e+00> : vector<3x1xf32>
    %5 = tpu.matmul %3, %4, %cst {dimension_numbers = #tpu.dot_dimension_numbers<[1], [0], [0], [1], [0, 0, 1, 1], [], []>} : vector<3x32xbf16>, vector<32x1xbf16>, vector<3x1xf32> -> vector<3x1xf32>
    %6 = vector.broadcast %2 : vector<1x1xf32> to vector<3x1xf32>
    %7 = arith.addf %5, %6 : vector<3x1xf32>
    %c0_5 = arith.constant 0 : index
    %c0_6 = arith.constant 0 : index
    %8 = vector.load %arg3[%c0_5, %c0_6] : memref<3x1xf32, #tpu.memory_space<vmem>>, vector<3x1xf32>
    tpu.vector_store %arg3[%c0_5, %c0_6], %7 {strides = array<i32>} : memref<3x1xf32, #tpu.memory_space<vmem>>, vector<3x1xf32>,
    return
  }
}

module attributes {stable_mosaic.version = 11 : i64} {
  func.func @_pool_kernel(%arg0: memref<2x7xf32, #tpu.memory_space<vmem>>, %arg1: memref<7x32xf32, #tpu.memory_space<vmem>>, %arg2: memref<2x1xf32, #tpu.memory_space<vmem>>, %arg3: memref<2x32xf32, #tpu.memory_space<vmem>>) attributes {dimension_semantics = [], scalar_prefetch = 0 : i64, scratch_operands = 0 : i64, tpu.core_type = #tpu.core_type<tc>} {
    %c0 = arith.constant 0 : index
    %c0_0 = arith.constant 0 : index
    %0 = vector.load %arg0[%c0, %c0_0] : memref<2x7xf32, #tpu.memory_space<vmem>>, vector<2x7xf32>
    %c0_1 = arith.constant 0 : index
    %c0_2 = arith.constant 0 : index
    %1 = vector.load %arg1[%c0_1, %c0_2] : memref<7x32xf32, #tpu.memory_space<vmem>>, vector<7x32xf32>
    %cst = arith.constant dense<0.000000e+00> : vector<2x32xf32>
    %2 = tpu.matmul %0, %1, %cst {dimension_numbers = #tpu.dot_dimension_numbers<[1], [0], [0], [1], [0, 0, 1, 1], [], []>} : vector<2x7xf32>, vector<7x32xf32>, vector<2x32xf32> -> vector<2x32xf32>
    %c0_3 = arith.constant 0 : index
    %c0_4 = arith.constant 0 : index
    %3 = vector.load %arg2[%c0_3, %c0_4] : memref<2x1xf32, #tpu.memory_space<vmem>>, vector<2x1xf32>
    %4 = vector.broadcast %3 : vector<2x1xf32> to vector<2x32xf32>
    %5 = arith.mulf %2, %4 : vector<2x32xf32>
    %c0_5 = arith.constant 0 : index
    %c0_6 = arith.constant 0 : index
    %6 = vector.load %arg3[%c0_5, %c0_6] : memref<2x32xf32, #tpu.memory_space<vmem>>, vector<2x32xf32>
    tpu.vector_store %arg3[%c0_5, %c0_6], %5 {strides = array<i32>} : memref<2x32xf32, #tpu.memory_space<vmem>>, vector<2x32xf32>,
    return
  }
}

module attributes {stable_mosaic.version = 11 : i64} {
  func.func @_mlp_kernel(%arg0: memref<2x64xf32, #tpu.memory_space<vmem>>, %arg1: memref<64x1xf32, #tpu.memory_space<vmem>>, %arg2: memref<1x1xf32, #tpu.memory_space<vmem>>, %arg3: memref<2x1xf32, #tpu.memory_space<vmem>>) attributes {dimension_semantics = [], scalar_prefetch = 0 : i64, scratch_operands = 0 : i64, tpu.core_type = #tpu.core_type<tc>} {
    %c0 = arith.constant 0 : index
    %c0_0 = arith.constant 0 : index
    %0 = vector.load %arg0[%c0, %c0_0] : memref<2x64xf32, #tpu.memory_space<vmem>>, vector<2x64xf32>
    %c0_1 = arith.constant 0 : index
    %c0_2 = arith.constant 0 : index
    %1 = vector.load %arg1[%c0_1, %c0_2] : memref<64x1xf32, #tpu.memory_space<vmem>>, vector<64x1xf32>
    %c0_3 = arith.constant 0 : index
    %c0_4 = arith.constant 0 : index
    %2 = vector.load %arg2[%c0_3, %c0_4] : memref<1x1xf32, #tpu.memory_space<vmem>>, vector<1x1xf32>
    %3 = arith.truncf %0 : vector<2x64xf32> to vector<2x64xbf16>
    %4 = arith.truncf %1 : vector<64x1xf32> to vector<64x1xbf16>
    %cst = arith.constant dense<0.000000e+00> : vector<2x1xf32>
    %5 = tpu.matmul %3, %4, %cst {dimension_numbers = #tpu.dot_dimension_numbers<[1], [0], [0], [1], [0, 0, 1, 1], [], []>} : vector<2x64xbf16>, vector<64x1xbf16>, vector<2x1xf32> -> vector<2x1xf32>
    %6 = vector.broadcast %2 : vector<1x1xf32> to vector<2x1xf32>
    %7 = arith.addf %5, %6 : vector<2x1xf32>
    %c0_5 = arith.constant 0 : index
    %c0_6 = arith.constant 0 : index
    %8 = vector.load %arg3[%c0_5, %c0_6] : memref<2x1xf32, #tpu.memory_space<vmem>>, vector<2x1xf32>
    tpu.vector_store %arg3[%c0_5, %c0_6], %7 {strides = array<i32>} : memref<2x1xf32, #tpu.memory_space<vmem>>, vector<2x1xf32>,
    return
  }
}

module attributes {stable_mosaic.version = 11 : i64} {
  func.func @_mlp_kernel(%arg0: memref<7x32xf32, #tpu.memory_space<vmem>>, %arg1: memref<32x6xf32, #tpu.memory_space<vmem>>, %arg2: memref<1x6xf32, #tpu.memory_space<vmem>>, %arg3: memref<7x6xf32, #tpu.memory_space<vmem>>) attributes {dimension_semantics = [], scalar_prefetch = 0 : i64, scratch_operands = 0 : i64, tpu.core_type = #tpu.core_type<tc>} {
    %c0 = arith.constant 0 : index
    %c0_0 = arith.constant 0 : index
    %0 = vector.load %arg0[%c0, %c0_0] : memref<7x32xf32, #tpu.memory_space<vmem>>, vector<7x32xf32>
    %c0_1 = arith.constant 0 : index
    %c0_2 = arith.constant 0 : index
    %1 = vector.load %arg1[%c0_1, %c0_2] : memref<32x6xf32, #tpu.memory_space<vmem>>, vector<32x6xf32>
    %c0_3 = arith.constant 0 : index
    %c0_4 = arith.constant 0 : index
    %2 = vector.load %arg2[%c0_3, %c0_4] : memref<1x6xf32, #tpu.memory_space<vmem>>, vector<1x6xf32>
    %3 = arith.truncf %0 : vector<7x32xf32> to vector<7x32xbf16>
    %4 = arith.truncf %1 : vector<32x6xf32> to vector<32x6xbf16>
    %cst = arith.constant dense<0.000000e+00> : vector<7x6xf32>
    %5 = tpu.matmul %3, %4, %cst {dimension_numbers = #tpu.dot_dimension_numbers<[1], [0], [0], [1], [0, 0, 1, 1], [], []>} : vector<7x32xbf16>, vector<32x6xbf16>, vector<7x6xf32> -> vector<7x6xf32>
    %6 = vector.broadcast %2 : vector<1x6xf32> to vector<7x6xf32>
    %7 = arith.addf %5, %6 : vector<7x6xf32>
    %c0_5 = arith.constant 0 : index
    %c0_6 = arith.constant 0 : index
    %8 = vector.load %arg3[%c0_5, %c0_6] : memref<7x6xf32, #tpu.memory_space<vmem>>, vector<7x6xf32>
    tpu.vector_store %arg3[%c0_5, %c0_6], %7 {strides = array<i32>} : memref<7x6xf32, #tpu.memory_space<vmem>>, vector<7x6xf32>,
    return
  }
}

module attributes {stable_mosaic.version = 11 : i64} {
  func.func @_mlp_kernel(%arg0: memref<7x32xf32, #tpu.memory_space<vmem>>, %arg1: memref<32x8xf32, #tpu.memory_space<vmem>>, %arg2: memref<1x8xf32, #tpu.memory_space<vmem>>, %arg3: memref<7x8xf32, #tpu.memory_space<vmem>>) attributes {dimension_semantics = [], scalar_prefetch = 0 : i64, scratch_operands = 0 : i64, tpu.core_type = #tpu.core_type<tc>} {
    %c0 = arith.constant 0 : index
    %c0_0 = arith.constant 0 : index
    %0 = vector.load %arg0[%c0, %c0_0] : memref<7x32xf32, #tpu.memory_space<vmem>>, vector<7x32xf32>
    %c0_1 = arith.constant 0 : index
    %c0_2 = arith.constant 0 : index
    %1 = vector.load %arg1[%c0_1, %c0_2] : memref<32x8xf32, #tpu.memory_space<vmem>>, vector<32x8xf32>
    %c0_3 = arith.constant 0 : index
    %c0_4 = arith.constant 0 : index
    %2 = vector.load %arg2[%c0_3, %c0_4] : memref<1x8xf32, #tpu.memory_space<vmem>>, vector<1x8xf32>
    %3 = arith.truncf %0 : vector<7x32xf32> to vector<7x32xbf16>
    %4 = arith.truncf %1 : vector<32x8xf32> to vector<32x8xbf16>
    %cst = arith.constant dense<0.000000e+00> : vector<7x8xf32>
    %5 = tpu.matmul %3, %4, %cst {dimension_numbers = #tpu.dot_dimension_numbers<[1], [0], [0], [1], [0, 0, 1, 1], [], []>} : vector<7x32xbf16>, vector<32x8xbf16>, vector<7x8xf32> -> vector<7x8xf32>
    %6 = vector.broadcast %2 : vector<1x8xf32> to vector<7x8xf32>
    %7 = arith.addf %5, %6 : vector<7x8xf32>
    %c0_5 = arith.constant 0 : index
    %c0_6 = arith.constant 0 : index
    %8 = vector.load %arg3[%c0_5, %c0_6] : memref<7x8xf32, #tpu.memory_space<vmem>>, vector<7x8xf32>
    tpu.vector_store %arg3[%c0_5, %c0_6], %7 {strides = array<i32>} : memref<7x8xf32, #tpu.memory_space<vmem>>, vector<7x8xf32>,
    return
  }
}

</mosaic_0001>

<bundles_post_ra>
// kernel: _lambda_.25
= control target key start
LH: loop header
LB: loop body
LE: loop exit
PB: predicated region body
PF: predicated region fallthrough
CT: control target
= control target key end

     0   :  { %v278_v0 = vmov 0.0   ;;  %vm45_vm0 = vcmask 1044480   ;;  %vm279_vm1 = vmmov 0   ;;  %vm41_vm2 = vcmask 80896   ;;  %s406_s1 = inlined_call_operand.vmem [shape: f32[10,64], index: 1, kind: input, shape index: {}]   ;;  %s407_s0 = inlined_call_operand.vmem [shape: f32[2,10], index: 0, kind: input, shape index: {}]   ;;  %s408_s3 = inlined_call_operand.vmem [shape: f32[64,64], index: 3, kind: input, shape index: {}]   ;;  %s409_s5 = inlined_call_operand.vmem [shape: f32[64,1], index: 5, kind: input, shape index: {}]   ;;  %s410_s2 = inlined_call_operand.vmem [shape: f32[1,64], index: 2, kind: input, shape index: {}]   ;;  %s411_s6 = inlined_call_operand.<no memory space> [shape: f32[1,1], index: 6, kind: input, shape index: {}]   ;;  %s412_s4 = inlined_call_operand.vmem [shape: f32[1,64], index: 4, kind: input, shape index: {}]   ;;  %s413_s7 = inlined_call_operand.vmem [shape: f32[2,1], index: 7, kind: output, shape index: {}]  }
   0x1   :  { %246 = vmatprep.subr.bf16.mxu0 %v278_v0  ;;  %v30_v1 = vld [vmem:[%s406_s1] sm:$0xff]  ;;  %v31_v2 = vld [vmem:[%s406_s1 + $0x8] sm:$0x3]  ;;  %248 = vmatprep.mubr.msk.bf16.mxu0 %vm279_vm1, %v278_v0  ;;  %v98_v5 = vld [vmem:[%s408_s3 + $0x30] sm:$0xff]  ;;  %vm112_vm4 = vcmask 523264   ;;  %v12_v40 = vstv %s411_s6  ;;  %vm222_vm6 = vcmask 1024  }
   0x2   :  { %v29_v3 = vld [vmem:[%s407_s0] sm:$0x3]  ;;  %v34_v4 = vpack.c.bf16 %v31_v2, %v30_v1  ;;  %252 = vmatprep.subr.bf16.mxu1 %v278_v0  ;;  %v99_v6 = vld [vmem:[%s408_s3 + $0x38] sm:$0xff]  ;;  %260 = vmatprep.mubr.msk.bf16.mxu1 %vm279_vm1, %v278_v0  ;;  %v97_v9 = vld [vmem:[%s408_s3 + $0x28] sm:$0xff]  ;;  %13 = vst [vmem:[#allocation2] sm:$0x1] %v12_v40 }
   0x3   :  { %v96_v7 = vld [vmem:[%s408_s3 + $0x20] sm:$0xff]  ;;  %v105_v8 = vpack.c.bf16 %v99_v6, %v98_v5  ;;  %v33_v11 = vpack.c.bf16 %v29_v3, %v29_v3  ;;  %v94_v13 = vld [vmem:[%s408_s3 + $0x10] sm:$0xff]  ;;  %v95_v14 = vld [vmem:[%s408_s3 + $0x18] sm:$0xff] }
   0x4   :  { %v47_v10 = vsel %vm45_vm0, %v34_v4, 0  ;;  %v104_v12 = vpack.c.bf16 %v97_v9, %v96_v7  ;;  %v103_v15 = vpack.c.bf16 %v95_v14, %v94_v13  ;;  %v92_v16 = vld [vmem:[%s408_s3] sm:$0xff]  ;;  %v93_v17 = vld [vmem:[%s408_s3 + $0x8] sm:$0xff]  ;;  %v165_v19 = vld [vmem:[%s409_s5 + $0x30] sm:$0xff] }
   0x5   :  { %247 = vmatpush3.bf16.msra.mxu0 %v47_v10  ;;  %253 = vmatpush3.bf16.msra.mxu1 %v105_v8  ;;  %v102_v18 = vpack.c.bf16 %v93_v17, %v92_v16  ;;  %v166_v20 = vld [vmem:[%s409_s5 + $0x38] sm:$0xff]  ;;  %v163_v21 = vld [vmem:[%s409_s5 + $0x20] sm:$0xff]  ;;  %v164_v23 = vld [vmem:[%s409_s5 + $0x28] sm:$0xff] }
   0x6   :  { %254 = vmatprep.subr.bf16.mxu1 %v278_v0  ;;  %264 = vmatprep.subr.bf16.mxu0 %v278_v0  ;;  %v172_v22 = vpack.c.bf16 %v166_v20, %v165_v19  ;;  %v171_v24 = vpack.c.bf16 %v164_v23, %v163_v21  ;;  %v228_v25 = vld [vmem:[%s410_s2] ss:$0 sm:$0xff]  ;;  %v161_v34 = vld [vmem:[%s409_s5 + $0x10] sm:$0xff]  ;;  %v162_v35 = vld [vmem:[%s409_s5 + $0x18] sm:$0xff] }
   0x7   :  { %v170_v36 = vpack.c.bf16 %v162_v35, %v161_v34  ;;  %v159_v37 = vld [vmem:[%s409_s5] sm:$0xff]  ;;  %v160_v38 = vld [vmem:[%s409_s5 + $0x8] sm:$0xff] }
   0x8   :  { %249 = vmatmul.mubr.msk.bf16.vlgmr.msra.gmra.mxu0 %vm41_vm2, %v33_v11  ;;  %v169_v39 = vpack.c.bf16 %v160_v38, %v159_v37  ;;  %v230_v41 = vld [vmem:[%s412_s4] ss:$0 sm:$0xff] }
   0x9   :  { %255 = vmatpush3.bf16.msra.mxu1 %v104_v12  ;;  %272 = vmatprep.mubr.msk.bf16.mxu0 %vm279_vm1, %v278_v0  ;;  %v232_v50 = vld [vmem:[#allocation2] ss:$0 sm:$0xff] }
   0xa   :  { %256 = vmatprep.subr.bf16.mxu1 %v278_v0  ;;  %265 = vmatpush3.bf16.msra.mxu0 %v172_v22 }
   0xb   :  { %266 = vmatprep.subr.bf16.mxu0 %v278_v0 }
   0xd   :  { %257 = vmatpush3.bf16.msra.mxu1 %v103_v15 }
   0xe   :  { %258 = vmatprep.subr.bf16.mxu1 %v278_v0  ;;  %267 = vmatpush3.bf16.msra.mxu0 %v171_v24 }
   0xf   :  { %268 = vmatprep.subr.bf16.mxu0 %v278_v0 }
  0x11   :  { %259 = vmatpush3.bf16.msra.mxu1 %v102_v18 }
  0x12   :  { %269 = vmatpush3.bf16.msra.mxu0 %v170_v36 }
  0x13   :  { %270 = vmatprep.subr.bf16.mxu0 %v278_v0 }
  0x16   :  { %271 = vmatpush3.bf16.msra.mxu0 %v169_v39 }
  0xc8   :  { %v83_v26 = vpop.f32.mrf.mxu0 }
  0xc9   :  { %v84_v27 = vadd.f32 %v228_v25, %v83_v26 }
  0xca   :  { %v250_v28 = vpop.f32.mrf.mxu0 }
  0xcb   :  { %vm89_vm3 = vcmp.gt.f32.partialorder %v84_v27, 0.0  ;;  %v90_v29 = vmul.f32 0.01, %v84_v27 }
  0xcc   :  { %v86_v30 = vpop.f32.mrf.mxu0 }
  0xcd   :  { %v91_v31 = vsel %vm89_vm3, %v84_v27, %v90_v29 }
  0xce   :  { %v101_v32 = vpack.c.bf16 %v91_v31, %v91_v31  ;;  %v251_v33 = vpop.f32.mrf.mxu0 }
  0xd0   :  { %261 = vmatmul.mubr.msk.bf16.vlgmr.msra.gmra.mxu1 %vm112_vm4, %v101_v32 }
 0x190   :  { %v150_v42 = vpop.f32.mrf.mxu1 }
 0x191   :  { %v151_v43 = vadd.f32 %v230_v41, %v150_v42 }
 0x192   :  { %v262_v44 = vpop.f32.mrf.mxu1 }
 0x193   :  { %vm156_vm5 = vcmp.gt.f32.partialorder %v151_v43, 0.0  ;;  %v157_v45 = vmul.f32 0.01, %v151_v43 }
 0x194   :  { %v153_v46 = vpop.f32.mrf.mxu1 }
 0x195   :  { %v158_v47 = vsel %vm156_vm5, %v151_v43, %v157_v45 }
 0x196   :  { %v168_v48 = vpack.c.bf16 %v158_v47, %v158_v47  ;;  %v263_v49 = vpop.f32.mrf.mxu1 }
 0x198   :  { %273 = vmatmul.mubr.msk.bf16.vlgmr.msra.gmra.mxu0 %vm112_vm4, %v168_v48 }
 0x258   :  { %v216_v51 = vpop.f32.mrf.mxu0 }
 0x259   :  { %v217_v52 = vadd.f32 %v232_v50, %v216_v51 }
 0x25a   :  { %v274_v53 = vpop.f32.mrf.mxu0 }
 0x25b   :  { %223 = vst.msk [vmem:[%s413_s7] sm:$0x3] %vm222_vm6, %v217_v52 }
 0x25c   :  { %v219_v54 = vpop.f32.mrf.mxu0 }
 0x25e   :  { %v275_v55 = vpop.f32.mrf.mxu0 }

// kernel: _lambda_.15
= control target key start
LH: loop header
LB: loop body
LE: loop exit
PB: predicated region body
PF: predicated region fallthrough
CT: control target
= control target key end

     0   :  { %v252_v0 = vmov 0.0   ;;  %vm43_vm0 = vcmask 1044480   ;;  %vm253_vm1 = vmmov 0   ;;  %vm39_vm2 = vcmask 80896   ;;  %s341_s1 = inlined_call_operand.vmem [shape: f32[10,32], index: 1, kind: input, shape index: {}]   ;;  %s342_s0 = inlined_call_operand.vmem [shape: f32[2,10], index: 0, kind: input, shape index: {}]   ;;  %s343_s3 = inlined_call_operand.vmem [shape: f32[32,32], index: 3, kind: input, shape index: {}]   ;;  %s344_s2 = inlined_call_operand.vmem [shape: f32[1,32], index: 2, kind: input, shape index: {}]   ;;  %s345_s5 = inlined_call_operand.vmem [shape: f32[32,32], index: 5, kind: input, shape index: {}]   ;;  %s346_s4 = inlined_call_operand.vmem [shape: f32[1,32], index: 4, kind: input, shape index: {}]   ;;  %s347_s6 = inlined_call_operand.vmem [shape: f32[1,32], index: 6, kind: input, shape index: {}]   ;;  %s348_s7 = inlined_call_operand.vmem [shape: f32[2,32], index: 7, kind: output, shape index: {}]  }
   0x1   :  { %228 = vmatprep.subr.bf16.mxu0 %v252_v0  ;;  %v28_v1 = vld [vmem:[%s341_s1] sm:$0xff]  ;;  %v29_v2 = vld [vmem:[%s341_s1 + $0x8] sm:$0x3]  ;;  %230 = vmatprep.mubr.msk.bf16.mxu0 %vm253_vm1, %v252_v0  ;;  %v92_v7 = vld [vmem:[%s343_s3 + $0x10] sm:$0xff]  ;;  %vm104_vm4 = vcmask 261120   ;;  %vm208_vm6 = vcmask 254976  }
   0x2   :  { %v27_v3 = vld [vmem:[%s342_s0] sm:$0x3]  ;;  %v32_v4 = vpack.c.bf16 %v29_v2, %v28_v1  ;;  %234 = vmatprep.subr.bf16.mxu1 %v252_v0  ;;  %238 = vmatprep.mubr.msk.bf16.mxu1 %vm253_vm1, %v252_v0  ;;  %v93_v8 = vld [vmem:[%s343_s3 + $0x18] sm:$0xff]  ;;  %v91_v11 = vld [vmem:[%s343_s3 + $0x8] sm:$0xff] }
   0x3   :  { %v31_v6 = vpack.c.bf16 %v27_v3, %v27_v3  ;;  %v97_v9 = vpack.c.bf16 %v93_v8, %v92_v7  ;;  %v90_v10 = vld [vmem:[%s343_s3] sm:$0xff]  ;;  %v153_v22 = vld [vmem:[%s345_s5 + $0x10] sm:$0xff]  ;;  %v154_v23 = vld [vmem:[%s345_s5 + $0x18] sm:$0xff] }
   0x4   :  { %v45_v5 = vsel %vm43_vm0, %v32_v4, 0  ;;  %v96_v12 = vpack.c.bf16 %v91_v11, %v90_v10  ;;  %v214_v13 = vld [vmem:[%s344_s2] ss:$0 sm:$0xff]  ;;  %v158_v24 = vpack.c.bf16 %v154_v23, %v153_v22  ;;  %v152_v26 = vld [vmem:[%s345_s5 + $0x8] sm:$0xff] }
   0x5   :  { %229 = vmatpush3.bf16.msra.mxu0 %v45_v5  ;;  %235 = vmatpush3.bf16.msra.mxu1 %v97_v9  ;;  %v151_v25 = vld [vmem:[%s345_s5] sm:$0xff] }
   0x6   :  { %242 = vmatprep.subr.bf16.mxu0 %v252_v0  ;;  %236 = vmatprep.subr.bf16.mxu1 %v252_v0  ;;  %v157_v27 = vpack.c.bf16 %v152_v26, %v151_v25  ;;  %v216_v28 = vld [vmem:[%s346_s4] ss:$0 sm:$0xff] }
   0x7   :  { %v218_v37 = vld [vmem:[%s347_s6] ss:$0 sm:$0xff] }
   0x8   :  { %231 = vmatmul.mubr.msk.bf16.vlgmr.msra.gmra.mxu0 %vm39_vm2, %v31_v6 }
   0x9   :  { %246 = vmatprep.mubr.msk.bf16.mxu0 %vm253_vm1, %v252_v0  ;;  %237 = vmatpush3.bf16.msra.mxu1 %v96_v12 }
   0xa   :  { %243 = vmatpush3.bf16.msra.mxu0 %v158_v24 }
   0xb   :  { %244 = vmatprep.subr.bf16.mxu0 %v252_v0 }
   0xe   :  { %245 = vmatpush3.bf16.msra.mxu0 %v157_v27 }
  0xc8   :  { %v81_v14 = vpop.f32.mrf.mxu0 }
  0xc9   :  { %v82_v15 = vadd.f32 %v214_v13, %v81_v14 }
  0xca   :  { %v232_v16 = vpop.f32.mrf.mxu0 }
  0xcb   :  { %vm87_vm3 = vcmp.gt.f32.partialorder %v82_v15, 0.0  ;;  %v88_v17 = vmul.f32 0.01, %v82_v15 }
  0xcc   :  { %v84_v18 = vpop.f32.mrf.mxu0 }
  0xcd   :  { %v89_v19 = vsel %vm87_vm3, %v82_v15, %v88_v17 }
  0xce   :  { %v95_v20 = vpack.c.bf16 %v89_v19, %v89_v19  ;;  %v233_v21 = vpop.f32.mrf.mxu0 }
  0xd0   :  { %239 = vmatmul.mubr.msk.bf16.vlgmr.msra.gmra.mxu1 %vm104_vm4, %v95_v20 }
 0x190   :  { %v142_v29 = vpop.f32.mrf.mxu1 }
 0x191   :  { %v143_v30 = vadd.f32 %v216_v28, %v142_v29 }
 0x192   :  { %v240_v31 = vpop.f32.mrf.mxu1 }
 0x193   :  { %vm148_vm5 = vcmp.gt.f32.partialorder %v143_v30, 0.0  ;;  %v149_v32 = vmul.f32 0.01, %v143_v30 }
 0x194   :  { %v145_v33 = vpop.f32.mrf.mxu1 }
 0x195   :  { %v150_v34 = vsel %vm148_vm5, %v143_v30, %v149_v32 }
 0x196   :  { %v156_v35 = vpack.c.bf16 %v150_v34, %v150_v34  ;;  %v241_v36 = vpop.f32.mrf.mxu1 }
 0x198   :  { %247 = vmatmul.mubr.msk.bf16.vlgmr.msra.gmra.mxu0 %vm104_vm4, %v156_v35 }
 0x258   :  { %v202_v38 = vpop.f32.mrf.mxu0 }
 0x259   :  { %v203_v39 = vadd.f32 %v218_v37, %v202_v38 }
 0x25a   :  { %v248_v40 = vpop.f32.mrf.mxu0 }
 0x25b   :  { %209 = vst.msk [vmem:[%s348_s7] sm:$0x3] %vm208_vm6, %v203_v39 }
 0x25c   :  { %v205_v41 = vpop.f32.mrf.mxu0 }
 0x25e   :  { %v249_v42 = vpop.f32.mrf.mxu0 }

// kernel: _lambda_.13
= control target key start
LH: loop header
LB: loop body
LE: loop exit
PB: predicated region body
PF: predicated region fallthrough
CT: control target
= control target key end

     0   :  { %vm42_vm0 = vcmask 1042432   ;;  %vm43_vm1 = vcmask 1043456   ;;  %v255_v0 = vmov 0.0   ;;  %v256_v2 = vmov 65535   ;;  %s342_s1 = inlined_call_operand.vmem [shape: f32[7,32], index: 1, kind: input, shape index: {}]   ;;  %s343_s0 = inlined_call_operand.vmem [shape: f32[7,7], index: 0, kind: input, shape index: {}]   ;;  %s344_s3 = inlined_call_operand.vmem [shape: f32[32,32], index: 3, kind: input, shape index: {}]   ;;  %s345_s2 = inlined_call_operand.vmem [shape: f32[1,32], index: 2, kind: input, shape index: {}]   ;;  %s346_s5 = inlined_call_operand.vmem [shape: f32[32,32], index: 5, kind: input, shape index: {}]   ;;  %s347_s4 = inlined_call_operand.vmem [shape: f32[1,32], index: 4, kind: input, shape index: {}]   ;;  %s348_s6 = inlined_call_operand.vmem [shape: f32[1,32], index: 6, kind: input, shape index: {}]   ;;  %s349_s7 = inlined_call_operand.vmem [shape: f32[7,32], index: 7, kind: output, shape index: {}]  }
   0x1   :  { %230 = vmatprep.subr.bf16.mxu0 %v255_v0  ;;  %v28_v1 = vld [vmem:[%s342_s1] sm:$0x7f]  ;;  %v44_v3 = vsel %vm42_vm0, 4294967295, %v256_v2  ;;  %236 = vmatprep.subr.bf16.mxu1 %v255_v0  ;;  %vm257_vm2 = vmmov 0   ;;  %vm38_vm3 = vcmask 56320   ;;  %v94_v9 = vld [vmem:[%s344_s3 + $0x10] sm:$0xff] }
   0x2   :  { %v31_v4 = vpack.c.bf16 %v28_v1, %v28_v1  ;;  %v45_v5 = vsel %vm43_vm1, %v44_v3, 0  ;;  %232 = vmatprep.mubr.msk.bf16.mxu0 %vm257_vm2, %v255_v0  ;;  %v27_v6 = vld [vmem:[%s343_s0] sm:$0x7f]  ;;  %240 = vmatprep.mubr.msk.bf16.mxu1 %vm257_vm2, %v255_v0  ;;  %v95_v10 = vld [vmem:[%s344_s3 + $0x18] sm:$0xff]  ;;  %v93_v13 = vld [vmem:[%s344_s3 + $0x8] sm:$0xff]  ;;  %vm106_vm5 = vcmask 261120  }
   0x3   :  { %v30_v8 = vpack.c.bf16 %v27_v6, %v27_v6  ;;  %v99_v11 = vpack.c.bf16 %v95_v10, %v94_v9  ;;  %v92_v12 = vld [vmem:[%s344_s3] sm:$0xff]  ;;  %v155_v24 = vld [vmem:[%s346_s5 + $0x10] sm:$0xff]  ;;  %v156_v25 = vld [vmem:[%s346_s5 + $0x18] sm:$0xff]  ;;  %vm210_vm7 = vcmask 260096  }
   0x4   :  { %v47_v7 = vand.u32 %v45_v5, %v31_v4  ;;  %v98_v14 = vpack.c.bf16 %v93_v13, %v92_v12  ;;  %v216_v15 = vld [vmem:[%s345_s2] ss:$0 sm:$0xff]  ;;  %v160_v26 = vpack.c.bf16 %v156_v25, %v155_v24  ;;  %v154_v28 = vld [vmem:[%s346_s5 + $0x8] sm:$0xff] }
   0x5   :  { %237 = vmatpush3.bf16.msra.mxu1 %v99_v11  ;;  %v153_v27 = vld [vmem:[%s346_s5] sm:$0xff] }
   0x6   :  { %231 = vmatpush3.bf16.msra.mxu0 %v47_v7  ;;  %238 = vmatprep.subr.bf16.mxu1 %v255_v0  ;;  %v159_v29 = vpack.c.bf16 %v154_v28, %v153_v27  ;;  %v218_v30 = vld [vmem:[%s347_s4] ss:$0 sm:$0xff] }
   0x7   :  { %244 = vmatprep.subr.bf16.mxu0 %v255_v0  ;;  %v220_v39 = vld [vmem:[%s348_s6] ss:$0 sm:$0xff] }
   0x9   :  { %233 = vmatmul.mubr.msk.bf16.vlgmr.msra.gmra.mxu0 %vm38_vm3, %v30_v8  ;;  %239 = vmatpush3.bf16.msra.mxu1 %v98_v14 }
   0xa   :  { %248 = vmatprep.mubr.msk.bf16.mxu0 %vm257_vm2, %v255_v0  ;;  %245 = vmatpush3.bf16.msra.mxu0 %v160_v26 }
   0xb   :  { %246 = vmatprep.subr.bf16.mxu0 %v255_v0 }
   0xe   :  { %247 = vmatpush3.bf16.msra.mxu0 %v159_v29 }
  0xc9   :  { %v83_v16 = vpop.f32.mrf.mxu0 }
  0xca   :  { %v84_v17 = vadd.f32 %v216_v15, %v83_v16 }
  0xcb   :  { %v234_v18 = vpop.f32.mrf.mxu0 }
  0xcc   :  { %vm89_vm4 = vcmp.gt.f32.partialorder %v84_v17, 0.0  ;;  %v90_v19 = vmul.f32 0.01, %v84_v17 }
  0xcd   :  { %v86_v20 = vpop.f32.mrf.mxu0 }
  0xce   :  { %v91_v21 = vsel %vm89_vm4, %v84_v17, %v90_v19 }
  0xcf   :  { %v97_v22 = vpack.c.bf16 %v91_v21, %v91_v21  ;;  %v235_v23 = vpop.f32.mrf.mxu0 }
  0xd1   :  { %241 = vmatmul.mubr.msk.bf16.vlgmr.msra.gmra.mxu1 %vm106_vm5, %v97_v22 }
 0x191   :  { %v144_v31 = vpop.f32.mrf.mxu1 }
 0x192   :  { %v145_v32 = vadd.f32 %v218_v30, %v144_v31 }
 0x193   :  { %v242_v33 = vpop.f32.mrf.mxu1 }
 0x194   :  { %vm150_vm6 = vcmp.gt.f32.partialorder %v145_v32, 0.0  ;;  %v151_v34 = vmul.f32 0.01, %v145_v32 }
 0x195   :  { %v147_v35 = vpop.f32.mrf.mxu1 }
 0x196   :  { %v152_v36 = vsel %vm150_vm6, %v145_v32, %v151_v34 }
 0x197   :  { %v158_v37 = vpack.c.bf16 %v152_v36, %v152_v36  ;;  %v243_v38 = vpop.f32.mrf.mxu1 }
 0x199   :  { %249 = vmatmul.mubr.msk.bf16.vlgmr.msra.gmra.mxu0 %vm106_vm5, %v158_v37 }
 0x259   :  { %v204_v40 = vpop.f32.mrf.mxu0 }
 0x25a   :  { %v205_v41 = vadd.f32 %v220_v39, %v204_v40 }
 0x25b   :  { %v250_v42 = vpop.f32.mrf.mxu0 }
 0x25c   :  { %211 = vst.msk [vmem:[%s349_s7] sm:$0x7f] %vm210_vm7, %v205_v41 }
 0x25d   :  { %v207_v43 = vpop.f32.mrf.mxu0 }
 0x25f   :  { %v251_v44 = vpop.f32.mrf.mxu0 }

// kernel: _lambda_.14
= control target key start
LH: loop header
LB: loop body
LE: loop exit
PB: predicated region body
PF: predicated region fallthrough
CT: control target
= control target key end

     0   :  { %vm43_vm0 = vcmask 1041408   ;;  %vm44_vm1 = vcmask 1042432   ;;  %v266_v0 = vmov 0.0   ;;  %v267_v2 = vmov 65535   ;;  %s360_s1 = inlined_call_operand.vmem [shape: f32[5,32], index: 1, kind: input, shape index: {}]   ;;  %s361_s0 = inlined_call_operand.vmem [shape: f32[10,5], index: 0, kind: input, shape index: {}]   ;;  %s362_s3 = inlined_call_operand.vmem [shape: f32[32,32], index: 3, kind: input, shape index: {}]   ;;  %s363_s2 = inlined_call_operand.vmem [shape: f32[1,32], index: 2, kind: input, shape index: {}]   ;;  %s364_s5 = inlined_call_operand.vmem [shape: f32[32,32], index: 5, kind: input, shape index: {}]   ;;  %s365_s4 = inlined_call_operand.vmem [shape: f32[1,32], index: 4, kind: input, shape index: {}]   ;;  %s366_s6 = inlined_call_operand.vmem [shape: f32[1,32], index: 6, kind: input, shape index: {}]   ;;  %s367_s7 = inlined_call_operand.vmem [shape: f32[10,32], index: 7, kind: output, shape index: {}]  }
   0x1   :  { %241 = vmatprep.subr.bf16.mxu0 %v266_v0  ;;  %v29_v1 = vld [vmem:[%s360_s1] sm:$0x1f]  ;;  %v45_v3 = vsel %vm43_vm0, 4294967295, %v267_v2  ;;  %247 = vmatprep.subr.bf16.mxu1 %v266_v0  ;;  %vm268_vm2 = vmmov 0   ;;  %v28_v7 = vld [vmem:[%s361_s0 + $0x8] sm:$0x3] }
   0x2   :  { %v32_v4 = vpack.c.bf16 %v29_v1, %v29_v1  ;;  %v46_v5 = vsel %vm44_vm1, %v45_v3, 0  ;;  %243 = vmatprep.mubr.msk.bf16.mxu0 %vm268_vm2, %v266_v0  ;;  %v27_v6 = vld [vmem:[%s361_s0] sm:$0xff]  ;;  %251 = vmatprep.mubr.msk.bf16.mxu1 %vm268_vm2, %v266_v0  ;;  %vm39_vm3 = vcmask 39936   ;;  %v99_v10 = vld [vmem:[%s362_s3 + $0x10] sm:$0xff]  ;;  %v100_v11 = vld [vmem:[%s362_s3 + $0x18] sm:$0xff]  ;;  %vm111_vm6 = vcmask 261120  }
   0x3   :  { %v31_v9 = vpack.c.bf16 %v28_v7, %v27_v6  ;;  %v104_v12 = vpack.c.bf16 %v100_v11, %v99_v10  ;;  %v97_v13 = vld [vmem:[%s362_s3] sm:$0xff]  ;;  %v98_v14 = vld [vmem:[%s362_s3 + $0x8] sm:$0xff]  ;;  %v164_v28 = vld [vmem:[%s364_s5 + $0x10] sm:$0xff]  ;;  %vm221_vm9 = vcmask 254976  }
   0x4   :  { %v48_v8 = vand.u32 %v46_v5, %v32_v4  ;;  %v103_v15 = vpack.c.bf16 %v98_v14, %v97_v13  ;;  %v227_v16 = vld [vmem:[%s363_s2] ss:$0 sm:$0xff]  ;;  %v165_v29 = vld [vmem:[%s364_s5 + $0x18] sm:$0xff]  ;;  %v163_v32 = vld [vmem:[%s364_s5 + $0x8] sm:$0xff] }
   0x5   :  { %248 = vmatpush3.bf16.msra.mxu1 %v104_v12  ;;  %v169_v30 = vpack.c.bf16 %v165_v29, %v164_v28  ;;  %v162_v31 = vld [vmem:[%s364_s5] sm:$0xff] }
   0x6   :  { %242 = vmatpush3.bf16.msra.mxu0 %v48_v8  ;;  %249 = vmatprep.subr.bf16.mxu1 %v266_v0  ;;  %v168_v33 = vpack.c.bf16 %v163_v32, %v162_v31  ;;  %v229_v34 = vld [vmem:[%s365_s4] ss:$0 sm:$0xff] }
   0x7   :  { %255 = vmatprep.subr.bf16.mxu0 %v266_v0  ;;  %v231_v46 = vld [vmem:[%s366_s6] ss:$0 sm:$0xff] }
   0x9   :  { %244 = vmatmul.mubr.msk.bf16.vlgmr.msra.gmra.mxu0 %vm39_vm3, %v31_v9  ;;  %250 = vmatpush3.bf16.msra.mxu1 %v103_v15 }
   0xa   :  { %259 = vmatprep.mubr.msk.bf16.mxu0 %vm268_vm2, %v266_v0  ;;  %256 = vmatpush3.bf16.msra.mxu0 %v169_v30 }
   0xb   :  { %257 = vmatprep.subr.bf16.mxu0 %v266_v0 }
   0xe   :  { %258 = vmatpush3.bf16.msra.mxu0 %v168_v33 }
  0xc9   :  { %v84_v17 = vpop.f32.mrf.mxu0 }
  0xca   :  { %v85_v18 = vadd.f32 %v227_v16, %v84_v17 }
  0xcb   :  { %v245_v19 = vpop.f32.mrf.mxu0 }
  0xcc   :  { %v93_v21 = vmul.f32 0.01, %v85_v18  ;;  %vm91_vm4 = vcmp.gt.f32.partialorder %v85_v18, 0.0 }
  0xcd   :  { %v87_v20 = vpop.f32.mrf.mxu0 }
  0xce   :  { %v88_v22 = vadd.f32 %v227_v16, %v87_v20  ;;  %v95_v25 = vsel %vm91_vm4, %v85_v18, %v93_v21 }
  0xcf   :  { %v246_v23 = vpop.f32.mrf.mxu0 }
  0xd0   :  { %vm92_vm5 = vcmp.gt.f32.partialorder %v88_v22, 0.0  ;;  %v94_v24 = vmul.f32 0.01, %v88_v22 }
  0xd2   :  { %v96_v26 = vsel %vm92_vm5, %v88_v22, %v94_v24 }
  0xd3   :  { %v102_v27 = vpack.c.bf16 %v96_v26, %v95_v25 }
  0xd5   :  { %252 = vmatmul.mubr.msk.bf16.vlgmr.msra.gmra.mxu1 %vm111_vm6, %v102_v27 }
 0x195   :  { %v149_v35 = vpop.f32.mrf.mxu1 }
 0x196   :  { %v150_v36 = vadd.f32 %v229_v34, %v149_v35 }
 0x197   :  { %v253_v37 = vpop.f32.mrf.mxu1 }
 0x198   :  { %v158_v39 = vmul.f32 0.01, %v150_v36  ;;  %vm156_vm7 = vcmp.gt.f32.partialorder %v150_v36, 0.0 }
 0x199   :  { %v152_v38 = vpop.f32.mrf.mxu1 }
 0x19a   :  { %v153_v40 = vadd.f32 %v229_v34, %v152_v38  ;;  %v160_v43 = vsel %vm156_vm7, %v150_v36, %v158_v39 }
 0x19b   :  { %v254_v41 = vpop.f32.mrf.mxu1 }
 0x19c   :  { %vm157_vm8 = vcmp.gt.f32.partialorder %v153_v40, 0.0  ;;  %v159_v42 = vmul.f32 0.01, %v153_v40 }
 0x19e   :  { %v161_v44 = vsel %vm157_vm8, %v153_v40, %v159_v42 }
 0x19f   :  { %v167_v45 = vpack.c.bf16 %v161_v44, %v160_v43 }
 0x1a1   :  { %260 = vmatmul.mubr.msk.bf16.vlgmr.msra.gmra.mxu0 %vm111_vm6, %v167_v45 }
 0x261   :  { %v213_v47 = vpop.f32.mrf.mxu0 }
 0x262   :  { %v214_v48 = vadd.f32 %v231_v46, %v213_v47 }
 0x263   :  { %v261_v49 = vpop.f32.mrf.mxu0 }
 0x264   :  { %220 = vst.msk [vmem:[%s367_s7] sm:$0xff] %vm111_vm6, %v214_v48 }
 0x265   :  { %v216_v50 = vpop.f32.mrf.mxu0 }
 0x266   :  { %v217_v51 = vadd.f32 %v231_v46, %v216_v50 }
 0x267   :  { %v262_v52 = vpop.f32.mrf.mxu0 }
 0x268   :  { %222 = vst.msk [vmem:[%s367_s7 + $0x8] sm:$0x3] %vm221_vm9, %v217_v51 }

// kernel: _lambda_.24
= control target key start
LH: loop header
LB: loop body
LE: loop exit
PB: predicated region body
PF: predicated region fallthrough
CT: control target
= control target key end

     0   :  { %v95_v0 = vmov 0.0   ;;  %vm96_vm0 = vmmov 0   ;;  %vm30_vm1 = vcmask 261120   ;;  %vm74_vm2 = vcmask 28672   ;;  %s138_s1 = inlined_call_operand.vmem [shape: f32[32,4], index: 1, kind: input, shape index: {}]   ;;  %s139_s0 = inlined_call_operand.vmem [shape: f32[5,32], index: 0, kind: input, shape index: {}]   ;;  %s140_s2 = inlined_call_operand.vmem [shape: f32[1,4], index: 2, kind: input, shape index: {}]   ;;  %s141_s3 = inlined_call_operand.vmem [shape: f32[5,4], index: 3, kind: output, shape index: {}]  }
   0x1   :  { %85 = vmatprep.subr.bf16.mxu0 %v95_v0  ;;  %v18_v1 = vld [vmem:[%s138_s1 + $0x10] sm:$0xff]  ;;  %v19_v2 = vld [vmem:[%s138_s1 + $0x18] sm:$0xff]  ;;  %v16_v3 = vld [vmem:[%s138_s1] sm:$0xff]  ;;  %89 = vmatprep.mubr.msk.bf16.mxu0 %vm96_vm0, %v95_v0 }
   0x2   :  { %v23_v4 = vpack.c.bf16 %v19_v2, %v18_v1  ;;  %v17_v5 = vld [vmem:[%s138_s1 + $0x8] sm:$0xff]  ;;  %v15_v7 = vld [vmem:[%s139_s0] sm:$0x1f] }
   0x3   :  { %v22_v6 = vpack.c.bf16 %v17_v5, %v16_v3  ;;  %v21_v8 = vpack.c.bf16 %v15_v7, %v15_v7  ;;  %v80_v9 = vld [vmem:[%s140_s2] ss:$0 sm:$0xff] }
   0x4   :  { %86 = vmatpush3.bf16.msra.mxu0 %v23_v4 }
   0x5   :  { %87 = vmatprep.subr.bf16.mxu0 %v95_v0 }
   0x8   :  { %88 = vmatpush3.bf16.msra.mxu0 %v22_v6 }
   0xb   :  { %90 = vmatmul.mubr.msk.bf16.vlgmr.msra.gmra.mxu0 %vm30_vm1, %v21_v8 }
  0xcb   :  { %v68_v10 = vpop.f32.mrf.mxu0 }
  0xcc   :  { %v69_v11 = vadd.f32 %v80_v9, %v68_v10 }
  0xcd   :  { %v91_v12 = vpop.f32.mrf.mxu0 }
  0xce   :  { %75 = vst.msk [vmem:[%s141_s3] sm:$0x1f] %vm74_vm2, %v69_v11 }
  0xcf   :  { %v71_v13 = vpop.f32.mrf.mxu0 }
  0xd1   :  { %v92_v14 = vpop.f32.mrf.mxu0 }

// kernel: _lambda_.23
= control target key start
LH: loop header
LB: loop body
LE: loop exit
PB: predicated region body
PF: predicated region fallthrough
CT: control target
= control target key end

     0   :  { %v97_v0 = vmov 0.0   ;;  %vm98_vm0 = vmmov 0   ;;  %vm32_vm1 = vcmask 261120   ;;  %vm76_vm2 = vcmask 2048   ;;  %s140_s1 = inlined_call_operand.vmem [shape: f32[32,1], index: 1, kind: input, shape index: {}]   ;;  %s141_s2 = inlined_call_operand.<no memory space> [shape: f32[1,1], index: 2, kind: input, shape index: {}]   ;;  %s142_s0 = inlined_call_operand.vmem [shape: f32[3,32], index: 0, kind: input, shape index: {}]   ;;  %s143_s3 = inlined_call_operand.vmem [shape: f32[3,1], index: 3, kind: output, shape index: {}]  }
   0x1   :  { %87 = vmatprep.subr.bf16.mxu0 %v97_v0  ;;  %v20_v1 = vld [vmem:[%s140_s1 + $0x10] sm:$0xff]  ;;  %v21_v2 = vld [vmem:[%s140_s1 + $0x18] sm:$0xff]  ;;  %v18_v3 = vld [vmem:[%s140_s1] sm:$0xff]  ;;  %91 = vmatprep.mubr.msk.bf16.mxu0 %vm98_vm0, %v97_v0  ;;  %v8_v4 = vstv %s141_s2 }
   0x2   :  { %v25_v5 = vpack.c.bf16 %v21_v2, %v20_v1  ;;  %v19_v6 = vld [vmem:[%s140_s1 + $0x8] sm:$0xff]  ;;  %9 = vst [vmem:[#allocation2] sm:$0x1] %v8_v4  ;;  %v17_v8 = vld [vmem:[%s142_s0] sm:$0x7] }
   0x3   :  { %v24_v7 = vpack.c.bf16 %v19_v6, %v18_v3  ;;  %v23_v9 = vpack.c.bf16 %v17_v8, %v17_v8 }
   0x4   :  { %88 = vmatpush3.bf16.msra.mxu0 %v25_v5 }
   0x5   :  { %89 = vmatprep.subr.bf16.mxu0 %v97_v0 }
   0x8   :  { %90 = vmatpush3.bf16.msra.mxu0 %v24_v7 }
   0x9   :  { %v82_v10 = vld [vmem:[#allocation2] ss:$0 sm:$0xff] }
   0xb   :  { %92 = vmatmul.mubr.msk.bf16.vlgmr.msra.gmra.mxu0 %vm32_vm1, %v23_v9 }
  0xcb   :  { %v70_v11 = vpop.f32.mrf.mxu0 }
  0xcc   :  { %v71_v12 = vadd.f32 %v82_v10, %v70_v11 }
  0xcd   :  { %v93_v13 = vpop.f32.mrf.mxu0 }
  0xce   :  { %77 = vst.msk [vmem:[%s143_s3] sm:$0x7] %vm76_vm2, %v71_v12 }
  0xcf   :  { %v73_v14 = vpop.f32.mrf.mxu0 }
  0xd1   :  { %v94_v15 = vpop.f32.mrf.mxu0 }

// kernel: _lambda_.18
= control target key start
LH: loop header
LB: loop body
LE: loop exit
PB: predicated region body
PF: predicated region fallthrough
CT: control target
= control target key end

     0   :  { %vm20_vm0 = vcmask 1046528   ;;  %vm16_vm1 = vcmask 56320   ;;  %v120_v0 = vmov 0.0   ;;  %vm121_vm2 = vmmov 0   ;;  %s155_s1 = inlined_call_operand.vmem [shape: f32[7,32], index: 1, kind: input, shape index: {}]   ;;  %s156_s0 = inlined_call_operand.vmem [shape: f32[2,7], index: 0, kind: input, shape index: {}]   ;;  %s157_s2 = inlined_call_operand.vmem [shape: f32[2,1], index: 2, kind: input, shape index: {}]   ;;  %s158_s3 = inlined_call_operand.vmem [shape: f32[2,32], index: 3, kind: output, shape index: {}]  }
   0x1   :  { %111 = vmatprep.subr.mxu0 %v120_v0  ;;  %v15_v1 = vld [vmem:[%s155_s1] sm:$0x7f]  ;;  %113 = vmatprep.mubr.msk.f32.mxu0 %vm121_vm2, %v120_v0  ;;  %v122_v3 = vmov 0   ;;  %vm101_vm3 = vcmask 254976  }
   0x2   :  { %v14_v2 = vld [vmem:[%s156_s0] sm:$0x3]  ;;  %112 = vmatpush3.msk.msra.mxu0 %vm20_vm0, %v15_v1  ;;  %119 = vset.pattern.permute.xlu0 %v122_v3 }
   0x3   :  { %v94_v4 = vld [vmem:[%s157_s2] sm:$0x3]  ;;  %114 = vmatmul.mubr.msk.f32.vlgmr.msra.gmra.mxu0 %vm16_vm1, %v14_v2 }
   0x4   :  { %97 = vperm.xlu0 %119, %v94_v4  }
  0x7f   :  { %v98_v5 = vpop.permute.xlu0 %97 }
  0xc3   :  { %v90_v6 = vpop.f32.mrf.mxu0 }
  0xc4   :  { %v100_v7 = vmul.f32 %v98_v5, %v90_v6 }
  0xc5   :  { %v115_v8 = vpop.f32.mrf.mxu0 }
  0xc6   :  { %102 = vst.msk [vmem:[%s158_s3] sm:$0x3] %vm101_vm3, %v100_v7 }

// kernel: _lambda_.20
= control target key start
LH: loop header
LB: loop body
LE: loop exit
PB: predicated region body
PF: predicated region fallthrough
CT: control target
= control target key end

     0   :  { %v109_v0 = vmov 0.0   ;;  %vm110_vm0 = vmmov 0   ;;  %vm38_vm1 = vcmask 523264   ;;  %vm82_vm2 = vcmask 1024   ;;  %s164_s1 = inlined_call_operand.vmem [shape: f32[64,1], index: 1, kind: input, shape index: {}]   ;;  %s165_s2 = inlined_call_operand.<no memory space> [shape: f32[1,1], index: 2, kind: input, shape index: {}]   ;;  %s166_s0 = inlined_call_operand.vmem [shape: f32[2,64], index: 0, kind: input, shape index: {}]   ;;  %s167_s3 = inlined_call_operand.vmem [shape: f32[2,1], index: 3, kind: output, shape index: {}]  }
   0x1   :  { %95 = vmatprep.subr.bf16.mxu0 %v109_v0  ;;  %v24_v1 = vld [vmem:[%s164_s1 + $0x30] sm:$0xff]  ;;  %v25_v2 = vld [vmem:[%s164_s1 + $0x38] sm:$0xff]  ;;  %v22_v3 = vld [vmem:[%s164_s1 + $0x20] sm:$0xff]  ;;  %103 = vmatprep.mubr.msk.bf16.mxu0 %vm110_vm0, %v109_v0  ;;  %v8_v4 = vstv %s165_s2 }
   0x2   :  { %v31_v5 = vpack.c.bf16 %v25_v2, %v24_v1  ;;  %v23_v6 = vld [vmem:[%s164_s1 + $0x28] sm:$0xff]  ;;  %9 = vst [vmem:[#allocation2] sm:$0x1] %v8_v4  ;;  %v20_v8 = vld [vmem:[%s164_s1 + $0x10] sm:$0xff]  ;;  %v21_v9 = vld [vmem:[%s164_s1 + $0x18] sm:$0xff] }
   0x3   :  { %v30_v7 = vpack.c.bf16 %v23_v6, %v22_v3  ;;  %v29_v10 = vpack.c.bf16 %v21_v9, %v20_v8  ;;  %v18_v11 = vld [vmem:[%s164_s1] sm:$0xff]  ;;  %v19_v12 = vld [vmem:[%s164_s1 + $0x8] sm:$0xff] }
   0x4   :  { %96 = vmatpush3.bf16.msra.mxu0 %v31_v5  ;;  %v28_v13 = vpack.c.bf16 %v19_v12, %v18_v11  ;;  %v17_v14 = vld [vmem:[%s166_s0] sm:$0x3] }
   0x5   :  { %97 = vmatprep.subr.bf16.mxu0 %v109_v0  ;;  %v27_v15 = vpack.c.bf16 %v17_v14, %v17_v14 }
   0x8   :  { %98 = vmatpush3.bf16.msra.mxu0 %v30_v7 }
   0x9   :  { %99 = vmatprep.subr.bf16.mxu0 %v109_v0  ;;  %v88_v16 = vld [vmem:[#allocation2] ss:$0 sm:$0xff] }
   0xc   :  { %100 = vmatpush3.bf16.msra.mxu0 %v29_v10 }
   0xd   :  { %101 = vmatprep.subr.bf16.mxu0 %v109_v0 }
  0x10   :  { %102 = vmatpush3.bf16.msra.mxu0 %v28_v13 }
  0x13   :  { %104 = vmatmul.mubr.msk.bf16.vlgmr.msra.gmra.mxu0 %vm38_vm1, %v27_v15 }
  0xd3   :  { %v76_v17 = vpop.f32.mrf.mxu0 }
  0xd4   :  { %v77_v18 = vadd.f32 %v88_v16, %v76_v17 }
  0xd5   :  { %v105_v19 = vpop.f32.mrf.mxu0 }
  0xd6   :  { %83 = vst.msk [vmem:[%s167_s3] sm:$0x3] %vm82_vm2, %v77_v18 }
  0xd7   :  { %v79_v20 = vpop.f32.mrf.mxu0 }
  0xd9   :  { %v106_v21 = vpop.f32.mrf.mxu0 }

// kernel: _lambda_.21
= control target key start
LH: loop header
LB: loop body
LE: loop exit
PB: predicated region body
PF: predicated region fallthrough
CT: control target
= control target key end

     0   :  { %v129_v3 = vmov 0.0   ;;  %vm130_vm0 = vmmov 0   ;;  %s173_s0 = inlined_call_operand.vmem [shape: f32[7,32], index: 0, kind: input, shape index: {}]   ;;  %s174_s1 = inlined_call_operand.vmem [shape: f32[32,6], index: 1, kind: input, shape index: {}]   ;;  %s175_s2 = inlined_call_operand.vmem [shape: f32[1,6], index: 2, kind: input, shape index: {}]   ;;  %s176_s3 = inlined_call_operand.hbm [shape: f32[7,6], index: 3, kind: output, shape index: {}]  }
   0x1   :  { %v19_v0 = vld [vmem:[%s174_s1 + $0x10] sm:$0xff]  ;;  %v20_v1 = vld [vmem:[%s174_s1 + $0x18] sm:$0xff]  ;;  %v17_v2 = vld [vmem:[%s174_s1] sm:$0xff]  ;;  %96 = vmatprep.subr.bf16.mxu0 %v129_v3  ;;  %100 = vmatprep.mubr.msk.bf16.mxu0 %vm130_vm0, %v129_v3 }
   0x2   :  { %v24_v4 = vpack.c.bf16 %v20_v1, %v19_v0  ;;  %v18_v5 = vld [vmem:[%s174_s1 + $0x8] sm:$0xff] }
   0x3   :  { %8 = vsyncpa [#allocation3], 0  ;;  %v23_v6 = vpack.c.bf16 %v18_v5, %v17_v2  ;;  %v16_v7 = vld [vmem:[%s173_s0] sm:$0x7f]  ;;  %vm31_vm1 = vcmask 261120   ;;  %s131_s24 = smov [#allocation2]  }
   0x4   :  { %97 = vmatpush3.bf16.msra.mxu0 %v24_v4  ;;  %v22_v8 = vpack.c.bf16 %v16_v7, %v16_v7  ;;  %v91_v9 = vld [vmem:[%s175_s2] ss:$0 sm:$0xff]  ;;  %s83_s1 = sshll.u32 %s131_s24, 4  ;;  %vm75_vm2 = vcmask 47104   ;;  %s84_s1 = int_to_ptr.vmem [resolvable:$true] %s83_s1 }
   0x5   :  { %98 = vmatprep.subr.bf16.mxu0 %v129_v3  ;;  %s107_s25 = scalar_lea.vmem %s84_s1, 128  ;;  %p112_p1 = scmp.lt.s32.totalorder %s84_s1, %s84_s1 }
   0x6   :  { %p108_p0 = scmp.ne.s32.totalorder %s84_s1, %s107_s25  ;;  %p113_p2 = scmp.lt.s32.totalorder %s107_s25, %s107_s25 }
   0x8   :  { %99 = vmatpush3.bf16.msra.mxu0 %v23_v6  ;;  %p114_p3 = por %p113_p2, %p112_p1 }
   0xa   :  { %p115_p4 = pnand %p114_p3, %p108_p0 }
   0xb   :  { %101 = vmatmul.mubr.msk.bf16.vlgmr.msra.gmra.mxu0 %vm31_vm1, %v22_v8 }
  0xcb   :  { %v69_v10 = vpop.f32.mrf.mxu0 }
  0xcc   :  { %v70_v11 = vadd.f32 %v91_v9, %v69_v10 }
  0xcd   :  { %v102_v12 = vpop.f32.mrf.mxu0 }
  0xce   :  { %76 = vst.msk [vmem:[#allocation2] sm:$0x7f] %vm75_vm2, %v70_v11 }
  0xcf   :  { %v72_v13 = vpop.f32.mrf.mxu0 }
  0xd0   :  { %118 = shalt.err (!%p115_p4)
}
  0xd1   :  { %86 = dma.vmem_to_hbm [thread:$0]  %s84_s1, 128, %s176_s3, [#allocation3]   ;;  %v103_v14 = vpop.f32.mrf.mxu0 }
  0xd2   :  { %127 = dma.done.wait [#allocation3], 128  }
  0xd3   :  { %128 = vsyncadd [#allocation3], 4294967168 }
  0xd4   :  { %90 = vsyncpa [#allocation3], 1 }

// kernel: _lambda_.16
= control target key start
LH: loop header
LB: loop body
LE: loop exit
PB: predicated region body
PF: predicated region fallthrough
CT: control target
= control target key end

     0   :  { %v2484_v0 = vmov 0.0   ;;  %vm2485_vm0 = vmmov 0   ;;  %vm102_vm1 = vcmask 261120   ;;  %vm146_vm2 = vcmask 15360   ;;  %s3227_s19 = inlined_call_operand.vmem [shape: f32[32,64], index: 19, kind: input, shape index: {}]   ;;  %s3228_s1 = inlined_call_operand.vmem [shape: f32[2,32], index: 1, kind: input, shape index: {}]   ;;  %s3229_s5 = inlined_call_operand.vmem [shape: f32[9,2], index: 5, kind: input, shape index: {}]   ;;  %s3230_s20 = inlined_call_operand.vmem [shape: f32[1,64], index: 20, kind: input, shape index: {}]   ;;  %s3231_s0 = inlined_call_operand.vmem [shape: f32[9,32], index: 0, kind: input, shape index: {}]   ;;  %s3232_s6 = inlined_call_operand.vmem [shape: f32[2,9], index: 6, kind: input, shape index: {}]   ;;  %s3233_s7 = inlined_call_operand.vmem [shape: f32[2,1], index: 7, kind: input, shape index: {}]   ;;  %s3234_s3 = inlined_call_operand.vmem [shape: f32[33,9], index: 3, kind: input, shape index: {}]   ;;  %s3235_s2 = inlined_call_operand.vmem [shape: f32[33,32], index: 2, kind: input, shape index: {}]   ;;  %s3236_s4 = inlined_call_operand.vmem [shape: f32[9,33], index: 4, kind: input, shape index: {}]   ;;  %s3237_s8 = inlined_call_operand.vmem [shape: f32[32,32], index: 8, kind: input, shape index: {}]   ;;  %s3238_s10 = inlined_call_operand.vmem [shape: f32[64,256], index: 10, kind: input, shape index: {}]   ;;  %s3239_s9 = inlined_call_operand.vmem [shape: f32[1,32], index: 9, kind: input, shape index: {}]   ;;  %s3240_s12 = inlined_call_operand.vmem [shape: f32[32,64], index: 12, kind: input, shape index: {}]   ;;  %s3241_s11 = inlined_call_operand.vmem [shape: f32[1,256], index: 11, kind: input, shape index: {}]   ;;  %s3242_s13 = inlined_call_operand.vmem [shape: f32[64,32], index: 13, kind: input, shape index: {}]   ;;  %s3243_s14 = inlined_call_operand.vmem [shape: f32[1,32], index: 14, kind: input, shape index: {}]   ;;  %s3244_s15 = inlined_call_operand.vmem [shape: f32[32,128], index: 15, kind: input, shape index: {}]   ;;  %s3245_s17 = inlined_call_operand.vmem [shape: f32[128,32], index: 17, kind: input, shape index: {}]   ;;  %s3246_s16 = inlined_call_operand.vmem [shape: f32[1,128], index: 16, kind: input, shape index: {}]   ;;  %s3247_s18 = inlined_call_operand.vmem [shape: f32[1,32], index: 18, kind: input, shape index: {}]   ;;  %s3248_s21 = inlined_call_operand.vmem [shape: f32[9,32], index: 21, kind: output, shape index: {}]  }
   0x1   :  { %3253 = sst [smem:[#allocation2_spill]] %s3227_s19  ;;  %2213 = vmatprep.subr.bf16.mxu1 %v2484_v0  ;;  %2217 = vmatprep.mubr.msk.bf16.mxu1 %vm2485_vm0, %v2484_v0  ;;  %vm153_vm3 = vcmask 1041408   ;;  %vm236_vm4 = vcmask 1040384   ;;  %vm232_vm5 = vcmask 72704   ;;  %vm310_vm6 = vcmask 254976   ;;  %v76_v56 = vld [vmem:[%s3234_s3] sm:$0xff] }
   0x2   :  { %3254 = sst [smem:[#allocation3_spill]] %s3228_s1  ;;  %v2486_v25 = vmov 0   ;;  %v86_v26 = vld [vmem:[%s3233_s7] sm:$0x3]  ;;  %vm589_vm7 = vcmask 1043456   ;;  %vm590_vm8 = vcmask 1044480  }
   0x3   :  { %3255 = sst [smem:[#allocation4_spill]] %s3229_s5  ;;  %2452 = vset.pattern.permute.xlu0 %v2486_v25  ;;  %2453 = vset.pattern.permute.xlu1 %v2486_v25  ;;  %v2487_v49 = vmov 65535   ;;  %v77_v57 = vld [vmem:[%s3234_s3 + $0x8] sm:$0xff]  ;;  %v78_v60 = vld [vmem:[%s3234_s3 + $0x10] sm:$0xff]  ;;  %v79_v61 = vld [vmem:[%s3234_s3 + $0x18] sm:$0xff]  ;;  %vm666_vm9 = vcmask 269312  }
   0x4   :  { %3256 = sst [smem:[#allocation5_spill]] %s3230_s20  ;;  %v591_v50 = vsel %vm589_vm7, 4294967295, %v2487_v49  ;;  %v2702_v59 = vpack.c.bf16 %v77_v57, %v76_v56  ;;  %v2714_v62 = vpack.c.bf16 %v79_v61, %v78_v60  ;;  %v80_v63 = vld [vmem:[%s3234_s3 + $0x20] sm:$0x1]  ;;  %v779_v56 = vld [vmem:[%s3238_s10 + $0x28] sm:$0xff]  ;;  %v781_v57 = vld [vmem:[%s3238_s10 + $0x38] sm:$0xff] }
   0x5   :  { %3257 = sst [smem:[#allocation6_spill]] %s3231_s0  ;;  %v2688_v54 = vsel %vm590_vm8, %v591_v50, 0  ;;  %v716_v49 = vld [vmem:[%s3237_s8] sm:$0xff]  ;;  %v717_v50 = vld [vmem:[%s3237_s8 + $0x8] sm:$0xff]  ;;  %v793_v61 = vld [vmem:[%s3238_s10 + $0x78] sm:$0xff]  ;;  %vm1235_vm12 = vcmask 262144  }
   0x6   :  { %3258 = sst [smem:[#allocation7_spill]] %s3232_s6  ;;  %v791_v60 = vld [vmem:[%s3238_s10 + $0x68] sm:$0xff]  ;;  %s2489_s1 = smov 96   ;;  %vm1125_vm13 = vcmask 523264  }
   0x7   :  { %s3259_s26 = sld [smem:[#allocation2_spill]] }
   0x8   :  { %s3260_s22 = sld [smem:[#allocation3_spill]] }
   0x9   :  { %s3261_s24 = sld [smem:[#allocation4_spill]] }
   0xa   :  { %s3263_s29 = sld [smem:[#allocation6_spill]] }
   0xb   :  { %s3264_s23 = sld [smem:[#allocation7_spill]] }
   0xd   :  { %v90_v1 = vld [vmem:[%s3259_s26 + $0x10] sm:$0xff]  ;;  %v91_v2 = vld [vmem:[%s3259_s26 + $0x18] sm:$0xff]  ;;  %v88_v3 = vld [vmem:[%s3259_s26] sm:$0xff] }
   0xe   :  { %v94_v4 = vpack.c.bf16 %v91_v2, %v90_v1  ;;  %v89_v5 = vld [vmem:[%s3259_s26 + $0x8] sm:$0xff]  ;;  %v87_v7 = vld [vmem:[%s3260_s22] sm:$0x3]  ;;  %s3262_s26 = sld [smem:[#allocation5_spill]]  ;;  %v2723_v1 = vpack.c.bf16 %v80_v63, %v80_v63 }
   0xf   :  { %v93_v6 = vpack.c.bf16 %v89_v5, %v88_v3  ;;  %v92_v8 = vpack.c.bf16 %v87_v7, %v87_v7  ;;  %v2623_v9 = vld [vmem:[%s3261_s24] sm:$0xff]  ;;  %v84_v14 = vld [vmem:[%s3261_s24 + $0x8] sm:$0x1] }
  0x10   :  { %2214 = vmatpush3.bf16.msra.mxu1 %v94_v4  ;;  %2247 = vmatprep.mubr.msk.f32.mxu0 %vm146_vm2, %v2623_v9  ;;  %v70_v15 = vld [vmem:[%s3263_s29 + $0x8] sm:$0x1]  ;;  %v69_v17 = vld [vmem:[%s3263_s29] sm:$0xff] }
  0x11   :  { %2215 = vmatprep.subr.bf16.mxu1 %v2484_v0  ;;  %v85_v19 = vld [vmem:[%s3264_s23] sm:$0x3] }
  0x12   :  { %v790_v63 = vld [vmem:[%s3238_s10 + $0x60] sm:$0xff] }
  0x14   :  { %2216 = vmatpush3.bf16.msra.mxu1 %v93_v6  ;;  %v2067_v10 = vld [vmem:[%s3262_s26] ss:$0 sm:$0xff] }
  0x17   :  { %2218 = vmatmul.mubr.msk.bf16.vlgmr.msra.gmra.mxu1 %vm102_vm1, %v92_v8 }
  0x18   :  { %2223 = vmatprep.mubr.msk.f32.mxu1 %vm146_vm2, %v2623_v9 }
  0xd7   :  { %v140_v11 = vpop.f32.mrf.mxu1 }
  0xd8   :  { %v141_v12 = vadd.f32 %v2067_v10, %v140_v11  ;;  %v2731_v10 = vld [vmem:[%s3235_s2 + $0x18] sm:$0xff] }
  0xd9   :  { %v2219_v13 = vpop.f32.mrf.mxu1 }
  0xda   :  { %2221 = vmatprep.subr.msk.mxu1 %vm153_vm3, %v141_v12  ;;  %v2741_v13 = vld [vmem:[%s3235_s2 + $0x10] sm:$0xff] }
  0xdb   :  { %v143_v16 = vpop.f32.mrf.mxu1  ;;  %2222 = vmatpush3.msk.msra.mxu1 %vm153_vm3, %v141_v12  ;;  %v2736_v12 = vld [vmem:[%s3235_s2 + $0x20] sm:$0x1] }
  0xdc   :  { %2224 = vmatmul.mubr.msk.f32.vlgmr.msra.gmra.mxu1 %vm146_vm2, %v84_v14  ;;  %2226 = vmatprep.subr.mxu1 %v2484_v0 }
  0xdd   :  { %v2220_v18 = vpop.f32.mrf.mxu1  ;;  %2227 = vmatpush3.msk.msra.mxu1 %vm236_vm4, %v70_v15  ;;  %2230 = vmatprep.mubr.msk.f32.mxu1 %vm2485_vm0, %v2484_v0 }
  0xde   :  { %2228 = vmatprep.subr.mxu1 %v2484_v0 }
  0xdf   :  { %2229 = vmatpush3.msra.mxu1 %v69_v17 }
  0xe0   :  { %2231 = vmatmul.mubr.msk.f32.vlgmr.msra.gmra.mxu1 %vm232_vm5, %v85_v19 }
  0xe1   :  { %2235 = vmatprep.mubr.msk.f32.mxu1 %vm146_vm2, %v2623_v9 }
 0x19c   :  { %v2655_v20 = vpop.f32.mrf.mxu1 }
 0x19e   :  { %v2657_v21 = vpop.f32.mrf.mxu1 }
 0x1a0   :  { %v306_v22 = vpop.f32.mrf.mxu1 }
 0x1a1   :  { %v311_v23 = vsel %vm310_vm6, %v306_v22, 0.0 }
 0x1a2   :  { %312 = vadd.xlane.f32.xlu0 %v311_v23  ;;  %v2232_v24 = vpop.f32.mrf.mxu1  ;;  %v2754_v23 = vld [vmem:[%s3235_s2] sm:$0xff] }
 0x22b   :  { %v313_v27 = vpop.xlane.xlu0 %312 }
 0x22c   :  { %v314_v28 = vmul.f32 %v313_v27, %v86_v26 }
 0x22e   :  { %2233 = vmatprep.subr.msk.mxu1 %vm153_vm3, %v314_v28 }
 0x22f   :  { %2234 = vmatpush3.msk.msra.mxu1 %vm153_vm3, %v314_v28 }
 0x230   :  { %2236 = vmatmul.mubr.msk.f32.vlgmr.msra.gmra.mxu1 %vm146_vm2, %v84_v14  ;;  %2238 = vmatprep.subr.mxu1 %v2484_v0 }
 0x231   :  { %2242 = vmatprep.mubr.msk.f32.mxu1 %vm2485_vm0, %v2484_v0 }
 0x2f0   :  { %v2237_v29 = vpop.f32.mrf.mxu1 }
 0x2f1   :  { %400 = vperm.xlu0 %2452, %v2237_v29   ;;  %v2759_v29 = vsel %vm236_vm4, 65535, %v2486_v25 }
 0x2f2   :  { %v384_v30 = vpop.f32.mrf.mxu1 }
 0x2f3   :  { %395 = vperm.xlu1 %2453, %v384_v30  }
 0x36c   :  { %v401_v31 = vpop.permute.xlu0 %400 }
 0x36d   :  { %v404_v32 = vsub.f32 %v70_v15, %v401_v31 }
 0x36e   :  { %v396_v33 = vpop.permute.xlu1 %395 }
 0x36f   :  { %v406_v34 = vmul.f32 %v404_v32, %v404_v32  ;;  %v403_v35 = vsub.f32 %v69_v17, %v396_v33  ;;  %v2748_v17 = vld [vmem:[%s3235_s2 + $0x8] sm:$0xff] }
 0x371   :  { %v405_v36 = vmul.f32 %v403_v35, %v403_v35  ;;  %2239 = vmatpush3.msk.msra.mxu1 %vm236_vm4, %v406_v34 }
 0x372   :  { %2240 = vmatprep.subr.mxu1 %v2484_v0 }
 0x373   :  { %2241 = vmatpush3.msra.mxu1 %v405_v36 }
 0x374   :  { %2243 = vmatmul.mubr.msk.f32.vlgmr.msra.gmra.mxu1 %vm232_vm5, %v85_v19  ;;  %2250 = vmatprep.subr.bf16.mxu1 %v2484_v0 }
 0x375   :  { %2252 = vmatprep.mubr.msk.bf16.mxu1 %vm2485_vm0, %v2484_v0 }
 0x434   :  { %v476_v37 = vpop.f32.mrf.mxu1 }
 0x435   :  { %v480_v38 = vsel %vm310_vm6, %v476_v37, 0.0 }
 0x436   :  { %481 = vadd.xlane.f32.xlu1 %v480_v38  ;;  %v2244_v39 = vpop.f32.mrf.mxu1 }
 0x4bf   :  { %v482_v40 = vpop.xlane.xlu1 %481 }
 0x4c0   :  { %v483_v41 = vmul.f32 %v482_v40, %v86_v26 }
 0x4c2   :  { %2245 = vmatprep.subr.msk.mxu0 %vm153_vm3, %v483_v41 }
 0x4c3   :  { %2246 = vmatpush3.msk.msra.mxu0 %vm153_vm3, %v483_v41 }
 0x4c4   :  { %2248 = vmatmul.mubr.msk.f32.vlgmr.msra.gmra.mxu0 %vm146_vm2, %v84_v14  ;;  %2264 = vmatprep.subr.bf16.mxu0 %v2484_v0 }
 0x4c5   :  { %2270 = vmatprep.mubr.msk.bf16.mxu0 %vm2485_vm0, %v2484_v0 }
 0x584   :  { %v2249_v42 = vpop.f32.mrf.mxu0 }
 0x585   :  { %v559_v43 = vadd.f32 1e-05, %v2249_v42  ;;  %v2767_v42 = vld [vmem:[%s3236_s4] sm:$0xff] }
 0x586   :  { %v553_v44 = vpop.f32.mrf.mxu0  ;;  %vm1228_vm10 = vcmp.gt.f32.partialorder %v2767_v42, 0.5 }
 0x587   :  { %2454 = vrsqrt.f32 %v559_v43  ;;  %v554_v45 = vadd.f32 1e-05, %v553_v44  ;;  %v2772_v43 = vld [vmem:[%s3236_s4 + $0x8] sm:$0x1] }
 0x588   :  { %vm1229_vm11 = vcmp.gt.f32.partialorder %v2772_v43, 0.5 }
 0x589   :  { %2456 = vrsqrt.f32 %v554_v45  ;;  %v662_v45 = vpack.c.bf16 %v2772_v43, %v2767_v42 }
 0x594   :  { %v2455_v46 = vpop.eup %2454 }
 0x595   :  { %571 = vperm.xlu0 %2452, %v2455_v46   ;;  %v718_v46 = vld [vmem:[%s3237_s8 + $0x10] sm:$0xff] }
 0x596   :  { %v2457_v47 = vpop.eup %2456 }
 0x597   :  { %566 = vperm.xlu1 %2453, %v2457_v47   ;;  %v719_v47 = vld [vmem:[%s3237_s8 + $0x18] sm:$0xff] }
 0x610   :  { %v572_v48 = vpop.permute.xlu0 %571 }
 0x611   :  { %v2684_v52 = vmul.f32 %v572_v48, %v404_v32  ;;  %v722_v48 = vpack.c.bf16 %v719_v47, %v718_v46  ;;  %v906_v46 = vld [vmem:[%s3240_s12] sm:$0xff]  ;;  %v907_v47 = vld [vmem:[%s3240_s12 + $0x8] sm:$0xff] }
 0x612   :  { %v567_v51 = vpop.permute.xlu1 %566 }
 0x613   :  { %v2686_v53 = vmul.f32 %v567_v51, %v403_v35  ;;  %v721_v51 = vpack.c.bf16 %v717_v50, %v716_v49  ;;  %v910_v49 = vpack.c.bf16 %v2748_v17, %v2754_v23  ;;  %v911_v50 = vpack.c.bf16 %v2731_v10, %v2741_v13 }
 0x615   :  { %v2692_v55 = vpack.c.bf16 %v2684_v52, %v2686_v53 }
 0x617   :  { %v594_v58 = vand.u32 %v2688_v54, %v2692_v55 }
 0x619   :  { %2251 = vmatpush3.bf16.msra.mxu1 %v594_v58  ;;  %v785_v58 = vpack.c.bf16 %v781_v57, %v779_v56 }
 0x61c   :  { %2253 = vmatmul.mubr.msk.bf16.vlgmr.msra.gmra.mxu1 %vm232_vm5, %v2702_v59 }
 0x61d   :  { %2256 = vmatprep.mubr.msk.bf16.mxu1 %vm2485_vm0, %v2484_v0 }
 0x624   :  { %2257 = vmatmul.mubr.msk.bf16.gmra.mxu1 %vm232_vm5, %v2714_v62 }
 0x625   :  { %2260 = vmatprep.mubr.msk.bf16.mxu1 %vm2485_vm0, %v2484_v0 }
 0x62c   :  { %2261 = vmatmul.mubr.msk.bf16.gmra.mxu1 %vm232_vm5, %v2723_v1 }
 0x62d   :  { %834 = vmatprep.mubr.bf16.mxu1 %v2486_v25 }
 0x6dc   :  { %v630_v2 = vpop.f32.mrf.mxu1 }
 0x6dd   :  { %v631_v31 = vadd.f32 %v630_v2, %v2754_v23  ;;  %v798_v2 = vpack.c.bf16 %v793_v61, %v791_v60 }
 0x6de   :  { %v2254_v3 = vpop.f32.mrf.mxu1 }
 0x6df   :  { %v652_v37 = vmax.f32 %v631_v31, 0.0  ;;  %v792_v3 = vld [vmem:[%s3238_s10 + $0x70] sm:$0xff]  ;;  %814 = vmatprep.subr.bf16.mxu1 %v798_v2 }
 0x6e0   :  { %v633_v4 = vpop.f32.mrf.mxu1 }
 0x6e1   :  { %v634_v26 = vadd.f32 %v633_v4, %v2748_v17  ;;  %v657_v41 = vadd.f32 1e-07, %v652_v37  ;;  %v797_v4 = vpack.c.bf16 %v792_v3, %v790_v63  ;;  %v892_v17 = vlaneseq }
 0x6e2   :  { %v2255_v5 = vpop.f32.mrf.mxu1 }
 0x6e3   :  { %v653_v34 = vmax.f32 %v634_v26, 0.0  ;;  %815 = vmatpush1.bf16.msra.mxu1 %v797_v4  ;;  %v893_v56 = vshrl.u32 %v892_v17, 7 }
 0x6e4   :  { %v638_v6 = vpop.f32.mrf.mxu1 }
 0x6e5   :  { %v639_v19 = vadd.f32 %v638_v6, %v2741_v13  ;;  %v658_v39 = vadd.f32 1e-07, %v653_v34  ;;  %v2086_v34 = vld [vmem:[%s3239_s9] ss:$0 sm:$0xff]  ;;  %v898_v13 = vsub.s32 1, %v893_v56 }
 0x6e6   :  { %v2258_v7 = vpop.f32.mrf.mxu1 }
 0x6e7   :  { %v654_v32 = vmax.f32 %v639_v19, 0.0  ;;  %v663_v44 = vpack.c.bf16 %v658_v39, %v657_v41  ;;  %v778_v7 = vld [vmem:[%s3238_s10 + $0x20] sm:$0xff]  ;;  %v908_v41 = vld [vmem:[%s3240_s12 + $0x10] sm:$0xff] }
 0x6e8   :  { %v641_v8 = vpop.f32.mrf.mxu1 }
 0x6e9   :  { %v642_v15 = vadd.f32 %v641_v8, %v2731_v10  ;;  %v659_v38 = vadd.f32 1e-07, %v654_v32  ;;  %v780_v8 = vld [vmem:[%s3238_s10 + $0x30] sm:$0xff]  ;;  %v890_v10 = vld [vmem:[%s3241_s11] sm:$0x3]  ;;  %s2488_s11 = smov 64  }
 0x6ea   :  { %v2259_v11 = vpop.f32.mrf.mxu1 }
 0x6eb   :  { %v655_v27 = vmax.f32 %v642_v15, 0.0  ;;  %v777_v15 = vld [vmem:[%s3238_s10 + $0x18] sm:$0xff] }
 0x6ec   :  { %v646_v14 = vpop.f32.mrf.mxu1 }
 0x6ed   :  { %v647_v16 = vadd.f32 %v646_v14, %v2736_v12  ;;  %v660_v35 = vadd.f32 1e-07, %v655_v27  ;;  %v775_v14 = vld [vmem:[%s3238_s10 + $0x8] sm:$0xff]  ;;  %v774_v27 = vld [vmem:[%s3238_s10] sm:$0xff] }
 0x6ee   :  { %v2262_v18 = vpop.f32.mrf.mxu1  ;;  %v783_v26 = vpack.c.bf16 %v777_v15, %v775_v14 }
 0x6ef   :  { %v656_v22 = vmax.f32 %v647_v16, 0.0  ;;  %v664_v40 = vpack.c.bf16 %v660_v35, %v659_v38 }
 0x6f0   :  { %v649_v24 = vpop.f32.mrf.mxu1 }
 0x6f1   :  { %v661_v28 = vadd.f32 1e-07, %v656_v22  ;;  %v784_v22 = vpack.c.bf16 %v780_v8, %v778_v7 }
 0x6f2   :  { %v2263_v30 = vpop.f32.mrf.mxu1 }
 0x6f3   :  { %v665_v33 = vpack.c.bf16 %v661_v28, %v661_v28  ;;  %v776_v28 = vld [vmem:[%s3238_s10 + $0x10] sm:$0xff] }
 0x6f4   :  { %v782_v30 = vpack.c.bf16 %v776_v28, %v774_v27 }
 0x6f5   :  { %v673_v36 = vand.u32 %v2759_v29, %v665_v33 }
 0x6f7   :  { %2265 = vmatpush3.bf16.msra.mxu0 %v673_v36 }
 0x6f8   :  { %2266 = vmatprep.subr.bf16.mxu0 %v2484_v0 }
 0x6fb   :  { %2267 = vmatpush3.bf16.msra.mxu0 %v664_v40 }
 0x6fc   :  { %2268 = vmatprep.subr.bf16.mxu0 %v2484_v0 }
 0x6ff   :  { %2269 = vmatpush3.bf16.msra.mxu0 %v663_v44  ;;  %v909_v44 = vld [vmem:[%s3240_s12 + $0x18] sm:$0xff] }
 0x700   :  { %2274 = vmatprep.subr.bf16.mxu0 %v2484_v0 }
 0x702   :  { %2271 = vmatmul.mubr.msk.bf16.vlgmr.msra.gmra.mxu0 %vm666_vm9, %v662_v45  ;;  %v914_v45 = vpack.c.bf16 %v909_v44, %v908_v41 }
 0x703   :  { %2278 = vmatprep.mubr.msk.bf16.mxu0 %vm2485_vm0, %v2484_v0  ;;  %2275 = vmatpush3.bf16.msra.mxu0 %v722_v48  ;;  %v913_v48 = vpack.c.bf16 %v907_v47, %v906_v46 }
 0x704   :  { %2276 = vmatprep.subr.bf16.mxu0 %v2484_v0 }
 0x707   :  { %2277 = vmatpush3.bf16.msra.mxu0 %v721_v51  ;;  %v912_v51 = vpack.c.bf16 %v2736_v12, %v2736_v12 }
 0x708   :  { %859 = vmatprep.subr.bf16.mxu0 %v785_v58  ;;  %v894_v58 = vsub.s32 0, %v893_v56 }
 0x70a   :  { %v895_v12 = vrot.slane %v890_v10, %v894_v58 }
 0x7c2   :  { %v709_v5 = vpop.f32.mrf.mxu0 }
 0x7c3   :  { %v710_v16 = vadd.f32 %v709_v5, %v2686_v53  ;;  %v789_v53 = vld [vmem:[%s3238_s10 + $0x58] sm:$0xff]  ;;  %v899_v5 = vrot.slane %v890_v10, %v898_v13 }
 0x7c4   :  { %v2272_v6 = vpop.f32.mrf.mxu0 }
 0x7c6   :  { %v712_v11 = vpop.f32.mrf.mxu0 }
 0x7c7   :  { %v713_v18 = vadd.f32 %v712_v11, %v2684_v52  ;;  %v787_v52 = vld [vmem:[%s3238_s10 + $0x48] sm:$0xff] }
 0x7c8   :  { %v2273_v19 = vpop.f32.mrf.mxu0  ;;  %v796_v31 = vpack.c.bf16 %v789_v53, %v787_v52 }
 0x7c9   :  { %v720_v24 = vpack.c.bf16 %v713_v18, %v710_v16 }
 0x7ca   :  { %816 = vmatprep.subr.bf16.mxu1 %v796_v31 }
 0x7cb   :  { %2279 = vmatmul.mubr.msk.bf16.vlgmr.msra.gmra.mxu0 %vm102_vm1, %v720_v24 }
 0x7cc   :  { %860 = vmatpush1.bf16.msra.mxu0 %v784_v22  ;;  %879 = vmatprep.mubr.bf16.mxu0 %v2486_v25  ;;  %v786_v25 = vld [vmem:[%s3238_s10 + $0x40] sm:$0xff] }
 0x7cd   :  { %861 = vmatprep.subr.bf16.mxu0 %v783_v26 }
 0x7d0   :  { %862 = vmatpush1.bf16.msra.mxu0 %v782_v30 }
 0x7d1   :  { %2298 = vmatprep.subr.bf16.mxu0 %v2484_v0 }
 0x7d3   :  { %2089 = vmatmul.mubr.msk.bf16.vlgmr.msra.gmra.mxu0 %vm102_vm1, %v2692_v55  ;;  %v788_v55 = vld [vmem:[%s3238_s10 + $0x50] sm:$0xff] }
 0x7d4   :  { %2300 = vmatprep.mubr.msk.bf16.mxu0 %vm2485_vm0, %v2484_v0  ;;  %v795_v32 = vpack.c.bf16 %v788_v55, %v786_v25 }
 0x7d6   :  { %817 = vmatpush1.bf16.msra.mxu1 %v795_v32 }
 0x7d7   :  { %2282 = vmatprep.subr.bf16.mxu1 %v2484_v0 }
 0x88b   :  { %v767_v33 = vpop.f32.mrf.mxu0 }
 0x88c   :  { %v768_v37 = vadd.f32 %v2086_v34, %v767_v33 }
 0x88d   :  { %v2280_v35 = vpop.f32.mrf.mxu0 }
 0x88f   :  { %v770_v36 = vpop.f32.mrf.mxu0 }
 0x890   :  { %v771_v38 = vadd.f32 %v2086_v34, %v770_v36 }
 0x891   :  { %v2281_v39 = vpop.f32.mrf.mxu0 }
 0x892   :  { %v794_v40 = vpack.c.bf16 %v771_v38, %v768_v37 }
 0x893   :  { %v881_v23 = vpop.f32.mrf.mxu0 }
 0x894   :  { %2088 = vmatmul.mubr.msk.bf16.vlgmr.msra.gmra.mxu1 %vm102_vm1, %v794_v40 }
 0x895   :  { %2286 = vmatprep.mubr.msk.bf16.mxu1 %vm2485_vm0, %v2484_v0  ;;  %2283 = vmatpush3.bf16.msra.mxu1 %v914_v45  ;;  %v883_v57 = vpop.f32.mrf.mxu0 }
 0x896   :  { %2284 = vmatprep.subr.bf16.mxu1 %v2484_v0 }
 0x897   :  { %v885_v61 = vpop.f32.mrf.mxu0 }
 0x899   :  { %2285 = vmatpush3.bf16.msra.mxu1 %v913_v48  ;;  %v887_v7 = vpop.f32.mrf.mxu0 }
 0x89a   :  { %2312 = vmatprep.subr.bf16.mxu1 %v2484_v0 }
 0x89c   :  { %2287 = vmatmul.mubr.msk.bf16.vlgmr.msra.gmra.mxu1 %vm102_vm1, %v910_v49 }
 0x89d   :  { %2290 = vmatprep.mubr.msk.bf16.mxu1 %vm2485_vm0, %v2484_v0 }
 0x8a4   :  { %2291 = vmatmul.mubr.msk.bf16.gmra.mxu1 %vm102_vm1, %v911_v50 }
 0x8a5   :  { %2294 = vmatprep.mubr.msk.bf16.mxu1 %vm2485_vm0, %v2484_v0 }
 0x8ac   :  { %2295 = vmatmul.mubr.msk.bf16.gmra.mxu1 %vm102_vm1, %v912_v51 }
 0x8ad   :  { %2314 = vmatprep.mubr.msk.bf16.mxu1 %vm2485_vm0, %v2484_v0 }
 0x954   :  { %v836_v60 = vpop.f32.mrf.mxu1 }
 0x955   :  { %v882_v2 = vadd.f32 %v881_v23, %v836_v60 }
 0x956   :  { %v838_v63 = vpop.f32.mrf.mxu1 }
 0x957   :  { %v884_v4 = vadd.f32 %v883_v57, %v838_v63  ;;  %v902_v11 = vadd.f32 %v895_v12, %v882_v2 }
 0x958   :  { %v840_v3 = vpop.f32.mrf.mxu1 }
 0x959   :  { %v886_v6 = vadd.f32 %v885_v61, %v840_v3  ;;  %v903_v16 = vadd.f32 %v899_v5, %v884_v4 }
 0x95a   :  { %v842_v8 = vpop.f32.mrf.mxu1 }
 0x95b   :  { %v904_v14 = vadd.f32 %v895_v12, %v886_v6  ;;  %v888_v15 = vadd.f32 %v887_v7, %v842_v8 }
 0x95c   :  { %v2911_v26 = vpop.f32.mrf.mxu1 }
 0x95d   :  { %v905_v18 = vadd.f32 %v899_v5, %v888_v15  ;;  %v2890_v19 = vpack.c.bf16 %v904_v14, %v902_v11 }
 0x95e   :  { %v2288_v27 = vpop.f32.mrf.mxu1 }
 0x95f   :  { %v2892_v22 = vpack.c.bf16 %v905_v18, %v903_v16  ;;  %982 = vrot.lane.b32.xlu0 %v2890_v19, %s2488_s11  ;;  %v1109_v27 = vld [vmem:[%s3242_s13 + $0x30] sm:$0xff] }
 0x960   :  { %v961_v28 = vpop.f32.mrf.mxu1 }
 0x961   :  { %v1045_v24 = vand.u32 %v2892_v22, %v2688_v54 }
 0x962   :  { %v2289_v30 = vpop.f32.mrf.mxu1 }
 0x963   :  { %2313 = vmatpush3.bf16.msra.mxu1 %v1045_v24 }
 0x964   :  { %2338 = vmatprep.subr.bf16.mxu1 %v2484_v0  ;;  %v966_v52 = vpop.f32.mrf.mxu1 }
 0x966   :  { %2315 = vmatmul.mubr.msk.bf16.vlgmr.msra.gmra.mxu1 %vm232_vm5, %v2702_v59  ;;  %v2292_v53 = vpop.f32.mrf.mxu1 }
 0x967   :  { %2318 = vmatprep.mubr.msk.bf16.mxu1 %vm2485_vm0, %v2484_v0 }
 0x968   :  { %v969_v31 = vpop.f32.mrf.mxu1 }
 0x96a   :  { %v2293_v25 = vpop.f32.mrf.mxu1 }
 0x96c   :  { %v2913_v55 = vpop.f32.mrf.mxu1 }
 0x96e   :  { %2319 = vmatmul.mubr.msk.bf16.gmra.mxu1 %vm232_vm5, %v2714_v62  ;;  %v2296_v32 = vpop.f32.mrf.mxu1 }
 0x96f   :  { %2322 = vmatprep.mubr.msk.bf16.mxu1 %vm2485_vm0, %v2484_v0 }
 0x970   :  { %v977_v33 = vpop.f32.mrf.mxu1 }
 0x972   :  { %v2297_v34 = vpop.f32.mrf.mxu1 }
 0x976   :  { %2323 = vmatmul.mubr.msk.bf16.gmra.mxu1 %vm232_vm5, %v2723_v1 }
 0x977   :  { %2344 = vmatprep.mubr.msk.bf16.mxu1 %vm2485_vm0, %v2484_v0 }
 0x9d1   :  { %v983_v35 = vpop.permute.xlu0 %982 }
 0x9d2   :  { %v985_v36 = vand.u32 %v983_v35, %v2688_v54 }
 0x9d4   :  { %2299 = vmatpush3.bf16.msra.mxu0 %v985_v36 }
 0x9d5   :  { %2326 = vmatprep.subr.bf16.mxu0 %v2484_v0 }
 0x9d7   :  { %2301 = vmatmul.mubr.msk.bf16.vlgmr.msra.gmra.mxu0 %vm232_vm5, %v2702_v59 }
 0x9d8   :  { %2304 = vmatprep.mubr.msk.bf16.mxu0 %vm2485_vm0, %v2484_v0 }
 0x9df   :  { %2305 = vmatmul.mubr.msk.bf16.gmra.mxu0 %vm232_vm5, %v2714_v62 }
 0x9e0   :  { %2308 = vmatprep.mubr.msk.bf16.mxu0 %vm2485_vm0, %v2484_v0 }
 0x9e7   :  { %2309 = vmatmul.mubr.msk.bf16.gmra.mxu0 %vm232_vm5, %v2723_v1 }
 0x9e8   :  { %2334 = vmatprep.mubr.msk.bf16.mxu0 %vm2485_vm0, %v2484_v0 }
 0xa26   :  { %v1081_v54 = vpop.f32.mrf.mxu1 }
 0xa27   :  { %v1082_v38 = vadd.f32 %v1081_v54, %v2911_v26 }
 0xa28   :  { %v2316_v37 = vpop.f32.mrf.mxu1 }
 0xa2a   :  { %v1084_v59 = vpop.f32.mrf.mxu1 }
 0xa2b   :  { %v1085_v39 = vadd.f32 %v1084_v59, %v961_v28  ;;  %v1105_v59 = vld [vmem:[%s3242_s13 + $0x10] sm:$0xff] }
 0xa2c   :  { %v2317_v40 = vpop.f32.mrf.mxu1 }
 0xa2d   :  { %v2930_v41 = vpack.c.bf16 %v1085_v39, %v1082_v38  ;;  %v1106_v39 = vld [vmem:[%s3242_s13 + $0x18] sm:$0xff] }
 0xa2e   :  { %v1089_v44 = vpop.f32.mrf.mxu1  ;;  %v1112_v40 = vpack.c.bf16 %v1106_v39, %v1105_v59 }
 0xa2f   :  { %v1090_v45 = vadd.f32 %v1089_v44, %v966_v52  ;;  %v1103_v44 = vld [vmem:[%s3242_s13] sm:$0xff] }
 0xa30   :  { %v2320_v62 = vpop.f32.mrf.mxu1 }
 0xa31   :  { %v1104_v62 = vld [vmem:[%s3242_s13 + $0x8] sm:$0xff] }
 0xa32   :  { %v1092_v46 = vpop.f32.mrf.mxu1 }
 0xa33   :  { %v1093_v47 = vadd.f32 %v1092_v46, %v969_v31 }
 0xa34   :  { %v2321_v48 = vpop.f32.mrf.mxu1 }
 0xa35   :  { %v2932_v49 = vpack.c.bf16 %v1093_v47, %v1090_v45  ;;  %v1111_v45 = vpack.c.bf16 %v1104_v62, %v1103_v44 }
 0xa36   :  { %v2934_v1 = vpop.f32.mrf.mxu1 }
 0xa37   :  { %v1098_v46 = vadd.f32 %v2934_v1, %v2913_v55 }
 0xa38   :  { %v2324_v50 = vpop.f32.mrf.mxu1 }
 0xa3a   :  { %v1100_v51 = vpop.f32.mrf.mxu1 }
 0xa3b   :  { %v2999_v51 = vpack.c.bf16 %v1098_v46, %v1098_v46 }
 0xa3c   :  { %v2325_v17 = vpop.f32.mrf.mxu1 }
 0xa97   :  { %v1021_v23 = vpop.f32.mrf.mxu0 }
 0xa98   :  { %v1022_v16 = vadd.f32 %v1021_v23, %v2911_v26  ;;  %v1110_v26 = vld [vmem:[%s3242_s13 + $0x38] sm:$0xff] }
 0xa99   :  { %v2302_v56 = vpop.f32.mrf.mxu0  ;;  %v2960_v30 = vpack.c.bf16 %v1110_v26, %v1109_v27 }
 0xa9b   :  { %v1024_v57 = vpop.f32.mrf.mxu0  ;;  %2327 = vmatpush3.bf16.msra.mxu0 %v2960_v30 }
 0xa9c   :  { %v1025_v14 = vadd.f32 %v1024_v57, %v961_v28  ;;  %v1107_v28 = vld [vmem:[%s3242_s13 + $0x20] sm:$0xff]  ;;  %2328 = vmatprep.subr.bf16.mxu0 %v2484_v0 }
 0xa9d   :  { %v2303_v58 = vpop.f32.mrf.mxu0 }
 0xa9e   :  { %v1170_v18 = vpack.c.bf16 %v1025_v14, %v1022_v16 }
 0xa9f   :  { %v1029_v60 = vpop.f32.mrf.mxu0 }
 0xaa0   :  { %v1030_v8 = vadd.f32 %v1029_v60, %v966_v52  ;;  %v1177_v24 = vsel %vm102_vm1, %v1170_v18, 0  ;;  %v1108_v52 = vld [vmem:[%s3242_s13 + $0x28] sm:$0xff] }
 0xaa1   :  { %v2306_v10 = vpop.f32.mrf.mxu0  ;;  %v2966_v53 = vpack.c.bf16 %v1108_v52, %v1107_v28 }
 0xaa3   :  { %v1032_v13 = vpop.f32.mrf.mxu0  ;;  %2329 = vmatpush3.bf16.msra.mxu0 %v2966_v53 }
 0xaa4   :  { %v1033_v5 = vadd.f32 %v1032_v13, %v969_v31  ;;  %2330 = vmatprep.subr.bf16.mxu0 %v2484_v0 }
 0xaa5   :  { %v2307_v61 = vpop.f32.mrf.mxu0 }
 0xaa6   :  { %v1171_v11 = vpack.c.bf16 %v1033_v5, %v1030_v8 }
 0xaa7   :  { %v1037_v63 = vpop.f32.mrf.mxu0  ;;  %2331 = vmatpush3.bf16.msra.mxu0 %v1112_v40 }
 0xaa8   :  { %v1038_v2 = vadd.f32 %v1037_v63, %v2913_v55  ;;  %v1180_v15 = vsel %vm102_vm1, %v1171_v11, 0  ;;  %2332 = vmatprep.subr.bf16.mxu0 %v2484_v0 }
 0xaa9   :  { %v2310_v12 = vpop.f32.mrf.mxu0 }
 0xaaa   :  { %v2937_v3 = vpack.c.bf16 %v1038_v2, %v1038_v2 }
 0xaab   :  { %v1040_v4 = vpop.f32.mrf.mxu0  ;;  %2333 = vmatpush3.bf16.msra.mxu0 %v1111_v45 }
 0xaac   :  { %v1183_v6 = vsel %vm102_vm1, %v2937_v3, 0  ;;  %2348 = vmatprep.subr.bf16.mxu0 %v2484_v0 }
 0xaad   :  { %v2311_v7 = vpop.f32.mrf.mxu0  ;;  %2339 = vmatpush3.bf16.xpose.msra.mxu1 %v1183_v6 }
 0xaae   :  { %2340 = vmatprep.subr.bf16.mxu1 %v2484_v0 }
 0xab5   :  { %2341 = vmatpush3.bf16.xpose.msra.mxu1 %v1180_v15 }
 0xab6   :  { %2342 = vmatprep.subr.bf16.mxu1 %v2484_v0 }
 0xabd   :  { %2343 = vmatpush3.bf16.xpose.msra.mxu1 %v1177_v24 }
 0xabe   :  { %2376 = vmatprep.subr.bf16.mxu1 %v2484_v0 }
 0xac4   :  { %2345 = vmatmul.mubr.msk.bf16.vlgmr.msra.gmra.mxu1 %vm102_vm1, %v2890_v19 }
 0xac5   :  { %2382 = vmatprep.mubr.msk.bf16.mxu1 %vm2485_vm0, %v2484_v0 }
 0xb84   :  { %v1219_v31 = vpop.f32.mrf.mxu1 }
 0xb85   :  { %v1226_v25 = vmul.f32 0.17677669, %v1219_v31 }
 0xb86   :  { %v2346_v32 = vpop.f32.mrf.mxu1 }
 0xb87   :  { %v1230_v33 = vsel %vm1228_vm10, %v1226_v25, -1e+30 }
 0xb88   :  { %v1222_v34 = vpop.f32.mrf.mxu1  ;;  %v1232_v35 = vsel %vm666_vm9, %v1230_v33, -inf }
 0xb89   :  { %v1227_v36 = vmul.f32 0.17677669, %v1222_v34  ;;  %1233 = vmax.xlane.f32.xlu0 %v1232_v35  ;;  %v2099_v34 = vld [vmem:[%s3243_s14] ss:$0 sm:$0xff] }
 0xb8a   :  { %v2347_v54 = vpop.f32.mrf.mxu1 }
 0xb8b   :  { %v1231_v37 = vsel %vm1229_vm11, %v1227_v36, -1e+30 }
 0xb8c   :  { %v1236_v38 = vsel %vm1235_vm12, %v1231_v37, -inf }
 0xb8d   :  { %1237 = vmax.xlane.f32.xlu1 %v1236_v38 }
 0xb9e   :  { %1123 = vrot.lane.b32.xlu1 %v2892_v22, %s2488_s11  ;;  %v1269_v22 = vand.u32 %v2999_v51, %v2759_v29 }
 0xba2   :  { %1372 = vrot.lane.b32.xlu1 %v1171_v11, %s2489_s1 }
 0xba6   :  { %1370 = vrot.lane.b32.xlu1 %v1170_v18, %s2489_s1 }
 0xc12   :  { %v1234_v47 = vpop.xlane.xlu0 %1233 }
 0xc13   :  { %v1239_v48 = vsub.f32 %v1230_v33, %v1234_v47 }
 0xc15   :  { %v1241_v50 = vmul.f32 1.442695, %v1239_v48 }
 0xc16   :  { %v1238_v17 = vpop.xlane.xlu1 %1237 }
 0xc17   :  { %2458 = vpow2.f32 %v1241_v50  ;;  %v1240_v23 = vsub.f32 %v1231_v37, %v1238_v17 }
 0xc19   :  { %v1243_v56 = vmul.f32 1.442695, %v1240_v23 }
 0xc1a   :  { %v1124_v57 = vpop.permute.xlu1 %1123 }
 0xc1b   :  { %2460 = vpow2.f32 %v1243_v56  ;;  %2335 = vmatmul.mubr.msk.bf16.vlgmr.msra.gmra.mxu0 %vm1125_vm13, %v1124_v57 }
 0xc1c   :  { %2349 = vmatpush3.bf16.msra.mxu0 %v1269_v22  ;;  %2354 = vmatprep.mubr.msk.bf16.mxu0 %vm2485_vm0, %v2484_v0 }
 0xc1d   :  { %2350 = vmatprep.subr.bf16.mxu0 %v2484_v0 }
 0xc1e   :  { %v1373_v52 = vpop.permute.xlu1 %1372 }
 0xc1f   :  { %v1383_v31 = vsel %vm102_vm1, %v1373_v52, 0 }
 0xc20   :  { %2351 = vmatpush3.bf16.msra.mxu0 %v2932_v49 }
 0xc21   :  { %2352 = vmatprep.subr.bf16.mxu0 %v2484_v0 }
 0xc22   :  { %v1371_v25 = vpop.permute.xlu1 %1370 }
 0xc23   :  { %v1380_v32 = vsel %vm102_vm1, %v1371_v25, 0 }
 0xc24   :  { %v2459_v55 = vpop.eup %2458  ;;  %2353 = vmatpush3.bf16.msra.mxu0 %v2930_v41 }
 0xc25   :  { %v1245_v1 = vsel %vm1228_vm10, %v2459_v55, 0.0  ;;  %2358 = vmatprep.subr.bf16.mxu0 %v2484_v0 }
 0xc26   :  { %v1247_v58 = vsel %vm666_vm9, %v1245_v1, 0.0 }
 0xc27   :  { %1248 = vadd.xlane.f32.xlu0 %v1247_v58 }
 0xc28   :  { %v2461_v60 = vpop.eup %2460 }
 0xc29   :  { %v1246_v10 = vsel %vm1229_vm11, %v2461_v60, 0.0 }
 0xc2a   :  { %v1250_v13 = vsel %vm1235_vm12, %v1246_v10, 0.0 }
 0xc2b   :  { %1251 = vadd.xlane.f32.xlu0 %v1250_v13 }
 0xc41   :  { %1374 = vrot.lane.b32.xlu0 %v2937_v3, %s2489_s1 }
 0xc45   :  { %1365 = vrot.lane.b32.xlu0 %v2890_v19, %s2489_s1 }
 0xcb0   :  { %v1249_v61 = vpop.xlane.xlu0 %1248 }
 0xcb1   :  { %v1253_v63 = vadd.f32 1e-16, %v1249_v61 }
 0xcb3   :  { %2462 = vrcp.f32 %v1253_v63 }
 0xcb4   :  { %v1252_v2 = vpop.xlane.xlu0 %1251 }
 0xcb5   :  { %v1254_v12 = vadd.f32 1e-16, %v1252_v2 }
 0xcb7   :  { %2464 = vrcp.f32 %v1254_v12 }
 0xcb8   :  { %v1375_v18 = vpop.permute.xlu0 %1374 }
 0xcb9   :  { %v1386_v28 = vsel %vm102_vm1, %v1375_v18, 0 }
 0xcbc   :  { %v1366_v33 = vpop.permute.xlu0 %1365 }
 0xcc0   :  { %v2463_v4 = vpop.eup %2462 }
 0xcc1   :  { %v1259_v6 = vmul.f32 %v2463_v4, %v1245_v1 }
 0xcc4   :  { %v2465_v5 = vpop.eup %2464 }
 0xcc5   :  { %v1260_v7 = vmul.f32 %v2465_v5, %v1246_v10 }
 0xcc7   :  { %v1261_v8 = vpack.c.bf16 %v1260_v7, %v1259_v6 }
 0xcc9   :  { %2355 = vmatmul.mubr.msk.bf16.vlgmr.msra.gmra.mxu0 %vm666_vm9, %v1261_v8 }
 0xcca   :  { %2359 = vmatpush3.bf16.msra.mxu0 %v1112_v40  ;;  %2362 = vmatprep.mubr.msk.bf16.mxu0 %vm2485_vm0, %v2484_v0 }
 0xccb   :  { %2360 = vmatprep.subr.bf16.mxu0 %v2484_v0 }
 0xcce   :  { %2361 = vmatpush3.bf16.msra.mxu0 %v1111_v45 }
 0xccf   :  { %2366 = vmatprep.subr.bf16.mxu0 %v2484_v0 }
 0xcdb   :  { %v1163_v19 = vpop.f32.mrf.mxu0 }
 0xcdc   :  { %v1164_v35 = vadd.f32 %v2099_v34, %v1163_v19 }
 0xcdd   :  { %v2336_v3 = vpop.f32.mrf.mxu0 }
 0xcdf   :  { %v1166_v11 = vpop.f32.mrf.mxu0 }
 0xce0   :  { %v1167_v38 = vadd.f32 %v2099_v34, %v1166_v11 }
 0xce1   :  { %v2337_v14 = vpop.f32.mrf.mxu0 }
 0xd89   :  { %v1305_v15 = vpop.f32.mrf.mxu0 }
 0xd8b   :  { %v2356_v16 = vpop.f32.mrf.mxu0 }
 0xd8d   :  { %v1308_v24 = vpop.f32.mrf.mxu0 }
 0xd8e   :  { %v1316_v27 = vpack.c.bf16 %v1308_v24, %v1305_v15 }
 0xd8f   :  { %v2357_v26 = vpop.f32.mrf.mxu0 }
 0xd90   :  { %2363 = vmatmul.mubr.msk.bf16.vlgmr.msra.gmra.mxu0 %vm102_vm1, %v1316_v27 }
 0xd91   :  { %2367 = vmatpush3.bf16.xpose.msra.mxu0 %v1386_v28  ;;  %2372 = vmatprep.mubr.msk.bf16.mxu0 %vm2485_vm0, %v2484_v0 }
 0xd92   :  { %2368 = vmatprep.subr.bf16.mxu0 %v2484_v0 }
 0xd99   :  { %2369 = vmatpush3.bf16.xpose.msra.mxu0 %v1383_v31  ;;  %v2478_v31 = vld [vmem:[%s3263_s29] sm:$0xff] }
 0xd9a   :  { %2370 = vmatprep.subr.bf16.mxu0 %v2484_v0 }
 0xda1   :  { %2371 = vmatpush3.bf16.xpose.msra.mxu0 %v1380_v32  ;;  %v2479_v32 = vld [vmem:[%s3263_s29 + $0x8] sm:$0x1] }
 0xda8   :  { %2373 = vmatmul.mubr.msk.bf16.vlgmr.msra.gmra.mxu0 %vm102_vm1, %v1366_v33 }
 0xda9   :  { %2403 = vmatprep.mubr.msk.f32.mxu0 %vm146_vm2, %v2623_v9 }
 0xe50   :  { %v1356_v36 = vpop.f32.mrf.mxu0 }
 0xe51   :  { %v3039_v54 = vadd.f32 %v1356_v36, %v1164_v35 }
 0xe52   :  { %v2364_v37 = vpop.f32.mrf.mxu0 }
 0xe54   :  { %v1359_v59 = vpop.f32.mrf.mxu0 }
 0xe55   :  { %v3041_v39 = vadd.f32 %v1359_v59, %v1167_v38 }
 0xe56   :  { %v2365_v40 = vpop.f32.mrf.mxu0 }
 0xe68   :  { %v1422_v44 = vpop.f32.mrf.mxu0 }
 0xe69   :  { %v1429_v62 = vmul.f32 0.17677669, %v1422_v44  ;;  %v2482_v44 = vld [vmem:[%s3261_s24 + $0x8] sm:$0x1] }
 0xe6a   :  { %v2374_v45 = vpop.f32.mrf.mxu0 }
 0xe6b   :  { %v1431_v9 = vsel %vm1228_vm10, %v1429_v62, -1e+30  ;;  %v2483_v62 = vld [vmem:[%s3261_s24] sm:$0xff] }
 0xe6c   :  { %v1425_v46 = vpop.f32.mrf.mxu0  ;;  %v1433_v47 = vsel %vm666_vm9, %v1431_v9, -inf }
 0xe6d   :  { %v1430_v48 = vmul.f32 0.17677669, %v1425_v46  ;;  %1434 = vmax.xlane.f32.xlu1 %v1433_v47 }
 0xe6e   :  { %v2375_v50 = vpop.f32.mrf.mxu0 }
 0xe6f   :  { %v1432_v17 = vsel %vm1229_vm11, %v1430_v48, -1e+30 }
 0xe70   :  { %v1436_v23 = vsel %vm1235_vm12, %v1432_v17, -inf }
 0xe71   :  { %1437 = vmax.xlane.f32.xlu0 %v1436_v23 }
 0xe7e   :  { %1467 = vrot.lane.b32.xlu1 %v2932_v49, %s2489_s1 }
 0xef6   :  { %v1435_v56 = vpop.xlane.xlu1 %1434 }
 0xef7   :  { %v1439_v22 = vsub.f32 %v1431_v9, %v1435_v56 }
 0xef9   :  { %v1441_v57 = vmul.f32 1.442695, %v1439_v22 }
 0xefa   :  { %v1438_v55 = vpop.xlane.xlu0 %1437  ;;  %v1468_v42 = vpop.permute.xlu1 %1467 }
 0xefb   :  { %2466 = vpow2.f32 %v1441_v57  ;;  %v1440_v1 = vsub.f32 %v1432_v17, %v1438_v55 }
 0xefd   :  { %v1443_v58 = vmul.f32 1.442695, %v1440_v1 }
 0xeff   :  { %2468 = vpow2.f32 %v1443_v58  ;;  %v1921_v58 = vld [vmem:[%s3244_s15 + $0x10] sm:$0xff] }
 0xf08   :  { %v2467_v60 = vpop.eup %2466 }
 0xf09   :  { %v1445_v10 = vsel %vm1228_vm10, %v2467_v60, 0.0  ;;  %v1922_v60 = vld [vmem:[%s3244_s15 + $0x18] sm:$0xff] }
 0xf0a   :  { %v1447_v13 = vsel %vm666_vm9, %v1445_v10, 0.0 }
 0xf0b   :  { %1448 = vadd.xlane.f32.xlu0 %v1447_v13 }
 0xf0c   :  { %v2469_v61 = vpop.eup %2468 }
 0xf0d   :  { %v1446_v63 = vsel %vm1229_vm11, %v2469_v61, 0.0 }
 0xf0e   :  { %v1450_v49 = vsel %vm1235_vm12, %v1446_v63, 0.0 }
 0xf0f   :  { %1451 = vadd.xlane.f32.xlu1 %v1450_v49 }
 0xf20   :  { %1465 = vrot.lane.b32.xlu1 %v2930_v41, %s2489_s1 }
 0xf21   :  { %1469 = vrot.lane.b32.xlu0 %v2999_v51, %s2489_s1 }
 0xf24   :  { %1573 = vrot.lane.b32.xlu1 %v2657_v21, %s2489_s1 }
 0xf25   :  { %1575 = vrot.lane.b32.xlu0 %v2655_v20, %s2489_s1 }
 0xf94   :  { %v1449_v2 = vpop.xlane.xlu0 %1448 }
 0xf95   :  { %v1453_v12 = vadd.f32 1e-16, %v1449_v2  ;;  %v1920_v2 = vld [vmem:[%s3244_s15 + $0x8] sm:$0xff] }
 0xf97   :  { %2470 = vrcp.f32 %v1453_v12 }
 0xf98   :  { %v1452_v43 = vpop.xlane.xlu1 %1451  ;;  %v1470_v4 = vpop.permute.xlu0 %1469 }
 0xf99   :  { %v1454_v5 = vadd.f32 1e-16, %v1452_v43  ;;  %v1477_v6 = vand.u32 %v1470_v4, %v2759_v29 }
 0xf9b   :  { %2472 = vrcp.f32 %v1454_v5  ;;  %2377 = vmatpush3.bf16.msra.mxu1 %v1477_v6  ;;  %v1997_v5 = vld [vmem:[%s3245_s17 + $0x70] sm:$0xff]  ;;  %v1998_v6 = vld [vmem:[%s3245_s17 + $0x78] sm:$0xff] }
 0xf9c   :  { %2378 = vmatprep.subr.bf16.mxu1 %v2484_v0  ;;  %v1466_v41 = vpop.permute.xlu1 %1465  ;;  %v1576_v34 = vpop.permute.xlu0 %1575 }
 0xf9f   :  { %2379 = vmatpush3.bf16.msra.mxu1 %v1468_v42  ;;  %v1919_v42 = vld [vmem:[%s3244_s15] sm:$0xff] }
 0xfa0   :  { %2380 = vmatprep.subr.bf16.mxu1 %v2484_v0  ;;  %v1574_v36 = vpop.permute.xlu1 %1573  ;;  %v1924_v12 = vpack.c.bf16 %v1920_v2, %v1919_v42 }
 0xfa3   :  { %2381 = vmatpush3.bf16.msra.mxu1 %v1466_v41  ;;  %v1995_v41 = vld [vmem:[%s3245_s17 + $0x60] sm:$0xff] }
 0xfa4   :  { %2386 = vmatprep.subr.bf16.mxu1 %v2484_v0  ;;  %v2471_v51 = vpop.eup %2470 }
 0xfa5   :  { %v1459_v8 = vmul.f32 %v2471_v51, %v1445_v10  ;;  %v1925_v10 = vpack.c.bf16 %v1922_v60, %v1921_v58  ;;  %v2007_v51 = vpack.c.bf16 %v1998_v6, %v1997_v5 }
 0xfa8   :  { %v2473_v7 = vpop.eup %2472 }
 0xfa9   :  { %v1460_v19 = vmul.f32 %v2473_v7, %v1446_v63  ;;  %v1996_v7 = vld [vmem:[%s3245_s17 + $0x68] sm:$0xff] }
 0xfab   :  { %v1461_v3 = vpack.c.bf16 %v1460_v19, %v1459_v8  ;;  %v2006_v8 = vpack.c.bf16 %v1996_v7, %v1995_v41  ;;  %v1993_v19 = vld [vmem:[%s3245_s17 + $0x50] sm:$0xff] }
 0xfad   :  { %2383 = vmatmul.mubr.msk.bf16.vlgmr.msra.gmra.mxu1 %vm666_vm9, %v1461_v3  ;;  %v1994_v3 = vld [vmem:[%s3245_s17 + $0x58] sm:$0xff] }
 0xfae   :  { %2387 = vmatpush3.bf16.msra.mxu1 %v2960_v30  ;;  %2390 = vmatprep.mubr.msk.bf16.mxu1 %vm2485_vm0, %v2484_v0 }
 0xfaf   :  { %2388 = vmatprep.subr.bf16.mxu1 %v2484_v0 }
 0xfb2   :  { %2389 = vmatpush3.bf16.msra.mxu1 %v2966_v53 }
 0xfb3   :  { %2394 = vmatprep.subr.mxu1 %v2484_v0 }
0x106d   :  { %v1513_v29 = vpop.f32.mrf.mxu1 }
0x106f   :  { %v2384_v11 = vpop.f32.mrf.mxu1 }
0x1070   :  { %v1991_v11 = vld [vmem:[%s3245_s17 + $0x40] sm:$0xff] }
0x1071   :  { %v1516_v14 = vpop.f32.mrf.mxu1 }
0x1072   :  { %v1520_v15 = vpack.c.bf16 %v1516_v14, %v1513_v29  ;;  %v2005_v29 = vpack.c.bf16 %v1994_v3, %v1993_v19  ;;  %v1992_v14 = vld [vmem:[%s3245_s17 + $0x48] sm:$0xff] }
0x1073   :  { %v2385_v16 = vpop.f32.mrf.mxu1 }
0x1074   :  { %2391 = vmatmul.mubr.msk.bf16.vlgmr.msra.gmra.mxu1 %vm102_vm1, %v1520_v15  ;;  %v2004_v15 = vpack.c.bf16 %v1992_v14, %v1991_v11  ;;  %v1989_v16 = vld [vmem:[%s3245_s17 + $0x30] sm:$0xff] }
0x1075   :  { %2398 = vmatprep.mubr.msk.f32.mxu1 %vm2485_vm0, %v2484_v0 }
0x1134   :  { %v1558_v30 = vpop.f32.mrf.mxu1 }
0x1135   :  { %v1565_v18 = vadd.f32 %v1558_v30, %v3039_v54  ;;  %v1990_v30 = vld [vmem:[%s3245_s17 + $0x38] sm:$0xff] }
0x1136   :  { %v2392_v24 = vpop.f32.mrf.mxu1 }
0x1137   :  { %v1567_v26 = vmul.f32 %v1565_v18, %v2657_v21  ;;  %v2003_v18 = vpack.c.bf16 %v1990_v30, %v1989_v16 }
0x1138   :  { %v1561_v27 = vpop.f32.mrf.mxu1 }
0x1139   :  { %v1566_v53 = vadd.f32 %v1561_v27, %v3041_v39  ;;  %v1569_v25 = vadd.f32 %v2478_v31, %v1567_v26  ;;  %v2481_v39 = vld [vmem:[%s3233_s7] sm:$0x3]  ;;  %v1988_v31 = vld [vmem:[%s3245_s17 + $0x28] sm:$0xff] }
0x113a   :  { %v2393_v28 = vpop.f32.mrf.mxu1 }
0x113b   :  { %v1568_v52 = vmul.f32 %v2655_v20, %v1566_v53  ;;  %v3091_v21 = vadd.f32 %v1574_v36, %v1569_v25  ;;  %v2480_v20 = vld [vmem:[%s3264_s23] sm:$0x3] }
0x113c   :  { %v1983_v36 = vld [vmem:[%s3245_s17] sm:$0xff] }
0x113d   :  { %v1570_v33 = vadd.f32 %v2479_v32, %v1568_v52  ;;  %v1987_v52 = vld [vmem:[%s3245_s17 + $0x20] sm:$0xff]  ;;  %v1985_v32 = vld [vmem:[%s3245_s17 + $0x10] sm:$0xff] }
0x113e   :  { %v2002_v25 = vpack.c.bf16 %v1988_v31, %v1987_v52 }
0x113f   :  { %v3089_v35 = vadd.f32 %v1576_v34, %v1570_v33  ;;  %v1986_v33 = vld [vmem:[%s3245_s17 + $0x18] sm:$0xff] }
0x1140   :  { %v2001_v34 = vpack.c.bf16 %v1986_v33, %v1985_v32 }
0x1141   :  { %2395 = vmatpush3.msk.msra.mxu1 %vm236_vm4, %v3089_v35 }
0x1142   :  { %2396 = vmatprep.subr.mxu1 %v2484_v0 }
0x1143   :  { %2397 = vmatpush3.msra.mxu1 %v3091_v21 }
0x1144   :  { %2399 = vmatmul.mubr.msk.f32.vlgmr.msra.gmra.mxu1 %vm232_vm5, %v2480_v20  ;;  %2406 = vmatprep.subr.mxu1 %v2484_v0 }
0x1145   :  { %2410 = vmatprep.mubr.msk.f32.mxu1 %vm2485_vm0, %v2484_v0 }
0x1204   :  { %v1650_v54 = vpop.f32.mrf.mxu1 }
0x1205   :  { %v1654_v37 = vsel %vm310_vm6, %v1650_v54, 0.0 }
0x1206   :  { %1655 = vadd.xlane.f32.xlu0 %v1654_v37  ;;  %v2400_v38 = vpop.f32.mrf.mxu1  ;;  %v2117_v37 = vld [vmem:[%s3246_s16] ss:$0 sm:$0xff] }
0x128f   :  { %v1656_v59 = vpop.xlane.xlu0 %1655 }
0x1290   :  { %v1657_v40 = vmul.f32 %v2481_v39, %v1656_v59 }
0x1292   :  { %2401 = vmatprep.subr.msk.mxu0 %vm153_vm3, %v1657_v40 }
0x1293   :  { %2402 = vmatpush3.msk.msra.mxu0 %vm153_vm3, %v1657_v40 }
0x1294   :  { %2404 = vmatmul.mubr.msk.f32.vlgmr.msra.gmra.mxu0 %vm146_vm2, %v2482_v44 }
0x1295   :  { %2415 = vmatprep.mubr.msk.f32.mxu0 %vm146_vm2, %v2483_v62 }
0x1354   :  { %v2405_v45 = vpop.f32.mrf.mxu0 }
0x1355   :  { %1743 = vperm.xlu1 %2453, %v2405_v45  }
0x1356   :  { %v1727_v9 = vpop.f32.mrf.mxu0 }
0x1359   :  { %1738 = vperm.xlu1 %2453, %v1727_v9  }
0x13d0   :  { %v1744_v46 = vpop.permute.xlu1 %1743 }
0x13d1   :  { %v3119_v47 = vsub.f32 %v3089_v35, %v1744_v46 }
0x13d3   :  { %v1749_v48 = vmul.f32 %v3119_v47, %v3119_v47 }
0x13d4   :  { %v1739_v50 = vpop.permute.xlu1 %1738 }
0x13d5   :  { %v3124_v17 = vsub.f32 %v3091_v21, %v1739_v50  ;;  %2407 = vmatpush3.msk.msra.mxu1 %vm236_vm4, %v1749_v48  ;;  %v2119_v50 = vld [vmem:[%s3247_s18] ss:$0 sm:$0xff] }
0x13d6   :  { %2408 = vmatprep.subr.mxu1 %v2484_v0 }
0x13d7   :  { %v1748_v23 = vmul.f32 %v3124_v17, %v3124_v17 }
0x13d9   :  { %2409 = vmatpush3.msra.mxu1 %v1748_v23 }
0x13da   :  { %2411 = vmatmul.mubr.msk.f32.vlgmr.msra.gmra.mxu1 %vm232_vm5, %v2480_v20  ;;  %2418 = vmatprep.subr.bf16.mxu1 %v2484_v0  ;;  %v1984_v20 = vld [vmem:[%s3245_s17 + $0x8] sm:$0xff] }
0x13db   :  { %2422 = vmatprep.mubr.msk.bf16.mxu1 %vm2485_vm0, %v2484_v0  ;;  %2419 = vmatpush3.bf16.msra.mxu1 %v1925_v10  ;;  %v2000_v54 = vpack.c.bf16 %v1984_v20, %v1983_v36 }
0x13dc   :  { %2420 = vmatprep.subr.bf16.mxu1 %v2484_v0 }
0x13df   :  { %2421 = vmatpush3.bf16.msra.mxu1 %v1924_v12 }
0x149a   :  { %v1819_v56 = vpop.f32.mrf.mxu1 }
0x149b   :  { %v1823_v22 = vsel %vm310_vm6, %v1819_v56, 0.0 }
0x149c   :  { %1824 = vadd.xlane.f32.xlu1 %v1823_v22  ;;  %v2412_v57 = vpop.f32.mrf.mxu1 }
0x1525   :  { %v1825_v55 = vpop.xlane.xlu1 %1824 }
0x1526   :  { %v1826_v1 = vmul.f32 %v2481_v39, %v1825_v55 }
0x1528   :  { %2413 = vmatprep.subr.msk.mxu0 %vm153_vm3, %v1826_v1 }
0x1529   :  { %2414 = vmatpush3.msk.msra.mxu0 %vm153_vm3, %v1826_v1 }
0x152a   :  { %2416 = vmatmul.mubr.msk.f32.vlgmr.msra.gmra.mxu0 %vm146_vm2, %v2482_v44  ;;  %2426 = vmatprep.subr.bf16.mxu0 %v2484_v0 }
0x152b   :  { %2442 = vmatprep.mubr.msk.bf16.mxu0 %vm2485_vm0, %v2484_v0  ;;  %2427 = vmatpush3.bf16.msra.mxu0 %v2007_v51  ;;  %vm2061_vm0 = vcmask 253952  }
0x152c   :  { %2428 = vmatprep.subr.bf16.mxu0 %v2484_v0 }
0x152f   :  { %2429 = vmatpush3.bf16.msra.mxu0 %v2006_v8 }
0x1530   :  { %2430 = vmatprep.subr.bf16.mxu0 %v2484_v0 }
0x1533   :  { %2431 = vmatpush3.bf16.msra.mxu0 %v2005_v29 }
0x1534   :  { %2432 = vmatprep.subr.bf16.mxu0 %v2484_v0 }
0x1537   :  { %2433 = vmatpush3.bf16.msra.mxu0 %v2004_v15 }
0x1538   :  { %2434 = vmatprep.subr.bf16.mxu0 %v2484_v0 }
0x153b   :  { %2435 = vmatpush3.bf16.msra.mxu0 %v2003_v18 }
0x153c   :  { %2436 = vmatprep.subr.bf16.mxu0 %v2484_v0 }
0x153f   :  { %2437 = vmatpush3.bf16.msra.mxu0 %v2002_v25 }
0x1540   :  { %2438 = vmatprep.subr.bf16.mxu0 %v2484_v0 }
0x1543   :  { %2439 = vmatpush3.bf16.msra.mxu0 %v2001_v34 }
0x1544   :  { %2440 = vmatprep.subr.bf16.mxu0 %v2484_v0 }
0x1547   :  { %2441 = vmatpush3.bf16.msra.mxu0 %v2000_v54 }
0x15ea   :  { %v2417_v13 = vpop.f32.mrf.mxu0 }
0x15eb   :  { %v1902_v61 = vadd.f32 1e-05, %v2417_v13 }
0x15ec   :  { %v1896_v63 = vpop.f32.mrf.mxu0 }
0x15ed   :  { %2474 = vrsqrt.f32 %v1902_v61  ;;  %v1897_v49 = vadd.f32 1e-05, %v1896_v63 }
0x15ef   :  { %2476 = vrsqrt.f32 %v1897_v49 }
0x15fa   :  { %v2475_v43 = vpop.eup %2474 }
0x15fb   :  { %1914 = vperm.xlu1 %2453, %v2475_v43  }
0x15fc   :  { %v2477_v4 = vpop.eup %2476 }
0x15fd   :  { %1909 = vperm.xlu0 %2452, %v2477_v4  }
0x1676   :  { %v1915_v24 = vpop.permute.xlu1 %1914 }
0x1677   :  { %v1918_v26 = vmul.f32 %v1915_v24, %v3119_v47 }
0x1678   :  { %v1910_v27 = vpop.permute.xlu0 %1909 }
0x1679   :  { %v1917_v53 = vmul.f32 %v1910_v27, %v3124_v17 }
0x167b   :  { %v1923_v28 = vpack.c.bf16 %v1918_v26, %v1917_v53 }
0x167d   :  { %2423 = vmatmul.mubr.msk.bf16.vlgmr.msra.gmra.mxu1 %vm102_vm1, %v1923_v28 }
0x173d   :  { %v1970_v38 = vpop.f32.mrf.mxu1 }
0x173e   :  { %v1971_v59 = vadd.f32 %v2117_v37, %v1970_v38 }
0x173f   :  { %v2424_v39 = vpop.f32.mrf.mxu1 }
0x1740   :  { %v1979_v44 = vmul.f32 0.01, %v1971_v59  ;;  %vm1977_vm14 = vcmp.gt.f32.partialorder %v1971_v59, 0.0 }
0x1741   :  { %v1973_v40 = vpop.f32.mrf.mxu1 }
0x1742   :  { %v1974_v0 = vadd.f32 %v2117_v37, %v1973_v40  ;;  %v1981_v9 = vsel %vm1977_vm14, %v1971_v59, %v1979_v44 }
0x1743   :  { %v2425_v62 = vpop.f32.mrf.mxu1 }
0x1744   :  { %vm1978_vm15 = vcmp.gt.f32.partialorder %v1974_v0, 0.0  ;;  %v1980_v45 = vmul.f32 0.01, %v1974_v0 }
0x1746   :  { %v1982_v46 = vsel %vm1978_vm15, %v1974_v0, %v1980_v45 }
0x1747   :  { %v1999_v47 = vpack.c.bf16 %v1982_v46, %v1981_v9 }
0x1749   :  { %2443 = vmatmul.mubr.bf16.vlgmr.msra.gmra.mxu0 %v1999_v47 }
0x1809   :  { %v2042_v48 = vpop.f32.mrf.mxu0 }
0x180a   :  { %v2049_v17 = vadd.f32 %v2042_v48, %v3091_v21 }
0x180b   :  { %v2444_v23 = vpop.f32.mrf.mxu0 }
0x180c   :  { %v2058_v56 = vadd.f32 %v2119_v50, %v2049_v17 }
0x180d   :  { %v2045_v22 = vpop.f32.mrf.mxu0 }
0x180e   :  { %2060 = vst.msk [vmem:[%s3248_s21] sm:$0xff] %vm102_vm1, %v2058_v56  ;;  %v2050_v57 = vadd.f32 %v2045_v22, %v3089_v35 }
0x180f   :  { %v2445_v55 = vpop.f32.mrf.mxu0 }
0x1810   :  { %v2059_v1 = vadd.f32 %v2119_v50, %v2050_v57 }
0x1812   :  { %2062 = vst.msk [vmem:[%s3248_s21 + $0x8] sm:$0x1] %vm2061_vm0, %v2059_v1 }

// kernel: _lambda_.22
= control target key start
LH: loop header
LB: loop body
LE: loop exit
PB: predicated region body
PF: predicated region fallthrough
CT: control target
= control target key end

     0   :  { %v129_v3 = vmov 0.0   ;;  %vm130_vm0 = vmmov 0   ;;  %s173_s0 = inlined_call_operand.vmem [shape: f32[7,32], index: 0, kind: input, shape index: {}]   ;;  %s174_s1 = inlined_call_operand.vmem [shape: f32[32,8], index: 1, kind: input, shape index: {}]   ;;  %s175_s2 = inlined_call_operand.vmem [shape: f32[1,8], index: 2, kind: input, shape index: {}]   ;;  %s176_s3 = inlined_call_operand.hbm [shape: f32[7,8], index: 3, kind: output, shape index: {}]  }
   0x1   :  { %v19_v0 = vld [vmem:[%s174_s1 + $0x10] sm:$0xff]  ;;  %v20_v1 = vld [vmem:[%s174_s1 + $0x18] sm:$0xff]  ;;  %v17_v2 = vld [vmem:[%s174_s1] sm:$0xff]  ;;  %96 = vmatprep.subr.bf16.mxu0 %v129_v3  ;;  %100 = vmatprep.mubr.msk.bf16.mxu0 %vm130_vm0, %v129_v3 }
   0x2   :  { %v24_v4 = vpack.c.bf16 %v20_v1, %v19_v0  ;;  %v18_v5 = vld [vmem:[%s174_s1 + $0x8] sm:$0xff] }
   0x3   :  { %8 = vsyncpa [#allocation3], 0  ;;  %v23_v6 = vpack.c.bf16 %v18_v5, %v17_v2  ;;  %v16_v7 = vld [vmem:[%s173_s0] sm:$0x7f]  ;;  %vm31_vm1 = vcmask 261120   ;;  %s131_s24 = smov [#allocation2]  }
   0x4   :  { %97 = vmatpush3.bf16.msra.mxu0 %v24_v4  ;;  %v22_v8 = vpack.c.bf16 %v16_v7, %v16_v7  ;;  %v91_v9 = vld [vmem:[%s175_s2] ss:$0 sm:$0xff]  ;;  %s83_s1 = sshll.u32 %s131_s24, 4  ;;  %vm75_vm2 = vcmask 63488   ;;  %s84_s1 = int_to_ptr.vmem [resolvable:$true] %s83_s1 }
   0x5   :  { %98 = vmatprep.subr.bf16.mxu0 %v129_v3  ;;  %s107_s25 = scalar_lea.vmem %s84_s1, 128  ;;  %p112_p1 = scmp.lt.s32.totalorder %s84_s1, %s84_s1 }
   0x6   :  { %p108_p0 = scmp.ne.s32.totalorder %s84_s1, %s107_s25  ;;  %p113_p2 = scmp.lt.s32.totalorder %s107_s25, %s107_s25 }
   0x8   :  { %99 = vmatpush3.bf16.msra.mxu0 %v23_v6  ;;  %p114_p3 = por %p113_p2, %p112_p1 }
   0xa   :  { %p115_p4 = pnand %p114_p3, %p108_p0 }
   0xb   :  { %101 = vmatmul.mubr.msk.bf16.vlgmr.msra.gmra.mxu0 %vm31_vm1, %v22_v8 }
  0xcb   :  { %v69_v10 = vpop.f32.mrf.mxu0 }
  0xcc   :  { %v70_v11 = vadd.f32 %v91_v9, %v69_v10 }
  0xcd   :  { %v102_v12 = vpop.f32.mrf.mxu0 }
  0xce   :  { %76 = vst.msk [vmem:[#allocation2] sm:$0x7f] %vm75_vm2, %v70_v11 }
  0xcf   :  { %v72_v13 = vpop.f32.mrf.mxu0 }
  0xd0   :  { %118 = shalt.err (!%p115_p4)
}
  0xd1   :  { %86 = dma.vmem_to_hbm [thread:$0]  %s84_s1, 128, %s176_s3, [#allocation3]   ;;  %v103_v14 = vpop.f32.mrf.mxu0 }
  0xd2   :  { %127 = dma.done.wait [#allocation3], 128  }
  0xd3   :  { %128 = vsyncadd [#allocation3], 4294967168 }
  0xd4   :  { %90 = vsyncpa [#allocation3], 1 }

</bundles_post_ra>
